<compile_context>
chip_gen: v5e
topology: v5e:2x2
jax: 0.10.0
libtpu: 0.0.40
codegen_flags: <defaults>
</compile_context>

<pallas_src>
import functools

import numpy as np
import jax
import jax.numpy as jnp
from jax.experimental import pallas as pl
from jax.experimental.pallas import tpu as pltpu


# --------------------------- fused kernel body ------------------------------ #

def _lenet_kernel(x_ref, r1_ref, b1_ref, s1_ref, r2_ref, b2_ref, e2_ref,
                  w1_ref, c1_ref, w2_ref, c2_ref, w3_ref, c3_ref, o_ref, *, tb):
    """Whole LeNet forward for a tile of `tb` images.

    x_ref : (tb*32, 96)        packed channels-last images, rows merged
    r1_ref: (5, 96, 512)       conv1 Toeplitz, even cols in [:256], odd in [256:]
    b1_ref: (1, 256)           conv1 bias tiled over pooled width (pad cols = 0)
    s1_ref: (tb*16, tb*32)     0/1 block-diag selector: row 2*hp of each image
    r2_ref: (5, 256, 256)      conv2 Toeplitz, even cols in [:128], odd in [128:]
    b2_ref: (1, 128)           conv2 bias row
    e2_ref: (5, tb, tb*16)     0/1 selectors: conv2 pooled row h of each image
    w1_ref: (5, 128, 128)      fc1 split per conv2 output height
    c1/w2/c2/w3/c3             fc biases / weights, padded to 128 lanes
    o_ref : (tb, 128)          padded logits
    """
    f32 = jnp.float32
    rows1 = tb * 32
    x = x_ref[...]                                           # (tb*32, 96)

    # ---- conv1 (5x5 valid) as 5 row-shifted Toeplitz matmuls ---------------
    acc1 = jnp.dot(x, r1_ref[0], preferred_element_type=f32)
    for i in range(1, 5):
        xs = pltpu.roll(x, shift=rows1 - i, axis=0)          # xs[r] = x[r + i]
        acc1 = acc1 + jnp.dot(xs, r1_ref[i], preferred_element_type=f32)
    # width-wise 2x2 max: even conv columns vs odd conv columns
    aw1 = jnp.maximum(acc1[:, :256], acc1[:, 256:])
    # height-wise 2x2 max (row r vs r+1), then select even rows per image
    m1 = jnp.maximum(aw1, pltpu.roll(aw1, shift=rows1 - 1, axis=0))
    a1 = jnp.maximum(
        jnp.dot(s1_ref[...], m1, preferred_element_type=f32) + b1_ref[...],
        0.0)                                                 # (tb*16, 256)

    # ---- conv2 --------------------------------------------------------------
    rows2 = tb * 16
    acc2 = jnp.dot(a1, r2_ref[0], preferred_element_type=f32)
    for i in range(1, 5):
        a1s = pltpu.roll(a1, shift=rows2 - i, axis=0)
        acc2 = acc2 + jnp.dot(a1s, r2_ref[i], preferred_element_type=f32)
    aw2 = jnp.maximum(acc2[:, :128], acc2[:, 128:])
    m2 = jnp.maximum(aw2, pltpu.roll(aw2, shift=rows2 - 1, axis=0))

    # ---- fc1 fused with conv2 height-pool row selection, then fc2/fc3 ------
    z = jnp.zeros((tb, 128), f32)
    for h in range(5):
        a2h = jnp.maximum(
            jnp.dot(e2_ref[h], m2, preferred_element_type=f32) + b2_ref[...],
            0.0)                                             # (tb, 128)
        z = z + jnp.dot(a2h, w1_ref[h], preferred_element_type=f32)
    z = jnp.maximum(z + c1_ref[...], 0.0)                    # fc1 + ReLU
    z = jnp.maximum(
        jnp.dot(z, w2_ref[...], preferred_element_type=f32) + c2_ref[...], 0.0)
    o_ref[...] = (jnp.dot(z, w3_ref[...], preferred_element_type=f32)
                  + c3_ref[...])


# ------------------------------ parameters ---------------------------------- #

def _uniform(key, shape, fan_in):
    bound = 1.0 / jnp.sqrt(jnp.float32(fan_in))
    return jax.random.uniform(key, shape, jnp.float32, -bound, bound)


def init_params(key):
    """Raw parameters (torch shapes; conv OIHW, fc as (in, out)).

    Note: fc1 consumes features flattened in (h, w, c) order (our packed
    channels-last layout) rather than torch's (c, h, w) .view order.  With
    self-initialized weights the models are equivalent; to load torch-trained
    weights, permute fc1_w's input rows accordingly.
    """
    ks = jax.random.split(key, 10)
    return {
        "conv1_w": _uniform(ks[0], (6, 3, 5, 5), 3 * 5 * 5),
        "conv1_b": _uniform(ks[1], (6,), 3 * 5 * 5),
        "conv2_w": _uniform(ks[2], (16, 6, 5, 5), 6 * 5 * 5),
        "conv2_b": _uniform(ks[3], (16,), 6 * 5 * 5),
        "fc1_w": _uniform(ks[4], (400, 120), 400),
        "fc1_b": _uniform(ks[5], (120,), 400),
        "fc2_w": _uniform(ks[6], (120, 84), 120),
        "fc2_b": _uniform(ks[7], (84,), 120),
        "fc3_w": _uniform(ks[8], (84, 10), 84),
        "fc3_b": _uniform(ks[9], (10,), 84),
    }


def _pack_conv(w, b, *, in_width, real_in_width, cin_pad, wp_pad, cout_pad):
    """Pack a torch-layout conv weight (Cout,Cin,kh,kw) into row-shift Toeplitz
    matmul operands.  For packed input x[h, ic*cin_pad + c]:

        sum_i x[h+i, :] @ r[i]  yields, at column  p*cout_pad + co,
        conv(x)[h, 2p, co] (even half) and at 'off + p*cout_pad + co' the odd
        conv column conv(x)[h, 2p+1, co].   Pooled-width pad columns stay 0.
    """
    w = np.asarray(w, np.float32)
    b = np.asarray(b, np.float32)
    cout, cin, kh, kw = w.shape
    wo = real_in_width - kw + 1           # real conv output width
    wp = wo // 2                          # real pooled width
    wt = np.zeros((kh, kw, cin_pad, cout_pad), np.float32)
    wt[:, :, :cin, :cout] = np.transpose(w, (2, 3, 1, 0))
    r = np.zeros((kh, in_width * cin_pad, 2 * wp_pad * cout_pad), np.float32)
    for parity in (0, 1):
        off = parity * wp_pad * cout_pad
        for i in range(kh):
            for p in range(wp):
                oc = 2 * p + parity       # conv output column
                for j in range(kw):
                    ic = oc + j           # input column
                    r[i, ic * cin_pad:(ic + 1) * cin_pad,
                      off + p * cout_pad: off + (p + 1) * cout_pad] += wt[i, j]
    brow = np.zeros((1, wp_pad * cout_pad), np.float32)
    for p in range(wp):
        brow[0, p * cout_pad: p * cout_pad + cout] = b
    return jnp.asarray(r), jnp.asarray(brow)


def _pad2(m, rows, cols):
    out = np.zeros((rows, cols), np.float32)
    mm = np.asarray(m, np.float32)
    out[:mm.shape[0], :mm.shape[1]] = mm
    return jnp.asarray(out)


def pack_params(p):
    """One-time host repacking into kernel-friendly, lane-dense operands."""
    r1, b1row = _pack_conv(p["conv1_w"], p["conv1_b"], in_width=32,
                           real_in_width=32, cin_pad=3, wp_pad=16, cout_pad=16)
    r2, b2row = _pack_conv(p["conv2_w"], p["conv2_b"], in_width=16,
                           real_in_width=14, cin_pad=16, wp_pad=8, cout_pad=16)
    # fc1 (400,120) with rows in (h, w, c) order -> (5, 128, 128) split by h.
    fc1 = np.asarray(p["fc1_w"], np.float32)
    w1 = np.zeros((5, 128, 128), np.float32)
    for h in range(5):
        for wpos in range(5):
            w1[h, wpos * 16:(wpos + 1) * 16, :120] = \
                fc1[h * 80 + wpos * 16: h * 80 + (wpos + 1) * 16]
    return {
        "r1": r1, "b1row": b1row,            # (5, 96, 512), (1, 256)
        "r2": r2, "b2row": b2row,            # (5, 256, 256), (1, 128)
        "w1": jnp.asarray(w1),               # (5, 128, 128)
        "b1fc": _pad2(np.asarray(p["fc1_b"]).reshape(1, -1), 1, 128),
        "w2": _pad2(p["fc2_w"], 128, 128),
        "b2fc": _pad2(np.asarray(p["fc2_b"]).reshape(1, -1), 1, 128),
        "w3": _pad2(p["fc3_w"], 128, 128),
        "b3fc": _pad2(np.asarray(p["fc3_b"]).reshape(1, -1), 1, 128),
    }


# --------------------------- host-side selectors ----------------------------- #

def _height_pool_select(tb):
    """S[b*16 + hp, b*32 + 2*hp] = 1 for hp < 14 (conv1 even-row picker)."""
    s = np.zeros((tb * 16, tb * 32), np.float32)
    for b in range(tb):
        for hp in range(14):
            s[b * 16 + hp, b * 32 + 2 * hp] = 1.0
    return s


def _fc_row_select(tb):
    """E[h, b, b*16 + 2*h] = 1 for h < 5 (conv2 pooled-row picker per height)."""
    e = np.zeros((5, tb, tb * 16), np.float32)
    for h in range(5):
        for b in range(tb):
            e[h, b, b * 16 + 2 * h] = 1.0
    return e


def _pick_tb(batch):
    if batch <= 8:
        return batch          # single full-extent block
    if batch >= 32:
        return 16
    return 8                  # keeps grid >= 2 (megacore on v7x)


# ------------------------------ forward pass --------------------------------- #

def forward(packed, x):
    """x: (B, 3, 32, 32) NCHW float32 (PyTorch layout); returns (B, 10) logits."""
    B = x.shape[0]
    tb = _pick_tb(B)
    nb = -(-B // tb)
    Bp = nb * tb
    # Single layout conversion into packed channels-last, rows merged.
    xp = jnp.transpose(x, (0, 2, 3, 1)).reshape(B * 32, 32 * 3)
    if Bp != B:               # zero-pad so every grid block is full (no OOB)
        xp = jnp.pad(xp, ((0, (Bp - B) * 32), (0, 0)))
    s1 = jnp.asarray(_height_pool_select(tb))
    e2 = jnp.asarray(_fc_row_select(tb))

    kernel = functools.partial(_lenet_kernel, tb=tb)
    out = pl.pallas_call(
        kernel,
        out_shape=jax.ShapeDtypeStruct((Bp, 128), jnp.float32),
        grid=(nb,),
        in_specs=[
            pl.BlockSpec((tb * 32, 96), lambda i: (i, 0)),
            pl.BlockSpec((5, 96, 512), lambda i: (0, 0, 0)),
            pl.BlockSpec((1, 256), lambda i: (0, 0)),
            pl.BlockSpec((tb * 16, tb * 32), lambda i: (0, 0)),
            pl.BlockSpec((5, 256, 256), lambda i: (0, 0, 0)),
            pl.BlockSpec((1, 128), lambda i: (0, 0)),
            pl.BlockSpec((5, tb, tb * 16), lambda i: (0, 0, 0)),
            pl.BlockSpec((5, 128, 128), lambda i: (0, 0, 0)),
            pl.BlockSpec((1, 128), lambda i: (0, 0)),
            pl.BlockSpec((128, 128), lambda i: (0, 0)),
            pl.BlockSpec((1, 128), lambda i: (0, 0)),
            pl.BlockSpec((128, 128), lambda i: (0, 0)),
            pl.BlockSpec((1, 128), lambda i: (0, 0)),
        ],
        out_specs=pl.BlockSpec((tb, 128), lambda i: (i, 0)),
        compiler_params=pltpu.CompilerParams(
            dimension_semantics=("parallel",),
            vmem_limit_bytes=32 * 1024 * 1024),
    )(xp, packed["r1"], packed["b1row"], s1, packed["r2"], packed["b2row"],
      e2, packed["w1"], packed["b1fc"], packed["w2"], packed["b2fc"],
      packed["w3"], packed["b3fc"])
    return out[:B, :10]


# ------------------------- pure-NumPy reference (f64) ------------------------ #

def _reference_forward(params, x):
    p = {k: np.asarray(v, np.float64) for k, v in params.items()}
    a = np.asarray(x, np.float64)                           # (B, 3, 32, 32)

    def conv_relu_pool_ref(x, w, b):
        bsz, cin, h, wdt = x.shape
        cout, _, kh, kw = w.shape
        ho, wo = h - kh + 1, wdt - kw + 1
        y = np.zeros((bsz, cout, ho, wo))
        for i in range(kh):
            for j in range(kw):
                y += np.einsum("bchw,oc->bohw",
                               x[:, :, i:i + ho, j:j + wo], w[:, :, i, j])
        y = np.maximum(y + b[None, :, None, None], 0.0)
        return np.maximum(
            np.maximum(y[:, :, 0::2, 0::2], y[:, :, 0::2, 1::2]),
            np.maximum(y[:, :, 1::2, 0::2], y[:, :, 1::2, 1::2]))

    a = conv_relu_pool_ref(a, p["conv1_w"], p["conv1_b"])
    a = conv_relu_pool_ref(a, p["conv2_w"], p["conv2_b"])
    a = a.transpose(0, 2, 3, 1).reshape(a.shape[0], -1)     # (h, w, c) flatten
    a = np.maximum(a @ p["fc1_w"] + p["fc1_b"], 0.0)
    a = np.maximum(a @ p["fc2_w"] + p["fc2_b"], 0.0)
    return a @ p["fc3_w"] + p["fc3_b"]


if __name__ == "__main__":
    key = jax.random.PRNGKey(0)
    pkey, xkey = jax.random.split(key)
    params = init_params(pkey)
    packed = pack_params(params)

    x = jax.random.normal(xkey, (2, 3, 32, 32), jnp.float32)

    out = jax.block_until_ready(jax.jit(forward)(packed, x))

    assert out.shape == (2, 10) and out.dtype == jnp.float32
    ref = _reference_forward(params, x)
    assert np.allclose(np.asarray(out, np.float64), ref, rtol=2e-2, atol=2e-2), (
        "Pallas forward deviates from reference")
    # TODO(synk): train_step/val_step (CrossEntropyLoss, argmax accuracy) are
    # training utilities and are not implemented as kernels here.
    print("KERNEL_OK")
</pallas_src>

<mosaic_0001>
module attributes {stable_mosaic.version = 11 : i64} {
  func.func @_lenet_kernel(%arg0: i32, %arg1: memref<64x96xf32, #tpu.memory_space<vmem>>, %arg2: memref<5x96x512xf32, #tpu.memory_space<vmem>>, %arg3: memref<1x256xf32, #tpu.memory_space<vmem>>, %arg4: memref<32x64xf32, #tpu.memory_space<vmem>>, %arg5: memref<5x256x256xf32, #tpu.memory_space<vmem>>, %arg6: memref<1x128xf32, #tpu.memory_space<vmem>>, %arg7: memref<5x2x32xf32, #tpu.memory_space<vmem>>, %arg8: memref<5x128x128xf32, #tpu.memory_space<vmem>>, %arg9: memref<1x128xf32, #tpu.memory_space<vmem>>, %arg10: memref<128x128xf32, #tpu.memory_space<vmem>>, %arg11: memref<1x128xf32, #tpu.memory_space<vmem>>, %arg12: memref<128x128xf32, #tpu.memory_space<vmem>>, %arg13: memref<1x128xf32, #tpu.memory_space<vmem>>, %arg14: memref<2x128xf32, #tpu.memory_space<vmem>>) attributes {dimension_semantics = [#tpu.dimension_semantics<parallel>], iteration_bounds = array<i64: 1>, scalar_prefetch = 0 : i64, scratch_operands = 0 : i64, tpu.core_type = #tpu.core_type<tc>, window_params = [{transform_indices = @transform_0, window_bounds = array<i64: 64, 96>}, {pipeline_mode = #tpu.pipeline_mode<synchronous>, transform_indices = @transform_1, window_bounds = array<i64: 5, 96, 512>}, {pipeline_mode = #tpu.pipeline_mode<synchronous>, transform_indices = @transform_2, window_bounds = array<i64: 1, 256>}, {pipeline_mode = #tpu.pipeline_mode<synchronous>, transform_indices = @transform_3, window_bounds = array<i64: 32, 64>}, {pipeline_mode = #tpu.pipeline_mode<synchronous>, transform_indices = @transform_4, window_bounds = array<i64: 5, 256, 256>}, {pipeline_mode = #tpu.pipeline_mode<synchronous>, transform_indices = @transform_5, window_bounds = array<i64: 1, 128>}, {pipeline_mode = #tpu.pipeline_mode<synchronous>, transform_indices = @transform_6, window_bounds = array<i64: 5, 2, 32>}, {pipeline_mode = #tpu.pipeline_mode<synchronous>, transform_indices = @transform_7, window_bounds = array<i64: 5, 128, 128>}, {pipeline_mode = #tpu.pipeline_mode<synchronous>, transform_indices = @transform_8, window_bounds = array<i64: 1, 128>}, {pipeline_mode = #tpu.pipeline_mode<synchronous>, transform_indices = @transform_9, window_bounds = array<i64: 128, 128>}, {pipeline_mode = #tpu.pipeline_mode<synchronous>, transform_indices = @transform_10, window_bounds = array<i64: 1, 128>}, {pipeline_mode = #tpu.pipeline_mode<synchronous>, transform_indices = @transform_11, window_bounds = array<i64: 128, 128>}, {pipeline_mode = #tpu.pipeline_mode<synchronous>, transform_indices = @transform_12, window_bounds = array<i64: 1, 128>}, {transform_indices = @transform_13, window_bounds = array<i64: 2, 128>}]} {
    %c0 = arith.constant 0 : index
    %c0_0 = arith.constant 0 : index
    %0 = vector.load %arg1[%c0, %c0_0] : memref<64x96xf32, #tpu.memory_space<vmem>>, vector<64x96xf32>
    %c0_1 = arith.constant 0 : index
    %c0_2 = arith.constant 0 : index
    %c0_3 = arith.constant 0 : index
    %1 = vector.load %arg2[%c0_1, %c0_2, %c0_3] : memref<5x96x512xf32, #tpu.memory_space<vmem>>, vector<1x96x512xf32>
    %2 = vector.shape_cast %1 : vector<1x96x512xf32> to vector<96x512xf32>
    %cst = arith.constant dense<0.000000e+00> : vector<64x512xf32>
    %3 = tpu.matmul %0, %2, %cst {dimension_numbers = #tpu.dot_dimension_numbers<[1], [0], [0], [1], [0, 0, 1, 1], [], []>} : vector<64x96xf32>, vector<96x512xf32>, vector<64x512xf32> -> vector<64x512xf32>
    %c63_i32 = arith.constant 63 : i32
    %4 = tpu.dynamic_rotate %0 by %c63_i32 dim 0 : vector<64x96xf32>, i32 -> vector<64x96xf32>
    %c1 = arith.constant 1 : index
    %c0_4 = arith.constant 0 : index
    %c0_5 = arith.constant 0 : index
    %5 = vector.load %arg2[%c1, %c0_4, %c0_5] : memref<5x96x512xf32, #tpu.memory_space<vmem>>, vector<1x96x512xf32>
    %6 = vector.shape_cast %5 : vector<1x96x512xf32> to vector<96x512xf32>
    %cst_6 = arith.constant dense<0.000000e+00> : vector<64x512xf32>
    %7 = tpu.matmul %4, %6, %cst_6 {dimension_numbers = #tpu.dot_dimension_numbers<[1], [0], [0], [1], [0, 0, 1, 1], [], []>} : vector<64x96xf32>, vector<96x512xf32>, vector<64x512xf32> -> vector<64x512xf32>
    %8 = arith.addf %3, %7 : vector<64x512xf32>
    %c62_i32 = arith.constant 62 : i32
    %9 = tpu.dynamic_rotate %0 by %c62_i32 dim 0 : vector<64x96xf32>, i32 -> vector<64x96xf32>
    %c2 = arith.constant 2 : index
    %c0_7 = arith.constant 0 : index
    %c0_8 = arith.constant 0 : index
    %10 = vector.load %arg2[%c2, %c0_7, %c0_8] : memref<5x96x512xf32, #tpu.memory_space<vmem>>, vector<1x96x512xf32>
    %11 = vector.shape_cast %10 : vector<1x96x512xf32> to vector<96x512xf32>
    %cst_9 = arith.constant dense<0.000000e+00> : vector<64x512xf32>
    %12 = tpu.matmul %9, %11, %cst_9 {dimension_numbers = #tpu.dot_dimension_numbers<[1], [0], [0], [1], [0, 0, 1, 1], [], []>} : vector<64x96xf32>, vector<96x512xf32>, vector<64x512xf32> -> vector<64x512xf32>
    %13 = arith.addf %8, %12 : vector<64x512xf32>
    %c61_i32 = arith.constant 61 : i32
    %14 = tpu.dynamic_rotate %0 by %c61_i32 dim 0 : vector<64x96xf32>, i32 -> vector<64x96xf32>
    %c3 = arith.constant 3 : index
    %c0_10 = arith.constant 0 : index
    %c0_11 = arith.constant 0 : index
    %15 = vector.load %arg2[%c3, %c0_10, %c0_11] : memref<5x96x512xf32, #tpu.memory_space<vmem>>, vector<1x96x512xf32>
    %16 = vector.shape_cast %15 : vector<1x96x512xf32> to vector<96x512xf32>
    %cst_12 = arith.constant dense<0.000000e+00> : vector<64x512xf32>
    %17 = tpu.matmul %14, %16, %cst_12 {dimension_numbers = #tpu.dot_dimension_numbers<[1], [0], [0], [1], [0, 0, 1, 1], [], []>} : vector<64x96xf32>, vector<96x512xf32>, vector<64x512xf32> -> vector<64x512xf32>
    %18 = arith.addf %13, %17 : vector<64x512xf32>
    %c60_i32 = arith.constant 60 : i32
    %19 = tpu.dynamic_rotate %0 by %c60_i32 dim 0 : vector<64x96xf32>, i32 -> vector<64x96xf32>
    %c4 = arith.constant 4 : index
    %c0_13 = arith.constant 0 : index
    %c0_14 = arith.constant 0 : index
    %20 = vector.load %arg2[%c4, %c0_13, %c0_14] : memref<5x96x512xf32, #tpu.memory_space<vmem>>, vector<1x96x512xf32>
    %21 = vector.shape_cast %20 : vector<1x96x512xf32> to vector<96x512xf32>
    %cst_15 = arith.constant dense<0.000000e+00> : vector<64x512xf32>
    %22 = tpu.matmul %19, %21, %cst_15 {dimension_numbers = #tpu.dot_dimension_numbers<[1], [0], [0], [1], [0, 0, 1, 1], [], []>} : vector<64x96xf32>, vector<96x512xf32>, vector<64x512xf32> -> vector<64x512xf32>
    %23 = arith.addf %18, %22 : vector<64x512xf32>
    %24 = vector.extract_strided_slice %23 {offsets = [0, 0], sizes = [64, 256], strides = [1, 1]} : vector<64x512xf32> to vector<64x256xf32>
    %25 = vector.extract_strided_slice %23 {offsets = [0, 256], sizes = [64, 256], strides = [1, 1]} : vector<64x512xf32> to vector<64x256xf32>
    %26 = arith.maximumf %24, %25 : vector<64x256xf32>
    %c63_i32_16 = arith.constant 63 : i32
    %27 = tpu.dynamic_rotate %26 by %c63_i32_16 dim 0 : vector<64x256xf32>, i32 -> vector<64x256xf32>
    %28 = arith.maximumf %26, %27 : vector<64x256xf32>
    %c0_17 = arith.constant 0 : index
    %c0_18 = arith.constant 0 : index
    %29 = vector.load %arg4[%c0_17, %c0_18] : memref<32x64xf32, #tpu.memory_space<vmem>>, vector<32x64xf32>
    %cst_19 = arith.constant dense<0.000000e+00> : vector<32x256xf32>
    %30 = tpu.matmul %29, %28, %cst_19 {dimension_numbers = #tpu.dot_dimension_numbers<[1], [0], [0], [1], [0, 0, 1, 1], [], []>} : vector<32x64xf32>, vector<64x256xf32>, vector<32x256xf32> -> vector<32x256xf32>
    %c0_20 = arith.constant 0 : index
    %c0_21 = arith.constant 0 : index
    %31 = vector.load %arg3[%c0_20, %c0_21] : memref<1x256xf32, #tpu.memory_space<vmem>>, vector<1x256xf32>
    %32 = vector.broadcast %31 : vector<1x256xf32> to vector<32x256xf32>
    %33 = arith.addf %30, %32 : vector<32x256xf32>
    %cst_22 = arith.constant 0.000000e+00 : f32
    %34 = vector.broadcast %cst_22 : f32 to vector<32x256xf32>
    %35 = arith.maximumf %33, %34 : vector<32x256xf32>
    %c0_23 = arith.constant 0 : index
    %c0_24 = arith.constant 0 : index
    %c0_25 = arith.constant 0 : index
    %36 = vector.load %arg5[%c0_23, %c0_24, %c0_25] : memref<5x256x256xf32, #tpu.memory_space<vmem>>, vector<1x256x256xf32>
    %37 = vector.shape_cast %36 : vector<1x256x256xf32> to vector<256x256xf32>
    %cst_26 = arith.constant dense<0.000000e+00> : vector<32x256xf32>
    %38 = tpu.matmul %35, %37, %cst_26 {dimension_numbers = #tpu.dot_dimension_numbers<[1], [0], [0], [1], [0, 0, 1, 1], [], []>} : vector<32x256xf32>, vector<256x256xf32>, vector<32x256xf32> -> vector<32x256xf32>
    %c31_i32 = arith.constant 31 : i32
    %39 = tpu.dynamic_rotate %35 by %c31_i32 dim 0 : vector<32x256xf32>, i32 -> vector<32x256xf32>
    %c1_27 = arith.constant 1 : index
    %c0_28 = arith.constant 0 : index
    %c0_29 = arith.constant 0 : index
    %40 = vector.load %arg5[%c1_27, %c0_28, %c0_29] : memref<5x256x256xf32, #tpu.memory_space<vmem>>, vector<1x256x256xf32>
    %41 = vector.shape_cast %40 : vector<1x256x256xf32> to vector<256x256xf32>
    %cst_30 = arith.constant dense<0.000000e+00> : vector<32x256xf32>
    %42 = tpu.matmul %39, %41, %cst_30 {dimension_numbers = #tpu.dot_dimension_numbers<[1], [0], [0], [1], [0, 0, 1, 1], [], []>} : vector<32x256xf32>, vector<256x256xf32>, vector<32x256xf32> -> vector<32x256xf32>
    %43 = arith.addf %38, %42 : vector<32x256xf32>
    %c30_i32 = arith.constant 30 : i32
    %44 = tpu.dynamic_rotate %35 by %c30_i32 dim 0 : vector<32x256xf32>, i32 -> vector<32x256xf32>
    %c2_31 = arith.constant 2 : index
    %c0_32 = arith.constant 0 : index
    %c0_33 = arith.constant 0 : index
    %45 = vector.load %arg5[%c2_31, %c0_32, %c0_33] : memref<5x256x256xf32, #tpu.memory_space<vmem>>, vector<1x256x256xf32>
    %46 = vector.shape_cast %45 : vector<1x256x256xf32> to vector<256x256xf32>
    %cst_34 = arith.constant dense<0.000000e+00> : vector<32x256xf32>
    %47 = tpu.matmul %44, %46, %cst_34 {dimension_numbers = #tpu.dot_dimension_numbers<[1], [0], [0], [1], [0, 0, 1, 1], [], []>} : vector<32x256xf32>, vector<256x256xf32>, vector<32x256xf32> -> vector<32x256xf32>
    %48 = arith.addf %43, %47 : vector<32x256xf32>
    %c29_i32 = arith.constant 29 : i32
    %49 = tpu.dynamic_rotate %35 by %c29_i32 dim 0 : vector<32x256xf32>, i32 -> vector<32x256xf32>
    %c3_35 = arith.constant 3 : index
    %c0_36 = arith.constant 0 : index
    %c0_37 = arith.constant 0 : index
    %50 = vector.load %arg5[%c3_35, %c0_36, %c0_37] : memref<5x256x256xf32, #tpu.memory_space<vmem>>, vector<1x256x256xf32>
    %51 = vector.shape_cast %50 : vector<1x256x256xf32> to vector<256x256xf32>
    %cst_38 = arith.constant dense<0.000000e+00> : vector<32x256xf32>
    %52 = tpu.matmul %49, %51, %cst_38 {dimension_numbers = #tpu.dot_dimension_numbers<[1], [0], [0], [1], [0, 0, 1, 1], [], []>} : vector<32x256xf32>, vector<256x256xf32>, vector<32x256xf32> -> vector<32x256xf32>
    %53 = arith.addf %48, %52 : vector<32x256xf32>
    %c28_i32 = arith.constant 28 : i32
    %54 = tpu.dynamic_rotate %35 by %c28_i32 dim 0 : vector<32x256xf32>, i32 -> vector<32x256xf32>
    %c4_39 = arith.constant 4 : index
    %c0_40 = arith.constant 0 : index
    %c0_41 = arith.constant 0 : index
    %55 = vector.load %arg5[%c4_39, %c0_40, %c0_41] : memref<5x256x256xf32, #tpu.memory_space<vmem>>, vector<1x256x256xf32>
    %56 = vector.shape_cast %55 : vector<1x256x256xf32> to vector<256x256xf32>
    %cst_42 = arith.constant dense<0.000000e+00> : vector<32x256xf32>
    %57 = tpu.matmul %54, %56, %cst_42 {dimension_numbers = #tpu.dot_dimension_numbers<[1], [0], [0], [1], [0, 0, 1, 1], [], []>} : vector<32x256xf32>, vector<256x256xf32>, vector<32x256xf32> -> vector<32x256xf32>
    %58 = arith.addf %53, %57 : vector<32x256xf32>
    %59 = vector.extract_strided_slice %58 {offsets = [0, 0], sizes = [32, 128], strides = [1, 1]} : vector<32x256xf32> to vector<32x128xf32>
    %60 = vector.extract_strided_slice %58 {offsets = [0, 128], sizes = [32, 128], strides = [1, 1]} : vector<32x256xf32> to vector<32x128xf32>
    %61 = arith.maximumf %59, %60 : vector<32x128xf32>
    %c31_i32_43 = arith.constant 31 : i32
    %62 = tpu.dynamic_rotate %61 by %c31_i32_43 dim 0 : vector<32x128xf32>, i32 -> vector<32x128xf32>
    %63 = arith.maximumf %61, %62 : vector<32x128xf32>
    %cst_44 = arith.constant 0.000000e+00 : f32
    %64 = vector.broadcast %cst_44 : f32 to vector<2x128xf32>
    %c0_45 = arith.constant 0 : index
    %c0_46 = arith.constant 0 : index
    %c0_47 = arith.constant 0 : index
    %65 = vector.load %arg7[%c0_45, %c0_46, %c0_47] : memref<5x2x32xf32, #tpu.memory_space<vmem>>, vector<1x2x32xf32>
    %66 = vector.shape_cast %65 : vector<1x2x32xf32> to vector<2x32xf32>
    %cst_48 = arith.constant dense<0.000000e+00> : vector<2x128xf32>
    %67 = tpu.matmul %66, %63, %cst_48 {dimension_numbers = #tpu.dot_dimension_numbers<[1], [0], [0], [1], [0, 0, 1, 1], [], []>} : vector<2x32xf32>, vector<32x128xf32>, vector<2x128xf32> -> vector<2x128xf32>
    %c0_49 = arith.constant 0 : index
    %c0_50 = arith.constant 0 : index
    %68 = vector.load %arg6[%c0_49, %c0_50] : memref<1x128xf32, #tpu.memory_space<vmem>>, vector<1x128xf32>
    %69 = vector.broadcast %68 : vector<1x128xf32> to vector<2x128xf32>
    %70 = arith.addf %67, %69 : vector<2x128xf32>
    %cst_51 = arith.constant 0.000000e+00 : f32
    %71 = vector.broadcast %cst_51 : f32 to vector<2x128xf32>
    %72 = arith.maximumf %70, %71 : vector<2x128xf32>
    %c0_52 = arith.constant 0 : index
    %c0_53 = arith.constant 0 : index
    %c0_54 = arith.constant 0 : index
    %73 = vector.load %arg8[%c0_52, %c0_53, %c0_54] : memref<5x128x128xf32, #tpu.memory_space<vmem>>, vector<1x128x128xf32>
    %74 = vector.shape_cast %73 : vector<1x128x128xf32> to vector<128x128xf32>
    %cst_55 = arith.constant dense<0.000000e+00> : vector<2x128xf32>
    %75 = tpu.matmul %72, %74, %cst_55 {dimension_numbers = #tpu.dot_dimension_numbers<[1], [0], [0], [1], [0, 0, 1, 1], [], []>} : vector<2x128xf32>, vector<128x128xf32>, vector<2x128xf32> -> vector<2x128xf32>
    %76 = arith.addf %64, %75 : vector<2x128xf32>
    %c1_56 = arith.constant 1 : index
    %c0_57 = arith.constant 0 : index
    %c0_58 = arith.constant 0 : index
    %77 = vector.load %arg7[%c1_56, %c0_57, %c0_58] : memref<5x2x32xf32, #tpu.memory_space<vmem>>, vector<1x2x32xf32>
    %78 = vector.shape_cast %77 : vector<1x2x32xf32> to vector<2x32xf32>
    %cst_59 = arith.constant dense<0.000000e+00> : vector<2x128xf32>
    %79 = tpu.matmul %78, %63, %cst_59 {dimension_numbers = #tpu.dot_dimension_numbers<[1], [0], [0], [1], [0, 0, 1, 1], [], []>} : vector<2x32xf32>, vector<32x128xf32>, vector<2x128xf32> -> vector<2x128xf32>
    %c0_60 = arith.constant 0 : index
    %c0_61 = arith.constant 0 : index
    %80 = vector.load %arg6[%c0_60, %c0_61] : memref<1x128xf32, #tpu.memory_space<vmem>>, vector<1x128xf32>
    %81 = vector.broadcast %80 : vector<1x128xf32> to vector<2x128xf32>
    %82 = arith.addf %79, %81 : vector<2x128xf32>
    %cst_62 = arith.constant 0.000000e+00 : f32
    %83 = vector.broadcast %cst_62 : f32 to vector<2x128xf32>
    %84 = arith.maximumf %82, %83 : vector<2x128xf32>
    %c1_63 = arith.constant 1 : index
    %c0_64 = arith.constant 0 : index
    %c0_65 = arith.constant 0 : index
    %85 = vector.load %arg8[%c1_63, %c0_64, %c0_65] : memref<5x128x128xf32, #tpu.memory_space<vmem>>, vector<1x128x128xf32>
    %86 = vector.shape_cast %85 : vector<1x128x128xf32> to vector<128x128xf32>
    %cst_66 = arith.constant dense<0.000000e+00> : vector<2x128xf32>
    %87 = tpu.matmul %84, %86, %cst_66 {dimension_numbers = #tpu.dot_dimension_numbers<[1], [0], [0], [1], [0, 0, 1, 1], [], []>} : vector<2x128xf32>, vector<128x128xf32>, vector<2x128xf32> -> vector<2x128xf32>
    %88 = arith.addf %76, %87 : vector<2x128xf32>
    %c2_67 = arith.constant 2 : index
    %c0_68 = arith.constant 0 : index
    %c0_69 = arith.constant 0 : index
    %89 = vector.load %arg7[%c2_67, %c0_68, %c0_69] : memref<5x2x32xf32, #tpu.memory_space<vmem>>, vector<1x2x32xf32>
    %90 = vector.shape_cast %89 : vector<1x2x32xf32> to vector<2x32xf32>
    %cst_70 = arith.constant dense<0.000000e+00> : vector<2x128xf32>
    %91 = tpu.matmul %90, %63, %cst_70 {dimension_numbers = #tpu.dot_dimension_numbers<[1], [0], [0], [1], [0, 0, 1, 1], [], []>} : vector<2x32xf32>, vector<32x128xf32>, vector<2x128xf32> -> vector<2x128xf32>
    %c0_71 = arith.constant 0 : index
    %c0_72 = arith.constant 0 : index
    %92 = vector.load %arg6[%c0_71, %c0_72] : memref<1x128xf32, #tpu.memory_space<vmem>>, vector<1x128xf32>
    %93 = vector.broadcast %92 : vector<1x128xf32> to vector<2x128xf32>
    %94 = arith.addf %91, %93 : vector<2x128xf32>
    %cst_73 = arith.constant 0.000000e+00 : f32
    %95 = vector.broadcast %cst_73 : f32 to vector<2x128xf32>
    %96 = arith.maximumf %94, %95 : vector<2x128xf32>
    %c2_74 = arith.constant 2 : index
    %c0_75 = arith.constant 0 : index
    %c0_76 = arith.constant 0 : index
    %97 = vector.load %arg8[%c2_74, %c0_75, %c0_76] : memref<5x128x128xf32, #tpu.memory_space<vmem>>, vector<1x128x128xf32>
    %98 = vector.shape_cast %97 : vector<1x128x128xf32> to vector<128x128xf32>
    %cst_77 = arith.constant dense<0.000000e+00> : vector<2x128xf32>
    %99 = tpu.matmul %96, %98, %cst_77 {dimension_numbers = #tpu.dot_dimension_numbers<[1], [0], [0], [1], [0, 0, 1, 1], [], []>} : vector<2x128xf32>, vector<128x128xf32>, vector<2x128xf32> -> vector<2x128xf32>
    %100 = arith.addf %88, %99 : vector<2x128xf32>
    %c3_78 = arith.constant 3 : index
    %c0_79 = arith.constant 0 : index
    %c0_80 = arith.constant 0 : index
    %101 = vector.load %arg7[%c3_78, %c0_79, %c0_80] : memref<5x2x32xf32, #tpu.memory_space<vmem>>, vector<1x2x32xf32>
    %102 = vector.shape_cast %101 : vector<1x2x32xf32> to vector<2x32xf32>
    %cst_81 = arith.constant dense<0.000000e+00> : vector<2x128xf32>
    %103 = tpu.matmul %102, %63, %cst_81 {dimension_numbers = #tpu.dot_dimension_numbers<[1], [0], [0], [1], [0, 0, 1, 1], [], []>} : vector<2x32xf32>, vector<32x128xf32>, vector<2x128xf32> -> vector<2x128xf32>
    %c0_82 = arith.constant 0 : index
    %c0_83 = arith.constant 0 : index
    %104 = vector.load %arg6[%c0_82, %c0_83] : memref<1x128xf32, #tpu.memory_space<vmem>>, vector<1x128xf32>
    %105 = vector.broadcast %104 : vector<1x128xf32> to vector<2x128xf32>
    %106 = arith.addf %103, %105 : vector<2x128xf32>
    %cst_84 = arith.constant 0.000000e+00 : f32
    %107 = vector.broadcast %cst_84 : f32 to vector<2x128xf32>
    %108 = arith.maximumf %106, %107 : vector<2x128xf32>
    %c3_85 = arith.constant 3 : index
    %c0_86 = arith.constant 0 : index
    %c0_87 = arith.constant 0 : index
    %109 = vector.load %arg8[%c3_85, %c0_86, %c0_87] : memref<5x128x128xf32, #tpu.memory_space<vmem>>, vector<1x128x128xf32>
    %110 = vector.shape_cast %109 : vector<1x128x128xf32> to vector<128x128xf32>
    %cst_88 = arith.constant dense<0.000000e+00> : vector<2x128xf32>
    %111 = tpu.matmul %108, %110, %cst_88 {dimension_numbers = #tpu.dot_dimension_numbers<[1], [0], [0], [1], [0, 0, 1, 1], [], []>} : vector<2x128xf32>, vector<128x128xf32>, vector<2x128xf32> -> vector<2x128xf32>
    %112 = arith.addf %100, %111 : vector<2x128xf32>
    %c4_89 = arith.constant 4 : index
    %c0_90 = arith.constant 0 : index
    %c0_91 = arith.constant 0 : index
    %113 = vector.load %arg7[%c4_89, %c0_90, %c0_91] : memref<5x2x32xf32, #tpu.memory_space<vmem>>, vector<1x2x32xf32>
    %114 = vector.shape_cast %113 : vector<1x2x32xf32> to vector<2x32xf32>
    %cst_92 = arith.constant dense<0.000000e+00> : vector<2x128xf32>
    %115 = tpu.matmul %114, %63, %cst_92 {dimension_numbers = #tpu.dot_dimension_numbers<[1], [0], [0], [1], [0, 0, 1, 1], [], []>} : vector<2x32xf32>, vector<32x128xf32>, vector<2x128xf32> -> vector<2x128xf32>
    %c0_93 = arith.constant 0 : index
    %c0_94 = arith.constant 0 : index
    %116 = vector.load %arg6[%c0_93, %c0_94] : memref<1x128xf32, #tpu.memory_space<vmem>>, vector<1x128xf32>
    %117 = vector.broadcast %116 : vector<1x128xf32> to vector<2x128xf32>
    %118 = arith.addf %115, %117 : vector<2x128xf32>
    %cst_95 = arith.constant 0.000000e+00 : f32
    %119 = vector.broadcast %cst_95 : f32 to vector<2x128xf32>
    %120 = arith.maximumf %118, %119 : vector<2x128xf32>
    %c4_96 = arith.constant 4 : index
    %c0_97 = arith.constant 0 : index
    %c0_98 = arith.constant 0 : index
    %121 = vector.load %arg8[%c4_96, %c0_97, %c0_98] : memref<5x128x128xf32, #tpu.memory_space<vmem>>, vector<1x128x128xf32>
    %122 = vector.shape_cast %121 : vector<1x128x128xf32> to vector<128x128xf32>
    %cst_99 = arith.constant dense<0.000000e+00> : vector<2x128xf32>
    %123 = tpu.matmul %120, %122, %cst_99 {dimension_numbers = #tpu.dot_dimension_numbers<[1], [0], [0], [1], [0, 0, 1, 1], [], []>} : vector<2x128xf32>, vector<128x128xf32>, vector<2x128xf32> -> vector<2x128xf32>
    %124 = arith.addf %112, %123 : vector<2x128xf32>
    %c0_100 = arith.constant 0 : index
    %c0_101 = arith.constant 0 : index
    %125 = vector.load %arg9[%c0_100, %c0_101] : memref<1x128xf32, #tpu.memory_space<vmem>>, vector<1x128xf32>
    %126 = vector.broadcast %125 : vector<1x128xf32> to vector<2x128xf32>
    %127 = arith.addf %124, %126 : vector<2x128xf32>
    %cst_102 = arith.constant 0.000000e+00 : f32
    %128 = vector.broadcast %cst_102 : f32 to vector<2x128xf32>
    %129 = arith.maximumf %127, %128 : vector<2x128xf32>
    %c0_103 = arith.constant 0 : index
    %c0_104 = arith.constant 0 : index
    %130 = vector.load %arg10[%c0_103, %c0_104] : memref<128x128xf32, #tpu.memory_space<vmem>>, vector<128x128xf32>
    %cst_105 = arith.constant dense<0.000000e+00> : vector<2x128xf32>
    %131 = tpu.matmul %129, %130, %cst_105 {dimension_numbers = #tpu.dot_dimension_numbers<[1], [0], [0], [1], [0, 0, 1, 1], [], []>} : vector<2x128xf32>, vector<128x128xf32>, vector<2x128xf32> -> vector<2x128xf32>
    %c0_106 = arith.constant 0 : index
    %c0_107 = arith.constant 0 : index
    %132 = vector.load %arg11[%c0_106, %c0_107] : memref<1x128xf32, #tpu.memory_space<vmem>>, vector<1x128xf32>
    %133 = vector.broadcast %132 : vector<1x128xf32> to vector<2x128xf32>
    %134 = arith.addf %131, %133 : vector<2x128xf32>
    %cst_108 = arith.constant 0.000000e+00 : f32
    %135 = vector.broadcast %cst_108 : f32 to vector<2x128xf32>
    %136 = arith.maximumf %134, %135 : vector<2x128xf32>
    %c0_109 = arith.constant 0 : index
    %c0_110 = arith.constant 0 : index
    %137 = vector.load %arg12[%c0_109, %c0_110] : memref<128x128xf32, #tpu.memory_space<vmem>>, vector<128x128xf32>
    %cst_111 = arith.constant dense<0.000000e+00> : vector<2x128xf32>
    %138 = tpu.matmul %136, %137, %cst_111 {dimension_numbers = #tpu.dot_dimension_numbers<[1], [0], [0], [1], [0, 0, 1, 1], [], []>} : vector<2x128xf32>, vector<128x128xf32>, vector<2x128xf32> -> vector<2x128xf32>
    %c0_112 = arith.constant 0 : index
    %c0_113 = arith.constant 0 : index
    %139 = vector.load %arg13[%c0_112, %c0_113] : memref<1x128xf32, #tpu.memory_space<vmem>>, vector<1x128xf32>
    %140 = vector.broadcast %139 : vector<1x128xf32> to vector<2x128xf32>
    %141 = arith.addf %138, %140 : vector<2x128xf32>
    %c0_114 = arith.constant 0 : index
    %c0_115 = arith.constant 0 : index
    %142 = vector.load %arg14[%c0_114, %c0_115] : memref<2x128xf32, #tpu.memory_space<vmem>>, vector<2x128xf32>
    tpu.vector_store %arg14[%c0_114, %c0_115], %141 {strides = array<i32>} : memref<2x128xf32, #tpu.memory_space<vmem>>, vector<2x128xf32>,
    return
  }
  func.func @transform_0(%arg0: i32) -> (i32, i32) {
    %c0_i32 = arith.constant 0 : i32
    %c0_i32_0 = arith.constant 0 : i32
    return %arg0, %c0_i32 : i32, i32
  }
  func.func @transform_1(%arg0: i32) -> (i32, i32, i32) {
    %c0_i32 = arith.constant 0 : i32
    %c0_i32_0 = arith.constant 0 : i32
    %c0_i32_1 = arith.constant 0 : i32
    %c0_i32_2 = arith.constant 0 : i32
    return %c0_i32, %c0_i32_0, %c0_i32_1 : i32, i32, i32
  }
  func.func @transform_2(%arg0: i32) -> (i32, i32) {
    %c0_i32 = arith.constant 0 : i32
    %c0_i32_0 = arith.constant 0 : i32
    %c0_i32_1 = arith.constant 0 : i32
    return %c0_i32, %c0_i32_0 : i32, i32
  }
  func.func @transform_3(%arg0: i32) -> (i32, i32) {
    %c0_i32 = arith.constant 0 : i32
    %c0_i32_0 = arith.constant 0 : i32
    %c0_i32_1 = arith.constant 0 : i32
    return %c0_i32, %c0_i32_0 : i32, i32
  }
  func.func @transform_4(%arg0: i32) -> (i32, i32, i32) {
    %c0_i32 = arith.constant 0 : i32
    %c0_i32_0 = arith.constant 0 : i32
    %c0_i32_1 = arith.constant 0 : i32
    %c0_i32_2 = arith.constant 0 : i32
    return %c0_i32, %c0_i32_0, %c0_i32_1 : i32, i32, i32
  }
  func.func @transform_5(%arg0: i32) -> (i32, i32) {
    %c0_i32 = arith.constant 0 : i32
    %c0_i32_0 = arith.constant 0 : i32
    %c0_i32_1 = arith.constant 0 : i32
    return %c0_i32, %c0_i32_0 : i32, i32
  }
  func.func @transform_6(%arg0: i32) -> (i32, i32, i32) {
    %c0_i32 = arith.constant 0 : i32
    %c0_i32_0 = arith.constant 0 : i32
    %c0_i32_1 = arith.constant 0 : i32
    %c0_i32_2 = arith.constant 0 : i32
    return %c0_i32, %c0_i32_0, %c0_i32_1 : i32, i32, i32
  }
  func.func @transform_7(%arg0: i32) -> (i32, i32, i32) {
    %c0_i32 = arith.constant 0 : i32
    %c0_i32_0 = arith.constant 0 : i32
    %c0_i32_1 = arith.constant 0 : i32
    %c0_i32_2 = arith.constant 0 : i32
    return %c0_i32, %c0_i32_0, %c0_i32_1 : i32, i32, i32
  }
  func.func @transform_8(%arg0: i32) -> (i32, i32) {
    %c0_i32 = arith.constant 0 : i32
    %c0_i32_0 = arith.constant 0 : i32
    %c0_i32_1 = arith.constant 0 : i32
    return %c0_i32, %c0_i32_0 : i32, i32
  }
  func.func @transform_9(%arg0: i32) -> (i32, i32) {
    %c0_i32 = arith.constant 0 : i32
    %c0_i32_0 = arith.constant 0 : i32
    %c0_i32_1 = arith.constant 0 : i32
    return %c0_i32, %c0_i32_0 : i32, i32
  }
  func.func @transform_10(%arg0: i32) -> (i32, i32) {
    %c0_i32 = arith.constant 0 : i32
    %c0_i32_0 = arith.constant 0 : i32
    %c0_i32_1 = arith.constant 0 : i32
    return %c0_i32, %c0_i32_0 : i32, i32
  }
  func.func @transform_11(%arg0: i32) -> (i32, i32) {
    %c0_i32 = arith.constant 0 : i32
    %c0_i32_0 = arith.constant 0 : i32
    %c0_i32_1 = arith.constant 0 : i32
    return %c0_i32, %c0_i32_0 : i32, i32
  }
  func.func @transform_12(%arg0: i32) -> (i32, i32) {
    %c0_i32 = arith.constant 0 : i32
    %c0_i32_0 = arith.constant 0 : i32
    %c0_i32_1 = arith.constant 0 : i32
    return %c0_i32, %c0_i32_0 : i32, i32
  }
  func.func @transform_13(%arg0: i32) -> (i32, i32) {
    %c0_i32 = arith.constant 0 : i32
    %c0_i32_0 = arith.constant 0 : i32
    return %arg0, %c0_i32 : i32, i32
  }
}

</mosaic_0001>

<bundles_post_ra>
// kernel: forward.1
= control target key start
LH: loop header
LB: loop body
LE: loop exit
PB: predicated region body
PF: predicated region fallthrough
CT: control target
= control target key end

     0   :  { %18 = vsyncpa [#allocation3], 0  ;;  %s5085_s0 = inlined_call_operand.vmem [shape: f32[64,96], index: 0, kind: input, shape index: {}]   ;;  %s5086_s1 = inlined_call_operand.hbm [shape: f32[5,96,512], index: 1, kind: input, shape index: {}]   ;;  %s5087_s2 = inlined_call_operand.hbm [shape: f32[1,256], index: 2, kind: input, shape index: {}]   ;;  %s5088_s3 = inlined_call_operand.hbm [shape: f32[32,64], index: 3, kind: input, shape index: {}]   ;;  %s5089_s4 = inlined_call_operand.hbm [shape: f32[5,256,256], index: 4, kind: input, shape index: {}]   ;;  %s5090_s5 = inlined_call_operand.hbm [shape: f32[1,128], index: 5, kind: input, shape index: {}]   ;;  %s5091_s6 = inlined_call_operand.hbm [shape: f32[5,2,32], index: 6, kind: input, shape index: {}]   ;;  %s5092_s7 = inlined_call_operand.hbm [shape: f32[5,128,128], index: 7, kind: input, shape index: {}]   ;;  %s5093_s8 = inlined_call_operand.hbm [shape: f32[1,128], index: 8, kind: input, shape index: {}]   ;;  %s5094_s9 = inlined_call_operand.hbm [shape: f32[128,128], index: 9, kind: input, shape index: {}]   ;;  %s5095_s10 = inlined_call_operand.hbm [shape: f32[1,128], index: 10, kind: input, shape index: {}]   ;;  %s5096_s11 = inlined_call_operand.hbm [shape: f32[128,128], index: 11, kind: input, shape index: {}]   ;;  %s5097_s12 = inlined_call_operand.hbm [shape: f32[1,128], index: 12, kind: input, shape index: {}]   ;;  %s5098_s13 = inlined_call_operand.hbm [shape: f32[2,128], index: 13, kind: output, shape index: {}]  }
   0x1   :  { %19 = vsyncpa [#allocation6], 0 }
   0x2   :  { %20 = vsyncpa [#allocation9], 0 }
   0x3   :  { %21 = vsyncpa [#allocation12], 0 }
   0x4   :  { %22 = vsyncpa [#allocation15], 0 }
   0x5   :  { %23 = vsyncpa [#allocation18], 0 }
   0x6   :  { %24 = vsyncpa [#allocation21], 0  ;;  %s46_s27 = sshll.u32 %s5087_s2, 4  ;;  %s47_s27 = int_to_ptr.hbm [resolvable:$true] %s46_s27 }
   0x7   :  { %25 = vsyncpa [#allocation4], 0  ;;  %s3707_s28 = smov [#allocation5]   ;;  %s69_s15 = sshll.u32 %s5089_s4, 4  ;;  %s70_s15 = int_to_ptr.hbm [resolvable:$true] %s69_s15 }
   0x8   :  { %s48_s29 = sshll.u32 %s3707_s28, 4  ;;  %s3708_s16 = smov [#allocation8]   ;;  %s49_s29 = int_to_ptr.vmem [resolvable:$true] %s48_s29 }
   0x9   :  { %51 = dma.hbm_to_vmem [thread:$0]  %s47_s27, 32, %s49_s29, [#allocation6]  }
   0xa   :  { %s71_s17 = sshll.u32 %s3708_s16, 4  ;;  %s3709_s18 = smov 256   ;;  %s72_s17 = int_to_ptr.vmem [resolvable:$true] %s71_s17 }
   0xb   :  { %s3710_s19 = smov 16   ;;  %s93_s2 = sshll.u32 %s5091_s6, 4  ;;  %s94_s2 = int_to_ptr.hbm [resolvable:$true] %s93_s2 }
   0xc   :  { %77 = dma.hbm_to_vmem [thread:$0]  %s70_s15, 40960, %s72_s17, [#allocation9], %s3709_s18, %s3709_s18, %s3710_s19  }
   0xd   :  { %s3711_s22 = smov [#allocation11]   ;;  %s120_s4 = sshll.u32 %s5093_s8, 4  ;;  %s121_s4 = int_to_ptr.hbm [resolvable:$true] %s120_s4 }
   0xe   :  { %s95_s23 = sshll.u32 %s3711_s22, 4  ;;  %s3712_s26 = smov 32   ;;  %s96_s23 = int_to_ptr.vmem [resolvable:$true] %s95_s23 }
   0xf   :  { %s3713_s27 = smov 2   ;;  %s3714_s28 = smov [#allocation14]  }
  0x10   :  { %101 = dma.hbm_to_vmem [thread:$0]  %s94_s2, 160, %s96_s23, [#allocation12], %s3712_s26, %s3712_s26, %s3713_s27  }
  0x11   :  { %s122_s29 = sshll.u32 %s3714_s28, 4  ;;  %s144_s15 = sshll.u32 %s5095_s10, 4  ;;  %s123_s29 = int_to_ptr.vmem [resolvable:$true] %s122_s29  ;;  %s145_s15 = int_to_ptr.hbm [resolvable:$true] %s144_s15 }
  0x12   :  { %125 = dma.hbm_to_vmem [thread:$0]  %s121_s4, 16, %s123_s29, [#allocation15]  }
  0x13   :  { %s32_s17 = sshll.u32 %s5086_s1, 4  ;;  %s3715_s18 = smov [#allocation17]   ;;  %s33_s17 = int_to_ptr.hbm [resolvable:$true] %s32_s17 }
  0x14   :  { %s146_s19 = sshll.u32 %s3715_s18, 4  ;;  %s3716_s8 = smov [#allocation2]   ;;  %s147_s19 = int_to_ptr.vmem [resolvable:$true] %s146_s19 }
  0x15   :  { %149 = dma.hbm_to_vmem [thread:$0]  %s145_s15, 16, %s147_s19, [#allocation18]  }
  0x16   :  { %s34_s20 = sshll.u32 %s3716_s8, 4  ;;  %s56_s22 = sshll.u32 %s5088_s3, 4  ;;  %s35_s20 = int_to_ptr.vmem [resolvable:$true] %s34_s20  ;;  %s57_s22 = int_to_ptr.hbm [resolvable:$true] %s56_s22 }
  0x17   :  { %s3717_s10 = smov 512   ;;  %s3718_s23 = smov [#allocation7]  }
  0x18   :  { %40 = dma.hbm_to_vmem [thread:$0]  %s33_s17, 30720, %s35_s20, [#allocation3], %s3717_s10, %s3717_s10, %s3712_s26  }
  0x19   :  { %s58_s24 = sshll.u32 %s3718_s23, 4  ;;  %s3719_s25 = smov 128   ;;  %s59_s24 = int_to_ptr.vmem [resolvable:$true] %s58_s24 }
  0x1a   :  { %s3720_s1 = smov 8   ;;  %s83_s28 = sshll.u32 %s5090_s5, 4  ;;  %s84_s28 = int_to_ptr.hbm [resolvable:$true] %s83_s28 }
  0x1b   :  { %64 = dma.hbm_to_vmem [thread:$0]  %s57_s22, 512, %s59_s24, [#allocation6], %s3719_s25, %s3719_s25, %s3720_s1  }
  0x1c   :  { %s3721_s29 = smov [#allocation10]   ;;  %s106_s14 = sshll.u32 %s5092_s7, 4  ;;  %s107_s14 = int_to_ptr.hbm [resolvable:$true] %s106_s14 }
  0x1d   :  { %s85_s30 = sshll.u32 %s3721_s29, 4  ;;  %s3722_s15 = smov [#allocation13]   ;;  %s86_s30 = int_to_ptr.vmem [resolvable:$true] %s85_s30 }
  0x1e   :  { %88 = dma.hbm_to_vmem [thread:$0]  %s84_s28, 16, %s86_s30, [#allocation9]  }
  0x1f   :  { %s108_s6 = sshll.u32 %s3722_s15, 4  ;;  %s130_s18 = sshll.u32 %s5094_s9, 4  ;;  %s109_s6 = int_to_ptr.vmem [resolvable:$true] %s108_s6  ;;  %s131_s18 = int_to_ptr.hbm [resolvable:$true] %s130_s18 }
  0x20   :  { %114 = dma.hbm_to_vmem [thread:$0]  %s107_s14, 10240, %s109_s6, [#allocation12], %s3719_s25, %s3719_s25, %s3720_s1  }
  0x21   :  { %s154_s8 = sshll.u32 %s5096_s11, 4  ;;  %s3723_s20 = smov [#allocation16]   ;;  %s155_s8 = int_to_ptr.hbm [resolvable:$true] %s154_s8 }
  0x22   :  { %s132_s7 = sshll.u32 %s3723_s20, 4  ;;  %s3724_s21 = smov [#allocation19]   ;;  %s133_s7 = int_to_ptr.vmem [resolvable:$true] %s132_s7 }
  0x23   :  { %138 = dma.hbm_to_vmem [thread:$0]  %s131_s18, 2048, %s133_s7, [#allocation15], %s3719_s25, %s3719_s25, %s3720_s1  }
  0x24   :  { %s156_s9 = sshll.u32 %s3724_s21, 4  ;;  %s168_s10 = sshll.u32 %s5097_s12, 4  ;;  %s157_s9 = int_to_ptr.vmem [resolvable:$true] %s156_s9  ;;  %s169_s10 = int_to_ptr.hbm [resolvable:$true] %s168_s10 }
  0x25   :  { %162 = dma.hbm_to_vmem [thread:$0]  %s155_s8, 2048, %s157_s9, [#allocation18], %s3719_s25, %s3719_s25, %s3720_s1  }
  0x26   :  { %s3725_s11 = smov [#allocation20]  }
  0x27   :  { %s170_s23 = sshll.u32 %s3725_s11, 4  ;;  %s171_s23 = int_to_ptr.vmem [resolvable:$true] %s170_s23 }
  0x28   :  { %173 = dma.hbm_to_vmem [thread:$0]  %s169_s10, 16, %s171_s23, [#allocation21]  }
  0x29   :  { %3691 = dma.done.wait [#allocation3], 30720  }
  0x2a   :  { %3692 = vsyncadd [#allocation3], 4294936576 }
  0x2b   :  { %3693 = dma.done.wait [#allocation6], 544  }
  0x2c   :  { %3694 = vsyncadd [#allocation6], 4294966752 }
  0x2d   :  { %3695 = dma.done.wait [#allocation9], 40976  }
  0x2e   :  { %3696 = vsyncadd [#allocation9], 4294926320 }
  0x2f   :  { %3697 = dma.done.wait [#allocation12], 10400  }
  0x30   :  { %3698 = vsyncadd [#allocation12], 4294956896 }
  0x31   :  { %3699 = dma.done.wait [#allocation15], 2064  }
  0x32   :  { %3700 = vsyncadd [#allocation15], 4294965232 }
  0x33   :  { %3701 = dma.done.wait [#allocation18], 2064  }
  0x34   :  { %3702 = vsyncadd [#allocation18], 4294965232 }
  0x35   :  { %3703 = dma.done.wait [#allocation21], 16  }
  0x36   :  { %3704 = vsyncadd [#allocation21], 4294967280  ;;  %v342_v0 = vld [vmem:[#allocation2 + $0x2e0] sm:$0xff]  ;;  %v343_v1 = vld [vmem:[#allocation2 + $0x2e8] sm:$0xff]  ;;  %v286_v28 = vlaneseq  ;;  %vm346_vm1 = vcmask 785408   ;;  %vm1655_vm5 = vcmask 523264  }
  0x37   :  { %v344_v2 = vld [vmem:[#allocation2 + $0x2f0] sm:$0xff]  ;;  %375 = vmatpush.msra.mxu0 %v342_v0  ;;  %416 = vmatpush.msra.mxu1 %v343_v1  ;;  %v345_v3 = vld [vmem:[#allocation2 + $0x2f8] sm:$0xff]  ;;  %v338_v4 = vld [vmem:[#allocation2 + $0x2c0] sm:$0xff]  ;;  %vm2747_vm6 = vcmask 261120   ;;  %s3158_s28 = sshll.u32 %s5098_s13, 4  ;;  %s3159_s28 = int_to_ptr.hbm [resolvable:$true] %s3158_s28 }
  0x38   :  { %v339_v5 = vld [vmem:[#allocation2 + $0x2c8] sm:$0xff]  ;;  %457 = vmatpush.msra.mxu2 %v344_v2  ;;  %498 = vmatpush.msra.mxu3 %v345_v3  ;;  %v340_v6 = vld [vmem:[#allocation2 + $0x2d0] sm:$0xff]  ;;  %v341_v7 = vld [vmem:[#allocation2 + $0x2d8] sm:$0xff]  ;;  %v3845_v38 = vshrl.u32 %v286_v28, 7 }
  0x39   :  { %v334_v8 = vld [vmem:[#allocation2 + $0x2a0] sm:$0xff]  ;;  %376 = vmatpush.msra.mxu0 %v338_v4  ;;  %417 = vmatpush.msra.mxu1 %v339_v5  ;;  %v335_v9 = vld [vmem:[#allocation2 + $0x2a8] sm:$0xff]  ;;  %v336_v10 = vld [vmem:[#allocation2 + $0x2b0] sm:$0xff] }
  0x3a   :  { %v337_v11 = vld [vmem:[#allocation2 + $0x2b8] sm:$0xff]  ;;  %458 = vmatpush.msra.mxu2 %v340_v6  ;;  %499 = vmatpush.msra.mxu3 %v341_v7  ;;  %v330_v12 = vld [vmem:[#allocation2 + $0x280] sm:$0xff]  ;;  %v331_v13 = vld [vmem:[#allocation2 + $0x288] sm:$0xff]  ;;  %vm288_vm0 = vcmp.lt.s32.totalorder %v3845_v38, 7  ;;  %vm731_vm2 = vcmp.lt.s32.totalorder %v3845_v38, 6  ;;  %vm1017_vm3 = vcmp.lt.s32.totalorder %v3845_v38, 5 }
  0x3b   :  { %377 = vmatpush.msra.mxu0 %v334_v8  ;;  %418 = vmatpush.msra.mxu1 %v335_v9  ;;  %v332_v14 = vld [vmem:[#allocation2 + $0x290] sm:$0xff]  ;;  %v333_v15 = vld [vmem:[#allocation2 + $0x298] sm:$0xff]  ;;  %v326_v16 = vld [vmem:[#allocation2 + $0x260] sm:$0xff]  ;;  %vm1303_vm4 = vcmp.lt.s32.totalorder %v3845_v38, 4 }
  0x3c   :  { %459 = vmatpush.msra.mxu2 %v336_v10  ;;  %500 = vmatpush.msra.mxu3 %v337_v11  ;;  %v327_v17 = vld [vmem:[#allocation2 + $0x268] sm:$0xff]  ;;  %v328_v18 = vld [vmem:[#allocation2 + $0x270] sm:$0xff]  ;;  %v329_v19 = vld [vmem:[#allocation2 + $0x278] sm:$0xff] }
  0x3d   :  { %378 = vmatpush.msra.mxu0 %v330_v12  ;;  %419 = vmatpush.msra.mxu1 %v331_v13  ;;  %v322_v20 = vld [vmem:[#allocation2 + $0x240] sm:$0xff]  ;;  %v323_v21 = vld [vmem:[#allocation2 + $0x248] sm:$0xff]  ;;  %v324_v22 = vld [vmem:[#allocation2 + $0x250] sm:$0xff] }
  0x3e   :  { %460 = vmatpush.msra.mxu2 %v332_v14  ;;  %501 = vmatpush.msra.mxu3 %v333_v15  ;;  %v325_v23 = vld [vmem:[#allocation2 + $0x258] sm:$0xff]  ;;  %v318_v24 = vld [vmem:[#allocation2 + $0x220] sm:$0xff]  ;;  %v319_v25 = vld [vmem:[#allocation2 + $0x228] sm:$0xff] }
  0x3f   :  { %379 = vmatpush.msra.mxu0 %v326_v16  ;;  %420 = vmatpush.msra.mxu1 %v327_v17  ;;  %v320_v26 = vld [vmem:[#allocation2 + $0x230] sm:$0xff]  ;;  %v321_v27 = vld [vmem:[#allocation2 + $0x238] sm:$0xff]  ;;  %v314_v29 = vld [vmem:[#allocation2 + $0x200] sm:$0xff] }
  0x40   :  { %461 = vmatpush.msra.mxu2 %v328_v18  ;;  %502 = vmatpush.msra.mxu3 %v329_v19  ;;  %v315_v30 = vld [vmem:[#allocation2 + $0x208] sm:$0xff]  ;;  %v316_v31 = vld [vmem:[#allocation2 + $0x210] sm:$0xff]  ;;  %v317_v32 = vld [vmem:[#allocation2 + $0x218] sm:$0xff] }
  0x41   :  { %380 = vmatpush.msra.mxu0 %v322_v20  ;;  %421 = vmatpush.msra.mxu1 %v323_v21  ;;  %v310_v33 = vld [vmem:[#allocation2 + $0x1e0] sm:$0xff]  ;;  %v311_v34 = vld [vmem:[#allocation2 + $0x1e8] sm:$0xff]  ;;  %v312_v35 = vld [vmem:[#allocation2 + $0x1f0] sm:$0xff] }
  0x42   :  { %462 = vmatpush.msra.mxu2 %v324_v22  ;;  %503 = vmatpush.msra.mxu3 %v325_v23  ;;  %v313_v36 = vld [vmem:[#allocation2 + $0x1f8] sm:$0xff]  ;;  %v306_v37 = vld [vmem:[#allocation2 + $0x1c0] sm:$0xff]  ;;  %v307_v39 = vld [vmem:[#allocation2 + $0x1c8] sm:$0xff] }
  0x43   :  { %381 = vmatpush.msra.mxu0 %v318_v24  ;;  %422 = vmatpush.msra.mxu1 %v319_v25  ;;  %v3850_v40 = vld [vmem:[%s5085_s0] sm:$0xff]  ;;  %v3855_v41 = vld [vmem:[%s5085_s0 + $0x8] sm:$0xff]  ;;  %v308_v42 = vld [vmem:[#allocation2 + $0x1d0] sm:$0xff] }
  0x44   :  { %463 = vmatpush.msra.mxu2 %v320_v26  ;;  %504 = vmatpush.msra.mxu3 %v321_v27  ;;  %v309_v43 = vld [vmem:[#allocation2 + $0x1d8] sm:$0xff]  ;;  %v302_v44 = vld [vmem:[#allocation2 + $0x1a0] sm:$0xff]  ;;  %v303_v45 = vld [vmem:[#allocation2 + $0x1a8] sm:$0xff]  ;;  %v278_v47 = vrot.slane %v3850_v40, 1  ;;  %v279_v48 = vrot.slane %v3855_v41, 1 }
  0x45   :  { %382 = vmatpush.msra.mxu0 %v314_v29  ;;  %423 = vmatpush.msra.mxu1 %v315_v30  ;;  %v304_v46 = vld [vmem:[#allocation2 + $0x1b0] sm:$0xff]  ;;  %v305_v49 = vld [vmem:[#allocation2 + $0x1b8] sm:$0xff]  ;;  %v298_v50 = vld [vmem:[#allocation2 + $0x180] sm:$0xff] }
  0x46   :  { %464 = vmatpush.msra.mxu2 %v316_v31  ;;  %505 = vmatpush.msra.mxu3 %v317_v32  ;;  %v299_v51 = vld [vmem:[#allocation2 + $0x188] sm:$0xff]  ;;  %v300_v52 = vld [vmem:[#allocation2 + $0x190] sm:$0xff]  ;;  %v301_v53 = vld [vmem:[#allocation2 + $0x198] sm:$0xff]  ;;  %v295_v54 = vsel %vm288_vm0, %v278_v47, %v279_v48 }
  0x47   :  { %383 = vmatpush.msra.mxu0 %v310_v33  ;;  %424 = vmatpush.msra.mxu1 %v311_v34  ;;  %v3867_v55 = vld [vmem:[%s5085_s0 + $0x10] sm:$0xff]  ;;  %v3879_v58 = vld [vmem:[%s5085_s0 + $0x18] sm:$0xff]  ;;  %v274_v60 = vld [vmem:[#allocation2 + $0x160] sm:$0xff] }
  0x48   :  { %465 = vmatpush.msra.mxu2 %v312_v35  ;;  %506 = vmatpush.msra.mxu3 %v313_v36  ;;  %v280_v56 = vrot.slane %v3867_v55, 1  ;;  %v281_v59 = vrot.slane %v3879_v58, 1  ;;  %v275_v61 = vld [vmem:[#allocation2 + $0x168] sm:$0xff]  ;;  %v276_v62 = vld [vmem:[#allocation2 + $0x170] sm:$0xff]  ;;  %v277_v63 = vld [vmem:[#allocation2 + $0x178] sm:$0xff] }
  0x49   :  { %384 = vmatpush.msra.mxu0 %v306_v37  ;;  %425 = vmatpush.msra.mxu1 %v307_v39  ;;  %v270_v0 = vld [vmem:[#allocation2 + $0x140] sm:$0xff]  ;;  %v271_v1 = vld [vmem:[#allocation2 + $0x148] sm:$0xff]  ;;  %v272_v2 = vld [vmem:[#allocation2 + $0x150] sm:$0xff] }
  0x4a   :  { %466 = vmatpush.msra.mxu2 %v308_v42  ;;  %507 = vmatpush.msra.mxu3 %v309_v43  ;;  %v294_v57 = vsel %vm288_vm0, %v279_v48, %v280_v56  ;;  %v273_v3 = vld [vmem:[#allocation2 + $0x158] sm:$0xff]  ;;  %v266_v4 = vld [vmem:[#allocation2 + $0x120] sm:$0xff]  ;;  %v267_v5 = vld [vmem:[#allocation2 + $0x128] sm:$0xff]  ;;  %v293_v8 = vsel %vm288_vm0, %v280_v56, %v281_v59 }
  0x4b   :  { %385 = vmatpush.msra.mxu0 %v302_v44  ;;  %426 = vmatpush.msra.mxu1 %v303_v45  ;;  %v268_v6 = vld [vmem:[#allocation2 + $0x130] sm:$0xff]  ;;  %v269_v7 = vld [vmem:[#allocation2 + $0x138] sm:$0xff]  ;;  %v3891_v9 = vld [vmem:[%s5085_s0 + $0x20] sm:$0xff] }
  0x4c   :  { %467 = vmatpush.msra.mxu2 %v304_v46  ;;  %508 = vmatpush.msra.mxu3 %v305_v49  ;;  %v262_v10 = vld [vmem:[#allocation2 + $0x100] sm:$0xff]  ;;  %v263_v11 = vld [vmem:[#allocation2 + $0x108] sm:$0xff]  ;;  %v264_v12 = vld [vmem:[#allocation2 + $0x110] sm:$0xff]  ;;  %v282_v14 = vrot.slane %v3891_v9, 1 }
  0x4d   :  { %386 = vmatpush.msra.mxu0 %v298_v50  ;;  %427 = vmatpush.msra.mxu1 %v299_v51  ;;  %v265_v13 = vld [vmem:[#allocation2 + $0x118] sm:$0xff]  ;;  %v258_v15 = vld [vmem:[#allocation2 + $0xe0] sm:$0xff]  ;;  %v259_v16 = vld [vmem:[#allocation2 + $0xe8] sm:$0xff] }
  0x4e   :  { %468 = vmatpush.msra.mxu2 %v300_v52  ;;  %509 = vmatpush.msra.mxu3 %v301_v53  ;;  %v260_v17 = vld [vmem:[#allocation2 + $0xf0] sm:$0xff]  ;;  %v261_v18 = vld [vmem:[#allocation2 + $0xf8] sm:$0xff]  ;;  %v254_v19 = vld [vmem:[#allocation2 + $0xc0] sm:$0xff]  ;;  %v292_v23 = vsel %vm288_vm0, %v281_v59, %v282_v14 }
  0x4f   :  { %3174 = vmatmul.msk.f32.vlgmr.msra.gmra.mxu0 %vm346_vm1, %v295_v54  ;;  %3182 = vmatmul.msk.f32.vlgmr.msra.gmra.mxu1 %vm346_vm1, %v295_v54  ;;  %v255_v20 = vld [vmem:[#allocation2 + $0xc8] sm:$0xff]  ;;  %v256_v21 = vld [vmem:[#allocation2 + $0xd0] sm:$0xff]  ;;  %v257_v22 = vld [vmem:[#allocation2 + $0xd8] sm:$0xff] }
  0x50   :  { %3190 = vmatmul.msk.f32.vlgmr.msra.gmra.mxu2 %vm346_vm1, %v295_v54  ;;  %3198 = vmatmul.msk.f32.vlgmr.msra.gmra.mxu3 %vm346_vm1, %v295_v54  ;;  %v3903_v24 = vld [vmem:[%s5085_s0 + $0x28] sm:$0xff]  ;;  %v250_v25 = vld [vmem:[#allocation2 + $0xa0] sm:$0xff]  ;;  %v252_v27 = vld [vmem:[#allocation2 + $0xb0] sm:$0xff] }
  0x51   :  { %563 = vmatpush.msrb.mxu0 %v274_v60  ;;  %604 = vmatpush.msrb.mxu1 %v275_v61  ;;  %v251_v26 = vld [vmem:[#allocation2 + $0xa8] sm:$0xff]  ;;  %v253_v28 = vld [vmem:[#allocation2 + $0xb8] sm:$0xff]  ;;  %v283_v29 = vrot.slane %v3903_v24, 1  ;;  %v246_v30 = vld [vmem:[#allocation2 + $0x80] sm:$0xff] }
  0x52   :  { %645 = vmatpush.msrb.mxu2 %v276_v62  ;;  %686 = vmatpush.msrb.mxu3 %v277_v63  ;;  %v247_v31 = vld [vmem:[#allocation2 + $0x88] sm:$0xff]  ;;  %v248_v32 = vld [vmem:[#allocation2 + $0x90] sm:$0xff]  ;;  %v249_v33 = vld [vmem:[#allocation2 + $0x98] sm:$0xff] }
  0x53   :  { %564 = vmatpush.msrb.mxu0 %v270_v0  ;;  %605 = vmatpush.msrb.mxu1 %v271_v1  ;;  %v242_v34 = vld [vmem:[#allocation2 + $0x60] sm:$0xff]  ;;  %v243_v35 = vld [vmem:[#allocation2 + $0x68] sm:$0xff]  ;;  %v244_v36 = vld [vmem:[#allocation2 + $0x70] sm:$0xff]  ;;  %v291_v39 = vsel %vm288_vm0, %v282_v14, %v283_v29 }
  0x54   :  { %646 = vmatpush.msrb.mxu2 %v272_v2  ;;  %687 = vmatpush.msrb.mxu3 %v273_v3  ;;  %v245_v37 = vld [vmem:[#allocation2 + $0x78] sm:$0xff]  ;;  %v3915_v42 = vld [vmem:[%s5085_s0 + $0x30] sm:$0xff]  ;;  %v238_v43 = vld [vmem:[#allocation2 + $0x40] sm:$0xff] }
  0x55   :  { %565 = vmatpush.msrb.mxu0 %v266_v4  ;;  %606 = vmatpush.msrb.mxu1 %v267_v5  ;;  %v239_v44 = vld [vmem:[#allocation2 + $0x48] sm:$0xff]  ;;  %v240_v45 = vld [vmem:[#allocation2 + $0x50] sm:$0xff]  ;;  %v241_v46 = vld [vmem:[#allocation2 + $0x58] sm:$0xff]  ;;  %v284_v48 = vrot.slane %v3915_v42, 1 }
  0x56   :  { %647 = vmatpush.msrb.mxu2 %v268_v6  ;;  %688 = vmatpush.msrb.mxu3 %v269_v7  ;;  %v234_v49 = vld [vmem:[#allocation2 + $0x20] sm:$0xff]  ;;  %v235_v50 = vld [vmem:[#allocation2 + $0x28] sm:$0xff]  ;;  %v236_v51 = vld [vmem:[#allocation2 + $0x30] sm:$0xff] }
  0x57   :  { %3175 = vmatmul.msk.f32.gmra.mxu0 %vm346_vm1, %v294_v57  ;;  %3183 = vmatmul.msk.f32.gmra.mxu1 %vm346_vm1, %v294_v57  ;;  %v237_v52 = vld [vmem:[#allocation2 + $0x38] sm:$0xff]  ;;  %v230_v53 = vld [vmem:[#allocation2] sm:$0xff]  ;;  %v231_v54 = vld [vmem:[#allocation2 + $0x8] sm:$0xff]  ;;  %v290_v59 = vsel %vm288_vm0, %v283_v29, %v284_v48 }
  0x58   :  { %3191 = vmatmul.msk.f32.gmra.mxu2 %vm346_vm1, %v294_v57  ;;  %3199 = vmatmul.msk.f32.gmra.mxu3 %vm346_vm1, %v294_v57  ;;  %v232_v56 = vld [vmem:[#allocation2 + $0x10] sm:$0xff]  ;;  %v233_v57 = vld [vmem:[#allocation2 + $0x18] sm:$0xff]  ;;  %v786_v0 = vld [vmem:[#allocation2 + $0x468] sm:$0xff] }
  0x59   :  { %566 = vmatpush.msrb.mxu0 %v262_v10  ;;  %607 = vmatpush.msrb.mxu1 %v263_v11  ;;  %v3927_v60 = vld [vmem:[%s5085_s0 + $0x38] sm:$0xff]  ;;  %v787_v1 = vld [vmem:[#allocation2 + $0x470] sm:$0xff]  ;;  %v781_v3 = vld [vmem:[#allocation2 + $0x440] sm:$0xff] }
  0x5a   :  { %648 = vmatpush.msrb.mxu2 %v264_v12  ;;  %689 = vmatpush.msrb.mxu3 %v265_v13  ;;  %v285_v61 = vrot.slane %v3927_v60, 1  ;;  %v788_v2 = vld [vmem:[#allocation2 + $0x478] sm:$0xff]  ;;  %v782_v4 = vld [vmem:[#allocation2 + $0x448] sm:$0xff]  ;;  %v783_v5 = vld [vmem:[#allocation2 + $0x450] sm:$0xff] }
  0x5b   :  { %567 = vmatpush.msrb.mxu0 %v258_v15  ;;  %608 = vmatpush.msrb.mxu1 %v259_v16  ;;  %v784_v6 = vld [vmem:[#allocation2 + $0x458] sm:$0xff]  ;;  %v777_v7 = vld [vmem:[#allocation2 + $0x420] sm:$0xff]  ;;  %v779_v10 = vld [vmem:[#allocation2 + $0x430] sm:$0xff] }
  0x5c   :  { %649 = vmatpush.msrb.mxu2 %v260_v17  ;;  %690 = vmatpush.msrb.mxu3 %v261_v18  ;;  %v289_v62 = vsel %vm288_vm0, %v284_v48, %v285_v61  ;;  %v296_v63 = vsel %vm288_vm0, %v285_v61, %v278_v47  ;;  %v785_v47 = vld [vmem:[#allocation2 + $0x460] sm:$0xff]  ;;  %v780_v11 = vld [vmem:[#allocation2 + $0x438] sm:$0xff]  ;;  %v774_v13 = vld [vmem:[#allocation2 + $0x408] sm:$0xff] }
  0x5d   :  { %568 = vmatpush.msrb.mxu0 %v254_v19  ;;  %609 = vmatpush.msrb.mxu1 %v255_v20  ;;  %v773_v12 = vld [vmem:[#allocation2 + $0x400] sm:$0xff]  ;;  %v775_v14 = vld [vmem:[#allocation2 + $0x410] sm:$0xff]  ;;  %v776_v15 = vld [vmem:[#allocation2 + $0x418] sm:$0xff] }
  0x5e   :  { %650 = vmatpush.msrb.mxu2 %v256_v21  ;;  %691 = vmatpush.msrb.mxu3 %v257_v22  ;;  %v769_v16 = vld [vmem:[#allocation2 + $0x3e0] sm:$0xff]  ;;  %v770_v17 = vld [vmem:[#allocation2 + $0x3e8] sm:$0xff]  ;;  %v771_v18 = vld [vmem:[#allocation2 + $0x3f0] sm:$0xff] }
  0x5f   :  { %3176 = vmatmul.msk.f32.gmra.mxu0 %vm346_vm1, %v293_v8  ;;  %3184 = vmatmul.msk.f32.gmra.mxu1 %vm346_vm1, %v293_v8  ;;  %v772_v19 = vld [vmem:[#allocation2 + $0x3f8] sm:$0xff]  ;;  %v765_v20 = vld [vmem:[#allocation2 + $0x3c0] sm:$0xff]  ;;  %v766_v21 = vld [vmem:[#allocation2 + $0x3c8] sm:$0xff] }
  0x60   :  { %3192 = vmatmul.msk.f32.gmra.mxu2 %vm346_vm1, %v293_v8  ;;  %3200 = vmatmul.msk.f32.gmra.mxu3 %vm346_vm1, %v293_v8  ;;  %v778_v8 = vld [vmem:[#allocation2 + $0x428] sm:$0xff]  ;;  %v767_v22 = vld [vmem:[#allocation2 + $0x3d0] sm:$0xff]  ;;  %v757_v29 = vld [vmem:[#allocation2 + $0x380] sm:$0xff] }
  0x61   :  { %569 = vmatpush.msrb.mxu0 %v250_v25  ;;  %610 = vmatpush.msrb.mxu1 %v251_v26  ;;  %v761_v25 = vld [vmem:[#allocation2 + $0x3a0] sm:$0xff]  ;;  %v762_v26 = vld [vmem:[#allocation2 + $0x3a8] sm:$0xff]  ;;  %v747_v48 = vld [vmem:[#allocation2 + $0x330] sm:$0xff] }
  0x62   :  { %651 = vmatpush.msrb.mxu2 %v252_v27  ;;  %692 = vmatpush.msrb.mxu3 %v253_v28  ;;  %v763_v27 = vld [vmem:[#allocation2 + $0x3b0] sm:$0xff]  ;;  %v764_v28 = vld [vmem:[#allocation2 + $0x3b8] sm:$0xff]  ;;  %v2872_v38 = vld [vmem:[#allocation11 + $0x4] sm:$0x3] }
  0x63   :  { %570 = vmatpush.msrb.mxu0 %v246_v30  ;;  %611 = vmatpush.msrb.mxu1 %v247_v31  ;;  %v758_v30 = vld [vmem:[#allocation2 + $0x388] sm:$0xff]  ;;  %v759_v31 = vld [vmem:[#allocation2 + $0x390] sm:$0xff] }
  0x64   :  { %652 = vmatpush.msrb.mxu2 %v248_v32  ;;  %693 = vmatpush.msrb.mxu3 %v249_v33  ;;  %v760_v32 = vld [vmem:[#allocation2 + $0x398] sm:$0xff]  ;;  %v753_v33 = vld [vmem:[#allocation2 + $0x360] sm:$0xff] }
  0x65   :  { %571 = vmatpush.msrb.mxu0 %v242_v34  ;;  %612 = vmatpush.msrb.mxu1 %v243_v35  ;;  %v754_v34 = vld [vmem:[#allocation2 + $0x368] sm:$0xff]  ;;  %v755_v35 = vld [vmem:[#allocation2 + $0x370] sm:$0xff] }
  0x66   :  { %653 = vmatpush.msrb.mxu2 %v244_v36  ;;  %694 = vmatpush.msrb.mxu3 %v245_v37  ;;  %v756_v36 = vld [vmem:[#allocation2 + $0x378] sm:$0xff]  ;;  %v749_v37 = vld [vmem:[#allocation2 + $0x340] sm:$0xff] }
  0x67   :  { %3177 = vmatmul.msk.f32.gmra.mxu0 %vm346_vm1, %v292_v23  ;;  %3185 = vmatmul.msk.f32.gmra.mxu1 %vm346_vm1, %v292_v23 }
  0x68   :  { %3193 = vmatmul.msk.f32.gmra.mxu2 %vm346_vm1, %v292_v23  ;;  %3201 = vmatmul.msk.f32.gmra.mxu3 %vm346_vm1, %v292_v23  ;;  %v768_v23 = vld [vmem:[#allocation2 + $0x3d8] sm:$0xff] }
  0x69   :  { %572 = vmatpush.msrb.mxu0 %v238_v43  ;;  %613 = vmatpush.msrb.mxu1 %v239_v44  ;;  %v751_v43 = vld [vmem:[#allocation2 + $0x350] sm:$0xff]  ;;  %v752_v44 = vld [vmem:[#allocation2 + $0x358] sm:$0xff] }
  0x6a   :  { %654 = vmatpush.msrb.mxu2 %v240_v45  ;;  %695 = vmatpush.msrb.mxu3 %v241_v46  ;;  %v745_v45 = vld [vmem:[#allocation2 + $0x320] sm:$0xff]  ;;  %v746_v46 = vld [vmem:[#allocation2 + $0x328] sm:$0xff] }
  0x6b   :  { %573 = vmatpush.msrb.mxu0 %v234_v49  ;;  %614 = vmatpush.msrb.mxu1 %v235_v50  ;;  %v748_v49 = vld [vmem:[#allocation2 + $0x338] sm:$0xff]  ;;  %v741_v50 = vld [vmem:[#allocation2 + $0x300] sm:$0xff] }
  0x6c   :  { %655 = vmatpush.msrb.mxu2 %v236_v51  ;;  %696 = vmatpush.msrb.mxu3 %v237_v52  ;;  %v742_v51 = vld [vmem:[#allocation2 + $0x308] sm:$0xff]  ;;  %v743_v52 = vld [vmem:[#allocation2 + $0x310] sm:$0xff] }
  0x6d   :  { %574 = vmatpush.msrb.mxu0 %v230_v53  ;;  %615 = vmatpush.msrb.mxu1 %v231_v54  ;;  %v744_v53 = vld [vmem:[#allocation2 + $0x318] sm:$0xff]  ;;  %v723_v54 = vrot.slane %v3850_v40, 2 }
  0x6e   :  { %656 = vmatpush.msrb.mxu2 %v232_v56  ;;  %697 = vmatpush.msrb.mxu3 %v233_v57  ;;  %v724_v56 = vrot.slane %v3855_v41, 2 }
  0x6f   :  { %3178 = vmatmul.msk.f32.gmra.mxu0 %vm346_vm1, %v291_v39  ;;  %3186 = vmatmul.msk.f32.gmra.mxu1 %vm346_vm1, %v291_v39 }
  0x70   :  { %3194 = vmatmul.msk.f32.gmra.mxu2 %vm346_vm1, %v291_v39  ;;  %3202 = vmatmul.msk.f32.gmra.mxu3 %vm346_vm1, %v291_v39  ;;  %v750_v39 = vld [vmem:[#allocation2 + $0x348] sm:$0xff]  ;;  %v738_v61 = vsel %vm731_vm2, %v723_v54, %v724_v56 }
  0x71   :  { %817 = vmatpush.msra.mxu0 %v785_v47  ;;  %858 = vmatpush.msra.mxu1 %v786_v0 }
  0x72   :  { %899 = vmatpush.msra.mxu2 %v787_v1  ;;  %940 = vmatpush.msra.mxu3 %v788_v2 }
  0x73   :  { %818 = vmatpush.msra.mxu0 %v781_v3  ;;  %859 = vmatpush.msra.mxu1 %v782_v4  ;;  %v726_v3 = vrot.slane %v3879_v58, 2  ;;  %v1071_v4 = vld [vmem:[#allocation2 + $0x5e0] sm:$0xff] }
  0x74   :  { %900 = vmatpush.msra.mxu2 %v783_v5  ;;  %941 = vmatpush.msra.mxu3 %v784_v6  ;;  %v1072_v5 = vld [vmem:[#allocation2 + $0x5e8] sm:$0xff]  ;;  %v1073_v6 = vld [vmem:[#allocation2 + $0x5f0] sm:$0xff] }
  0x75   :  { %819 = vmatpush.msra.mxu0 %v777_v7  ;;  %860 = vmatpush.msra.mxu1 %v778_v8  ;;  %v1074_v7 = vld [vmem:[#allocation2 + $0x5f8] sm:$0xff]  ;;  %v1067_v8 = vld [vmem:[#allocation2 + $0x5c0] sm:$0xff] }
  0x76   :  { %901 = vmatpush.msra.mxu2 %v779_v10  ;;  %942 = vmatpush.msra.mxu3 %v780_v11  ;;  %v1068_v10 = vld [vmem:[#allocation2 + $0x5c8] sm:$0xff]  ;;  %v1069_v11 = vld [vmem:[#allocation2 + $0x5d0] sm:$0xff] }
  0x77   :  { %3179 = vmatmul.msk.f32.gmra.mxu0 %vm346_vm1, %v290_v59  ;;  %3187 = vmatmul.msk.f32.gmra.mxu1 %vm346_vm1, %v290_v59 }
  0x78   :  { %3195 = vmatmul.msk.f32.gmra.mxu2 %vm346_vm1, %v290_v59  ;;  %3203 = vmatmul.msk.f32.gmra.mxu3 %vm346_vm1, %v290_v59 }
  0x79   :  { %820 = vmatpush.msra.mxu0 %v773_v12  ;;  %861 = vmatpush.msra.mxu1 %v774_v13 }
  0x7a   :  { %902 = vmatpush.msra.mxu2 %v775_v14  ;;  %943 = vmatpush.msra.mxu3 %v776_v15  ;;  %v1070_v14 = vld [vmem:[#allocation2 + $0x5d8] sm:$0xff] }
  0x7b   :  { %821 = vmatpush.msra.mxu0 %v769_v16  ;;  %862 = vmatpush.msra.mxu1 %v770_v17 }
  0x7c   :  { %903 = vmatpush.msra.mxu2 %v771_v18  ;;  %944 = vmatpush.msra.mxu3 %v772_v19  ;;  %v1063_v18 = vld [vmem:[#allocation2 + $0x5a0] sm:$0xff]  ;;  %v1064_v19 = vld [vmem:[#allocation2 + $0x5a8] sm:$0xff] }
  0x7d   :  { %822 = vmatpush.msra.mxu0 %v765_v20  ;;  %863 = vmatpush.msra.mxu1 %v766_v21  ;;  %v1065_v20 = vld [vmem:[#allocation2 + $0x5b0] sm:$0xff]  ;;  %v1066_v21 = vld [vmem:[#allocation2 + $0x5b8] sm:$0xff] }
  0x7e   :  { %904 = vmatpush.msra.mxu2 %v767_v22  ;;  %945 = vmatpush.msra.mxu3 %v768_v23  ;;  %v1059_v22 = vld [vmem:[#allocation2 + $0x580] sm:$0xff]  ;;  %v1060_v23 = vld [vmem:[#allocation2 + $0x588] sm:$0xff] }
  0x7f   :  { %3180 = vmatmul.msk.f32.gmra.mxu0 %vm346_vm1, %v289_v62  ;;  %3188 = vmatmul.msk.f32.gmra.mxu1 %vm346_vm1, %v289_v62 }
  0x80   :  { %3196 = vmatmul.msk.f32.gmra.mxu2 %vm346_vm1, %v289_v62  ;;  %3204 = vmatmul.msk.f32.gmra.mxu3 %vm346_vm1, %v289_v62  ;;  %v725_v62 = vrot.slane %v3867_v55, 2 }
  0x81   :  { %823 = vmatpush.msra.mxu0 %v761_v25  ;;  %864 = vmatpush.msra.mxu1 %v762_v26  ;;  %v1061_v25 = vld [vmem:[#allocation2 + $0x590] sm:$0xff]  ;;  %v1062_v26 = vld [vmem:[#allocation2 + $0x598] sm:$0xff] }
  0x82   :  { %905 = vmatpush.msra.mxu2 %v763_v27  ;;  %946 = vmatpush.msra.mxu3 %v764_v28  ;;  %v737_v2 = vsel %vm731_vm2, %v724_v56, %v725_v62  ;;  %v736_v17 = vsel %vm731_vm2, %v725_v62, %v726_v3  ;;  %v727_v27 = vrot.slane %v3891_v9, 2  ;;  %v1055_v28 = vld [vmem:[#allocation2 + $0x560] sm:$0xff]  ;;  %v1046_v56 = vld [vmem:[#allocation2 + $0x518] sm:$0xff]  ;;  %v1040_v62 = vld [vmem:[#allocation2 + $0x4e8] sm:$0xff] }
  0x83   :  { %824 = vmatpush.msra.mxu0 %v757_v29  ;;  %865 = vmatpush.msra.mxu1 %v758_v30  ;;  %v1056_v29 = vld [vmem:[#allocation2 + $0x568] sm:$0xff]  ;;  %v1057_v30 = vld [vmem:[#allocation2 + $0x570] sm:$0xff] }
  0x84   :  { %906 = vmatpush.msra.mxu2 %v759_v31  ;;  %947 = vmatpush.msra.mxu3 %v760_v32  ;;  %v1058_v31 = vld [vmem:[#allocation2 + $0x578] sm:$0xff]  ;;  %v1051_v32 = vld [vmem:[#allocation2 + $0x540] sm:$0xff] }
  0x85   :  { %825 = vmatpush.msra.mxu0 %v753_v33  ;;  %866 = vmatpush.msra.mxu1 %v754_v34  ;;  %v1052_v33 = vld [vmem:[#allocation2 + $0x548] sm:$0xff] }
  0x86   :  { %907 = vmatpush.msra.mxu2 %v755_v35  ;;  %948 = vmatpush.msra.mxu3 %v756_v36  ;;  %v1053_v36 = vld [vmem:[#allocation2 + $0x550] sm:$0xff] }
  0x87   :  { %3181 = vmatmul.msk.f32.gmra.mxu0 %vm346_vm1, %v296_v63  ;;  %3189 = vmatmul.msk.f32.gmra.mxu1 %vm346_vm1, %v296_v63 }
  0x88   :  { %3197 = vmatmul.msk.f32.gmra.mxu2 %vm346_vm1, %v296_v63  ;;  %3205 = vmatmul.msk.f32.gmra.mxu3 %vm346_vm1, %v296_v63 }
  0x89   :  { %826 = vmatpush.msra.mxu0 %v749_v37  ;;  %867 = vmatpush.msra.mxu1 %v750_v39  ;;  %v1054_v37 = vld [vmem:[#allocation2 + $0x558] sm:$0xff] }
  0x8a   :  { %908 = vmatpush.msra.mxu2 %v751_v43  ;;  %949 = vmatpush.msra.mxu3 %v752_v44  ;;  %v735_v44 = vsel %vm731_vm2, %v726_v3, %v727_v27 }
  0x8b   :  { %827 = vmatpush.msra.mxu0 %v745_v45  ;;  %868 = vmatpush.msra.mxu1 %v746_v46  ;;  %v1047_v45 = vld [vmem:[#allocation2 + $0x520] sm:$0xff]  ;;  %v1048_v46 = vld [vmem:[#allocation2 + $0x528] sm:$0xff] }
  0x8c   :  { %909 = vmatpush.msra.mxu2 %v747_v48  ;;  %950 = vmatpush.msra.mxu3 %v748_v49  ;;  %v1049_v48 = vld [vmem:[#allocation2 + $0x530] sm:$0xff]  ;;  %v1050_v49 = vld [vmem:[#allocation2 + $0x538] sm:$0xff] }
  0x8d   :  { %828 = vmatpush.msra.mxu0 %v741_v50  ;;  %869 = vmatpush.msra.mxu1 %v742_v51  ;;  %v728_v50 = vrot.slane %v3903_v24, 2  ;;  %v1043_v51 = vld [vmem:[#allocation2 + $0x500] sm:$0xff] }
  0x8e   :  { %910 = vmatpush.msra.mxu2 %v743_v52  ;;  %951 = vmatpush.msra.mxu3 %v744_v53  ;;  %v1044_v52 = vld [vmem:[#allocation2 + $0x508] sm:$0xff]  ;;  %v1045_v53 = vld [vmem:[#allocation2 + $0x510] sm:$0xff] }
  0x8f   :  { %3206 = vmatmul.msk.f32.vlgmr.msrb.gmra.mxu0 %vm346_vm1, %v3850_v40  ;;  %3214 = vmatmul.msk.f32.vlgmr.msrb.gmra.mxu1 %vm346_vm1, %v3850_v40 }
  0x90   :  { %3222 = vmatmul.msk.f32.vlgmr.msrb.gmra.mxu2 %vm346_vm1, %v3850_v40  ;;  %3230 = vmatmul.msk.f32.vlgmr.msrb.gmra.mxu3 %vm346_vm1, %v3850_v40 }
  0x91   :  { %1103 = vmatpush.msrb.mxu0 %v1071_v4  ;;  %1144 = vmatpush.msrb.mxu1 %v1072_v5  ;;  %v1041_v4 = vld [vmem:[#allocation2 + $0x4f0] sm:$0xff]  ;;  %v1042_v5 = vld [vmem:[#allocation2 + $0x4f8] sm:$0xff] }
  0x92   :  { %1185 = vmatpush.msrb.mxu2 %v1073_v6  ;;  %1226 = vmatpush.msrb.mxu3 %v1074_v7 }
  0x93   :  { %1104 = vmatpush.msrb.mxu0 %v1067_v8  ;;  %1145 = vmatpush.msrb.mxu1 %v1068_v10  ;;  %v734_v8 = vsel %vm731_vm2, %v727_v27, %v728_v50  ;;  %v1035_v10 = vld [vmem:[#allocation2 + $0x4c0] sm:$0xff] }
  0x94   :  { %1186 = vmatpush.msrb.mxu2 %v1069_v11  ;;  %1227 = vmatpush.msrb.mxu3 %v1070_v14  ;;  %v1036_v11 = vld [vmem:[#allocation2 + $0x4c8] sm:$0xff]  ;;  %v1037_v14 = vld [vmem:[#allocation2 + $0x4d0] sm:$0xff] }
  0x95   :  { %1105 = vmatpush.msrb.mxu0 %v1063_v18  ;;  %1146 = vmatpush.msrb.mxu1 %v1064_v19  ;;  %v729_v18 = vrot.slane %v3915_v42, 2  ;;  %v1031_v19 = vld [vmem:[#allocation2 + $0x4a0] sm:$0xff] }
  0x96   :  { %1187 = vmatpush.msrb.mxu2 %v1065_v20  ;;  %1228 = vmatpush.msrb.mxu3 %v1066_v21  ;;  %v1032_v20 = vld [vmem:[#allocation2 + $0x4a8] sm:$0xff]  ;;  %v1033_v21 = vld [vmem:[#allocation2 + $0x4b0] sm:$0xff] }
  0x97   :  { %3207 = vmatmul.msk.f32.gmra.mxu0 %vm346_vm1, %v3855_v41  ;;  %3215 = vmatmul.msk.f32.gmra.mxu1 %vm346_vm1, %v3855_v41 }
  0x98   :  { %3223 = vmatmul.msk.f32.gmra.mxu2 %vm346_vm1, %v3855_v41  ;;  %3231 = vmatmul.msk.f32.gmra.mxu3 %vm346_vm1, %v3855_v41 }
  0x99   :  { %1106 = vmatpush.msrb.mxu0 %v1059_v22  ;;  %1147 = vmatpush.msrb.mxu1 %v1060_v23  ;;  %v1034_v22 = vld [vmem:[#allocation2 + $0x4b8] sm:$0xff]  ;;  %v1027_v23 = vld [vmem:[#allocation2 + $0x480] sm:$0xff] }
  0x9a   :  { %1188 = vmatpush.msrb.mxu2 %v1061_v25  ;;  %1229 = vmatpush.msrb.mxu3 %v1062_v26  ;;  %v1028_v25 = vld [vmem:[#allocation2 + $0x488] sm:$0xff] }
  0x9b   :  { %1107 = vmatpush.msrb.mxu0 %v1055_v28  ;;  %1148 = vmatpush.msrb.mxu1 %v1056_v29  ;;  %v1029_v28 = vld [vmem:[#allocation2 + $0x490] sm:$0xff]  ;;  %v1030_v29 = vld [vmem:[#allocation2 + $0x498] sm:$0xff] }
  0x9c   :  { %1189 = vmatpush.msrb.mxu2 %v1057_v30  ;;  %1230 = vmatpush.msrb.mxu3 %v1058_v31 }
  0x9d   :  { %1108 = vmatpush.msrb.mxu0 %v1051_v32  ;;  %1149 = vmatpush.msrb.mxu1 %v1052_v33  ;;  %v733_v32 = vsel %vm731_vm2, %v728_v50, %v729_v18  ;;  %v730_v33 = vrot.slane %v3927_v60, 2 }
  0x9e   :  { %1190 = vmatpush.msrb.mxu2 %v1053_v36  ;;  %1231 = vmatpush.msrb.mxu3 %v1054_v37 }
  0x9f   :  { %3208 = vmatmul.msk.f32.gmra.mxu0 %vm346_vm1, %v3867_v55  ;;  %3216 = vmatmul.msk.f32.gmra.mxu1 %vm346_vm1, %v3867_v55 }
  0xa0   :  { %3224 = vmatmul.msk.f32.gmra.mxu2 %vm346_vm1, %v3867_v55  ;;  %3232 = vmatmul.msk.f32.gmra.mxu3 %vm346_vm1, %v3867_v55 }
  0xa1   :  { %1109 = vmatpush.msrb.mxu0 %v1047_v45  ;;  %1150 = vmatpush.msrb.mxu1 %v1048_v46  ;;  %v732_v46 = vsel %vm731_vm2, %v729_v18, %v730_v33 }
  0xa2   :  { %1191 = vmatpush.msrb.mxu2 %v1049_v48  ;;  %1232 = vmatpush.msrb.mxu3 %v1050_v49 }
  0xa3   :  { %1110 = vmatpush.msrb.mxu0 %v1043_v51  ;;  %1151 = vmatpush.msrb.mxu1 %v1044_v52  ;;  %v739_v52 = vsel %vm731_vm2, %v730_v33, %v723_v54 }
  0xa4   :  { %1192 = vmatpush.msrb.mxu2 %v1045_v53  ;;  %1233 = vmatpush.msrb.mxu3 %v1046_v56  ;;  %v1009_v53 = vrot.slane %v3850_v40, 3  ;;  %v1010_v56 = vrot.slane %v3855_v41, 3  ;;  %v1011_v41 = vrot.slane %v3867_v55, 3  ;;  %v1012_v55 = vrot.slane %v3879_v58, 3  ;;  %v3372_v40 = vld [vmem:[%s5085_s0 + $0x8] sm:$0xff] }
  0xa5   :  { %1152 = vmatpush.msrb.mxu1 %v1040_v62 }
  0xa6   :  { %1193 = vmatpush.msrb.mxu2 %v1041_v4  ;;  %1234 = vmatpush.msrb.mxu3 %v1042_v5  ;;  %v1024_v5 = vsel %vm1017_vm3, %v1009_v53, %v1010_v56 }
  0xa7   :  { %3209 = vmatmul.msk.f32.gmra.mxu0 %vm346_vm1, %v3879_v58  ;;  %3217 = vmatmul.msk.f32.gmra.mxu1 %vm346_vm1, %v3879_v58 }
  0xa8   :  { %3225 = vmatmul.msk.f32.gmra.mxu2 %vm346_vm1, %v3879_v58  ;;  %3233 = vmatmul.msk.f32.gmra.mxu3 %vm346_vm1, %v3879_v58 }
  0xa9   :  { %1153 = vmatpush.msrb.mxu1 %v1036_v11  ;;  %1194 = vmatpush.msrb.mxu2 %v1037_v14 }
  0xab   :  { %1154 = vmatpush.msrb.mxu1 %v1032_v20  ;;  %1195 = vmatpush.msrb.mxu2 %v1033_v21  ;;  %v1359_v20 = vld [vmem:[#allocation2 + $0x770] sm:$0xff]  ;;  %v1360_v21 = vld [vmem:[#allocation2 + $0x778] sm:$0xff] }
  0xad   :  { %1155 = vmatpush.msrb.mxu1 %v1028_v25  ;;  %1196 = vmatpush.msrb.mxu2 %v1029_v28  ;;  %v1355_v25 = vld [vmem:[#allocation2 + $0x750] sm:$0xff] }
  0xaf   :  { %3210 = vmatmul.msk.f32.gmra.mxu0 %vm346_vm1, %v3891_v9  ;;  %3218 = vmatmul.msk.f32.gmra.mxu1 %vm346_vm1, %v3891_v9 }
  0xb0   :  { %3226 = vmatmul.msk.f32.gmra.mxu2 %vm346_vm1, %v3891_v9  ;;  %3234 = vmatmul.msk.f32.gmra.mxu3 %vm346_vm1, %v3891_v9 }
  0xb7   :  { %3211 = vmatmul.msk.f32.gmra.mxu0 %vm346_vm1, %v3903_v24  ;;  %3219 = vmatmul.msk.f32.gmra.mxu1 %vm346_vm1, %v3903_v24 }
  0xb8   :  { %3227 = vmatmul.msk.f32.gmra.mxu2 %vm346_vm1, %v3903_v24  ;;  %3235 = vmatmul.msk.f32.gmra.mxu3 %vm346_vm1, %v3903_v24 }
  0xbf   :  { %3212 = vmatmul.msk.f32.gmra.mxu0 %vm346_vm1, %v3915_v42  ;;  %3220 = vmatmul.msk.f32.gmra.mxu1 %vm346_vm1, %v3915_v42 }
  0xc0   :  { %3228 = vmatmul.msk.f32.gmra.mxu2 %vm346_vm1, %v3915_v42  ;;  %3236 = vmatmul.msk.f32.gmra.mxu3 %vm346_vm1, %v3915_v42 }
  0xc7   :  { %3213 = vmatmul.msk.f32.gmra.mxu0 %vm346_vm1, %v3927_v60  ;;  %3221 = vmatmul.msk.f32.gmra.mxu1 %vm346_vm1, %v3927_v60 }
  0xc8   :  { %3229 = vmatmul.msk.f32.gmra.mxu2 %vm346_vm1, %v3927_v60  ;;  %3237 = vmatmul.msk.f32.gmra.mxu3 %vm346_vm1, %v3927_v60 }
  0xcc   :  { %v4015_v57 = vpop.f32.mrf.mxu0  ;;  %v4017_v59 = vpop.f32.mrf.mxu1 }
  0xcf   :  { %3238 = vmatmul.msk.f32.vlgmr.msra.gmra.mxu0 %vm346_vm1, %v738_v61  ;;  %3246 = vmatmul.msk.f32.vlgmr.msra.gmra.mxu1 %vm346_vm1, %v738_v61 }
  0xd0   :  { %3254 = vmatmul.msk.f32.vlgmr.msra.gmra.mxu2 %vm346_vm1, %v738_v61  ;;  %3262 = vmatmul.msk.f32.vlgmr.msra.gmra.mxu3 %vm346_vm1, %v738_v61  ;;  %v1039_v61 = vld [vmem:[#allocation2 + $0x4e0] sm:$0xff] }
  0xd1   :  { %1111 = vmatpush.msrb.mxu0 %v1039_v61  ;;  %1471 = vmatpush.msra.mxu2 %v1359_v20  ;;  %v1341_v20 = vld [vmem:[#allocation2 + $0x6e0] sm:$0xff] }
  0xd3   :  { %v4028_v63 = vpop.f32.mrf.mxu2  ;;  %v4030_v47 = vpop.f32.mrf.mxu3  ;;  %1112 = vmatpush.msrb.mxu0 %v1035_v10  ;;  %1472 = vmatpush.msra.mxu2 %v1355_v25  ;;  %v1337_v25 = vld [vmem:[#allocation2 + $0x6c0] sm:$0xff] }
  0xd4   :  { %v4032_v0 = vpop.f32.mrf.mxu0  ;;  %v4034_v1 = vpop.f32.mrf.mxu1 }
  0xd5   :  { %1113 = vmatpush.msrb.mxu0 %v1031_v19  ;;  %v1023_v19 = vsel %vm1017_vm3, %v1010_v56, %v1011_v41  ;;  %v1022_v56 = vsel %vm1017_vm3, %v1011_v41, %v1012_v55  ;;  %v1013_v41 = vrot.slane %v3891_v9, 3 }
  0xd7   :  { %3239 = vmatmul.msk.f32.gmra.mxu0 %vm346_vm1, %v737_v2  ;;  %3247 = vmatmul.msk.f32.gmra.mxu1 %vm346_vm1, %v737_v2 }
  0xd8   :  { %3255 = vmatmul.msk.f32.gmra.mxu2 %vm346_vm1, %v737_v2  ;;  %3263 = vmatmul.msk.f32.gmra.mxu3 %vm346_vm1, %v737_v2 }
  0xd9   :  { %1114 = vmatpush.msrb.mxu0 %v1027_v23  ;;  %v1354_v23 = vld [vmem:[#allocation2 + $0x748] sm:$0xff] }
  0xdb   :  { %v4043_v12 = vpop.f32.mrf.mxu2  ;;  %v4045_v13 = vpop.f32.mrf.mxu3 }
  0xdc   :  { %v4047_v15 = vpop.f32.mrf.mxu0  ;;  %v4049_v16 = vpop.f32.mrf.mxu1 }
  0xdf   :  { %3240 = vmatmul.msk.f32.gmra.mxu0 %vm346_vm1, %v736_v17  ;;  %3248 = vmatmul.msk.f32.gmra.mxu1 %vm346_vm1, %v736_v17 }
  0xe0   :  { %3256 = vmatmul.msk.f32.gmra.mxu2 %vm346_vm1, %v736_v17  ;;  %3264 = vmatmul.msk.f32.gmra.mxu3 %vm346_vm1, %v736_v17  ;;  %v1038_v17 = vld [vmem:[#allocation2 + $0x4d8] sm:$0xff] }
  0xe1   :  { %1235 = vmatpush.msrb.mxu3 %v1038_v17 }
  0xe3   :  { %v4058_v34 = vpop.f32.mrf.mxu2  ;;  %v4060_v35 = vpop.f32.mrf.mxu3  ;;  %1236 = vmatpush.msrb.mxu3 %v1034_v22  ;;  %v1353_v22 = vld [vmem:[#allocation2 + $0x740] sm:$0xff] }
  0xe4   :  { %v4062_v39 = vpop.f32.mrf.mxu0  ;;  %v4064_v43 = vpop.f32.mrf.mxu1 }
  0xe5   :  { %1237 = vmatpush.msrb.mxu3 %v1030_v29 }
  0xe7   :  { %3241 = vmatmul.msk.f32.gmra.mxu0 %vm346_vm1, %v735_v44  ;;  %3249 = vmatmul.msk.f32.gmra.mxu1 %vm346_vm1, %v735_v44 }
  0xe8   :  { %3257 = vmatmul.msk.f32.gmra.mxu2 %vm346_vm1, %v735_v44  ;;  %3265 = vmatmul.msk.f32.gmra.mxu3 %vm346_vm1, %v735_v44 }
  0xe9   :  { %1512 = vmatpush.msra.mxu3 %v1360_v21  ;;  %v1342_v21 = vld [vmem:[#allocation2 + $0x6e8] sm:$0xff] }
  0xeb   :  { %v4073_v2 = vpop.f32.mrf.mxu2  ;;  %v4075_v3 = vpop.f32.mrf.mxu3 }
  0xec   :  { %v4077_v6 = vpop.f32.mrf.mxu0  ;;  %v4079_v7 = vpop.f32.mrf.mxu1 }
  0xed   :  { %5100 = vst [vmem:[#allocation31_spill] sm:$0xff] %v4077_v6 }
  0xee   :  { %5101 = vst [vmem:[#allocation32_spill] sm:$0xff] %v4079_v7 }
  0xef   :  { %3242 = vmatmul.msk.f32.gmra.mxu0 %vm346_vm1, %v734_v8  ;;  %3250 = vmatmul.msk.f32.gmra.mxu1 %vm346_vm1, %v734_v8 }
  0xf0   :  { %3258 = vmatmul.msk.f32.gmra.mxu2 %vm346_vm1, %v734_v8  ;;  %3266 = vmatmul.msk.f32.gmra.mxu3 %vm346_vm1, %v734_v8 }
  0xf3   :  { %v4088_v26 = vpop.f32.mrf.mxu2  ;;  %v4090_v27 = vpop.f32.mrf.mxu3 }
  0xf4   :  { %v4092_v30 = vpop.f32.mrf.mxu0  ;;  %v4094_v31 = vpop.f32.mrf.mxu1 }
  0xf5   :  { %5102 = vst [vmem:[#allocation33_spill] sm:$0xff] %v4092_v30 }
  0xf6   :  { %5103 = vst [vmem:[#allocation34_spill] sm:$0xff] %v4094_v31 }
  0xf7   :  { %3243 = vmatmul.msk.f32.gmra.mxu0 %vm346_vm1, %v733_v32  ;;  %3251 = vmatmul.msk.f32.gmra.mxu1 %vm346_vm1, %v733_v32 }
  0xf8   :  { %3259 = vmatmul.msk.f32.gmra.mxu2 %vm346_vm1, %v733_v32  ;;  %3267 = vmatmul.msk.f32.gmra.mxu3 %vm346_vm1, %v733_v32  ;;  %v1356_v32 = vld [vmem:[#allocation2 + $0x758] sm:$0xff] }
  0xf9   :  { %1513 = vmatpush.msra.mxu3 %v1356_v32 }
  0xfb   :  { %v4103_v36 = vpop.f32.mrf.mxu2  ;;  %v4105_v37 = vpop.f32.mrf.mxu3 }
  0xfc   :  { %v4107_v44 = vpop.f32.mrf.mxu0  ;;  %v4109_v45 = vpop.f32.mrf.mxu1 }
  0xfd   :  { %5104 = vst [vmem:[#allocation35_spill] sm:$0xff] %v4107_v44 }
  0xfe   :  { %5105 = vst [vmem:[#allocation36_spill] sm:$0xff] %v4109_v45 }
  0xff   :  { %3244 = vmatmul.msk.f32.gmra.mxu0 %vm346_vm1, %v732_v46  ;;  %3252 = vmatmul.msk.f32.gmra.mxu1 %vm346_vm1, %v732_v46 }
 0x100   :  { %3260 = vmatmul.msk.f32.gmra.mxu2 %vm346_vm1, %v732_v46  ;;  %3268 = vmatmul.msk.f32.gmra.mxu3 %vm346_vm1, %v732_v46 }
 0x103   :  { %v4117_v48 = vpop.f32.mrf.mxu2  ;;  %v4119_v49 = vpop.f32.mrf.mxu3 }
 0x104   :  { %v4121_v50 = vpop.f32.mrf.mxu0  ;;  %v4123_v51 = vpop.f32.mrf.mxu1 }
 0x105   :  { %5106 = vst [vmem:[#allocation37_spill] sm:$0xff] %v4121_v50 }
 0x106   :  { %5107 = vst [vmem:[#allocation38_spill] sm:$0xff] %v4123_v51 }
 0x107   :  { %3245 = vmatmul.msk.f32.gmra.mxu0 %vm346_vm1, %v739_v52  ;;  %3253 = vmatmul.msk.f32.gmra.mxu1 %vm346_vm1, %v739_v52 }
 0x108   :  { %3261 = vmatmul.msk.f32.gmra.mxu2 %vm346_vm1, %v739_v52  ;;  %3269 = vmatmul.msk.f32.gmra.mxu3 %vm346_vm1, %v739_v52 }
 0x10b   :  { %v4136_v61 = vpop.f32.mrf.mxu2  ;;  %v4138_v62 = vpop.f32.mrf.mxu3 }
 0x10c   :  { %v4140_v4 = vpop.f32.mrf.mxu0  ;;  %v4142_v54 = vpop.f32.mrf.mxu1 }
 0x10f   :  { %3270 = vmatmul.msk.f32.vlgmr.msrb.gmra.mxu0 %vm346_vm1, %v1024_v5  ;;  %3278 = vmatmul.msk.f32.vlgmr.msrb.gmra.mxu1 %vm346_vm1, %v1024_v5 }
 0x110   :  { %3286 = vmatmul.msk.f32.vlgmr.msrb.gmra.mxu2 %vm346_vm1, %v1024_v5  ;;  %3294 = vmatmul.msk.f32.vlgmr.msrb.gmra.mxu3 %vm346_vm1, %v1024_v5  ;;  %v1349_v5 = vld [vmem:[#allocation2 + $0x720] sm:$0xff] }
 0x113   :  { %v658_v8 = vpop.f32.mrf.mxu2  ;;  %v699_v10 = vpop.f32.mrf.mxu3 }
 0x114   :  { %v4154_v11 = vadd.f32 %v658_v8, %v4028_v63  ;;  %v4157_v14 = vadd.f32 %v699_v10, %v4030_v47  ;;  %v4159_v17 = vpop.f32.mrf.mxu0  ;;  %v4161_v18 = vpop.f32.mrf.mxu1  ;;  %v1357_v63 = vld [vmem:[#allocation2 + $0x760] sm:$0xff]  ;;  %v1358_v47 = vld [vmem:[#allocation2 + $0x768] sm:$0xff]  ;;  %v1351_v10 = vld [vmem:[#allocation2 + $0x730] sm:$0xff] }
 0x115   :  { %1389 = vmatpush.msra.mxu0 %v1357_v63  ;;  %1430 = vmatpush.msra.mxu1 %v1358_v47  ;;  %v1350_v8 = vld [vmem:[#allocation2 + $0x728] sm:$0xff]  ;;  %v1347_v63 = vld [vmem:[#allocation2 + $0x710] sm:$0xff]  ;;  %v1348_v47 = vld [vmem:[#allocation2 + $0x718] sm:$0xff] }
 0x116   :  { %1473 = vmatpush.msra.mxu2 %v1351_v10 }
 0x117   :  { %3271 = vmatmul.msk.f32.gmra.mxu0 %vm346_vm1, %v1023_v19  ;;  %3279 = vmatmul.msk.f32.gmra.mxu1 %vm346_vm1, %v1023_v19 }
 0x118   :  { %3287 = vmatmul.msk.f32.gmra.mxu2 %vm346_vm1, %v1023_v19  ;;  %3295 = vmatmul.msk.f32.gmra.mxu3 %vm346_vm1, %v1023_v19  ;;  %v1352_v19 = vld [vmem:[#allocation2 + $0x738] sm:$0xff] }
 0x119   :  { %1390 = vmatpush.msra.mxu0 %v1353_v22  ;;  %1431 = vmatpush.msra.mxu1 %v1354_v23  ;;  %v1343_v22 = vld [vmem:[#allocation2 + $0x6f0] sm:$0xff]  ;;  %v1344_v23 = vld [vmem:[#allocation2 + $0x6f8] sm:$0xff] }
 0x11a   :  { %1514 = vmatpush.msra.mxu3 %v1352_v19  ;;  %1474 = vmatpush.msra.mxu2 %v1347_v63  ;;  %v1334_v63 = vld [vmem:[#allocation2 + $0x6a8] sm:$0xff] }
 0x11b   :  { %v661_v28 = vpop.f32.mrf.mxu2  ;;  %v702_v29 = vpop.f32.mrf.mxu3  ;;  %1391 = vmatpush.msra.mxu0 %v1349_v5  ;;  %1432 = vmatpush.msra.mxu1 %v1350_v8  ;;  %v1339_v5 = vld [vmem:[#allocation2 + $0x6d0] sm:$0xff]  ;;  %v1340_v8 = vld [vmem:[#allocation2 + $0x6d8] sm:$0xff] }
 0x11c   :  { %v4171_v33 = vadd.f32 %v661_v28, %v4043_v12  ;;  %v4174_v58 = vadd.f32 %v702_v29, %v4045_v13  ;;  %v4176_v46 = vpop.f32.mrf.mxu0  ;;  %v4178_v52 = vpop.f32.mrf.mxu1  ;;  %v1345_v12 = vld [vmem:[#allocation2 + $0x700] sm:$0xff]  ;;  %v1346_v13 = vld [vmem:[#allocation2 + $0x708] sm:$0xff]  ;;  %1515 = vmatpush.msra.mxu3 %v1348_v47  ;;  %1475 = vmatpush.msra.mxu2 %v1343_v22  ;;  %v1332_v22 = vld [vmem:[#allocation2 + $0x698] sm:$0xff] }
 0x11d   :  { %1392 = vmatpush.msra.mxu0 %v1345_v12  ;;  %1433 = vmatpush.msra.mxu1 %v1346_v13  ;;  %v1338_v28 = vld [vmem:[#allocation2 + $0x6c8] sm:$0xff]  ;;  %v1021_v12 = vsel %vm1017_vm3, %v1012_v55, %v1013_v41  ;;  %v1333_v13 = vld [vmem:[#allocation2 + $0x6a0] sm:$0xff]  ;;  %v1014_v55 = vrot.slane %v3903_v24, 3 }
 0x11e   :  { %1516 = vmatpush.msra.mxu3 %v1344_v23  ;;  %1476 = vmatpush.msra.mxu2 %v1339_v5  ;;  %v1329_v47 = vld [vmem:[#allocation2 + $0x680] sm:$0xff]  ;;  %v1328_v5 = vld [vmem:[#allocation2 + $0x678] sm:$0xff] }
 0x11f   :  { %3272 = vmatmul.msk.f32.gmra.mxu0 %vm346_vm1, %v1022_v56  ;;  %3280 = vmatmul.msk.f32.gmra.mxu1 %vm346_vm1, %v1022_v56  ;;  %v1325_v23 = vld [vmem:[#allocation2 + $0x660] sm:$0xff] }
 0x120   :  { %3288 = vmatmul.msk.f32.gmra.mxu2 %vm346_vm1, %v1022_v56  ;;  %3296 = vmatmul.msk.f32.gmra.mxu3 %vm346_vm1, %v1022_v56 }
 0x121   :  { %1393 = vmatpush.msra.mxu0 %v1341_v20  ;;  %1434 = vmatpush.msra.mxu1 %v1342_v21  ;;  %v1330_v20 = vld [vmem:[#allocation2 + $0x688] sm:$0xff]  ;;  %v1331_v21 = vld [vmem:[#allocation2 + $0x690] sm:$0xff] }
 0x122   :  { %1517 = vmatpush.msra.mxu3 %v1340_v8 }
 0x123   :  { %v664_v29 = vpop.f32.mrf.mxu2  ;;  %v705_v32 = vpop.f32.mrf.mxu3  ;;  %1394 = vmatpush.msra.mxu0 %v1337_v25  ;;  %1435 = vmatpush.msra.mxu1 %v1338_v28  ;;  %v1326_v25 = vld [vmem:[#allocation2 + $0x668] sm:$0xff] }
 0x124   :  { %v4188_v56 = vadd.f32 %v664_v29, %v4058_v34  ;;  %v4191_v9 = vadd.f32 %v705_v32, %v4060_v35  ;;  %v4193_v10 = vpop.f32.mrf.mxu0  ;;  %v4195_v19 = vpop.f32.mrf.mxu1  ;;  %v1335_v34 = vld [vmem:[#allocation2 + $0x6b0] sm:$0xff]  ;;  %v1336_v35 = vld [vmem:[#allocation2 + $0x6b8] sm:$0xff] }
 0x125   :  { %1395 = vmatpush.msra.mxu0 %v1333_v13  ;;  %1436 = vmatpush.msra.mxu1 %v1334_v63  ;;  %v1327_v32 = vld [vmem:[#allocation2 + $0x670] sm:$0xff]  ;;  %v1020_v63 = vsel %vm1017_vm3, %v1013_v41, %v1014_v55  ;;  %v1015_v41 = vrot.slane %v3915_v42, 3 }
 0x126   :  { %1477 = vmatpush.msra.mxu2 %v1335_v34  ;;  %1518 = vmatpush.msra.mxu3 %v1336_v35  ;;  %v1321_v34 = vld [vmem:[#allocation2 + $0x640] sm:$0xff]  ;;  %v1322_v35 = vld [vmem:[#allocation2 + $0x648] sm:$0xff] }
 0x127   :  { %3273 = vmatmul.msk.f32.gmra.mxu0 %vm346_vm1, %v1021_v12  ;;  %3281 = vmatmul.msk.f32.gmra.mxu1 %vm346_vm1, %v1021_v12 }
 0x128   :  { %3289 = vmatmul.msk.f32.gmra.mxu2 %vm346_vm1, %v1021_v12  ;;  %3297 = vmatmul.msk.f32.gmra.mxu3 %vm346_vm1, %v1021_v12 }
 0x129   :  { %1396 = vmatpush.msra.mxu0 %v1329_v47  ;;  %1437 = vmatpush.msra.mxu1 %v1330_v20  ;;  %v1317_v47 = vld [vmem:[#allocation2 + $0x620] sm:$0xff]  ;;  %v1318_v20 = vld [vmem:[#allocation2 + $0x628] sm:$0xff] }
 0x12a   :  { %1478 = vmatpush.msra.mxu2 %v1331_v21  ;;  %1519 = vmatpush.msra.mxu3 %v1332_v22  ;;  %v1319_v21 = vld [vmem:[#allocation2 + $0x630] sm:$0xff]  ;;  %v1320_v22 = vld [vmem:[#allocation2 + $0x638] sm:$0xff] }
 0x12b   :  { %v667_v28 = vpop.f32.mrf.mxu2  ;;  %v708_v29 = vpop.f32.mrf.mxu3  ;;  %1397 = vmatpush.msra.mxu0 %v1325_v23  ;;  %1438 = vmatpush.msra.mxu1 %v1326_v25  ;;  %v1313_v23 = vld [vmem:[#allocation2 + $0x600] sm:$0xff]  ;;  %v1314_v25 = vld [vmem:[#allocation2 + $0x608] sm:$0xff] }
 0x12c   :  { %v4205_v8 = vadd.f32 %v667_v28, %v4073_v2  ;;  %v4208_v24 = vadd.f32 %v708_v29, %v4075_v3  ;;  %v4210_v12 = vpop.f32.mrf.mxu0  ;;  %v4212_v13 = vpop.f32.mrf.mxu1  ;;  %1479 = vmatpush.msra.mxu2 %v1327_v32  ;;  %1520 = vmatpush.msra.mxu3 %v1328_v5  ;;  %v1323_v2 = vld [vmem:[#allocation2 + $0x650] sm:$0xff]  ;;  %v1324_v3 = vld [vmem:[#allocation2 + $0x658] sm:$0xff] }
 0x12d   :  { %5110 = vst [vmem:[#allocation41_spill] sm:$0xff] %v4210_v12  ;;  %1398 = vmatpush.msra.mxu0 %v1321_v34  ;;  %1439 = vmatpush.msra.mxu1 %v1322_v35  ;;  %v1315_v32 = vld [vmem:[#allocation2 + $0x610] sm:$0xff]  ;;  %v1316_v5 = vld [vmem:[#allocation2 + $0x618] sm:$0xff] }
 0x12e   :  { %5108 = vst [vmem:[#allocation39_spill] sm:$0xff] %v4205_v8  ;;  %1480 = vmatpush.msra.mxu2 %v1323_v2  ;;  %1521 = vmatpush.msra.mxu3 %v1324_v3  ;;  %v1019_v2 = vsel %vm1017_vm3, %v1014_v55, %v1015_v41 }
 0x12f   :  { %5109 = vst [vmem:[#allocation40_spill] sm:$0xff] %v4208_v24  ;;  %3274 = vmatmul.msk.f32.gmra.mxu0 %vm346_vm1, %v1020_v63  ;;  %3282 = vmatmul.msk.f32.gmra.mxu1 %vm346_vm1, %v1020_v63 }
 0x130   :  { %5111 = vst [vmem:[#allocation42_spill] sm:$0xff] %v4212_v13  ;;  %3290 = vmatmul.msk.f32.gmra.mxu2 %vm346_vm1, %v1020_v63  ;;  %3298 = vmatmul.msk.f32.gmra.mxu3 %vm346_vm1, %v1020_v63 }
 0x131   :  { %1399 = vmatpush.msra.mxu0 %v1317_v47  ;;  %1440 = vmatpush.msra.mxu1 %v1318_v20 }
 0x132   :  { %1481 = vmatpush.msra.mxu2 %v1319_v21  ;;  %1522 = vmatpush.msra.mxu3 %v1320_v22 }
 0x133   :  { %v670_v28 = vpop.f32.mrf.mxu2  ;;  %v711_v29 = vpop.f32.mrf.mxu3  ;;  %1400 = vmatpush.msra.mxu0 %v1313_v23  ;;  %1441 = vmatpush.msra.mxu1 %v1314_v25 }
 0x134   :  { %v4222_v63 = vadd.f32 %v670_v28, %v4088_v26  ;;  %v4225_v42 = vadd.f32 %v711_v29, %v4090_v27  ;;  %v4227_v34 = vpop.f32.mrf.mxu0  ;;  %v4229_v35 = vpop.f32.mrf.mxu1  ;;  %1482 = vmatpush.msra.mxu2 %v1315_v32  ;;  %1523 = vmatpush.msra.mxu3 %v1316_v5  ;;  %v1016_v26 = vrot.slane %v3927_v60, 3 }
 0x135   :  { %5114 = vst [vmem:[#allocation45_spill] sm:$0xff] %v4227_v34 }
 0x136   :  { %5112 = vst [vmem:[#allocation43_spill] sm:$0xff] %v4222_v63  ;;  %v1018_v22 = vsel %vm1017_vm3, %v1015_v41, %v1016_v26  ;;  %v1025_v41 = vsel %vm1017_vm3, %v1016_v26, %v1009_v53  ;;  %v1296_v53 = vrot.slane %v3372_v40, 4 }
 0x137   :  { %5113 = vst [vmem:[#allocation44_spill] sm:$0xff] %v4225_v42  ;;  %3275 = vmatmul.msk.f32.gmra.mxu0 %vm346_vm1, %v1019_v2  ;;  %3283 = vmatmul.msk.f32.gmra.mxu1 %vm346_vm1, %v1019_v2 }
 0x138   :  { %5115 = vst [vmem:[#allocation46_spill] sm:$0xff] %v4229_v35  ;;  %3291 = vmatmul.msk.f32.gmra.mxu2 %vm346_vm1, %v1019_v2  ;;  %3299 = vmatmul.msk.f32.gmra.mxu3 %vm346_vm1, %v1019_v2 }
 0x13b   :  { %v673_v27 = vpop.f32.mrf.mxu2  ;;  %v714_v3 = vpop.f32.mrf.mxu3 }
 0x13c   :  { %v4239_v55 = vadd.f32 %v673_v27, %v4103_v36  ;;  %v4242_v47 = vadd.f32 %v714_v3, %v4105_v37  ;;  %v4244_v20 = vpop.f32.mrf.mxu0  ;;  %v4246_v21 = vpop.f32.mrf.mxu1 }
 0x13d   :  { %5118 = vst [vmem:[#allocation49_spill] sm:$0xff] %v4244_v20 }
 0x13e   :  { %5116 = vst [vmem:[#allocation47_spill] sm:$0xff] %v4239_v55 }
 0x13f   :  { %5117 = vst [vmem:[#allocation48_spill] sm:$0xff] %v4242_v47  ;;  %3276 = vmatmul.msk.f32.gmra.mxu0 %vm346_vm1, %v1018_v22  ;;  %3284 = vmatmul.msk.f32.gmra.mxu1 %vm346_vm1, %v1018_v22 }
 0x140   :  { %5119 = vst [vmem:[#allocation50_spill] sm:$0xff] %v4246_v21  ;;  %3292 = vmatmul.msk.f32.gmra.mxu2 %vm346_vm1, %v1018_v22  ;;  %3300 = vmatmul.msk.f32.gmra.mxu3 %vm346_vm1, %v1018_v22 }
 0x143   :  { %v676_v60 = vpop.f32.mrf.mxu2  ;;  %v717_v36 = vpop.f32.mrf.mxu3 }
 0x144   :  { %v4255_v37 = vadd.f32 %v676_v60, %v4117_v48  ;;  %v4258_v23 = vadd.f32 %v717_v36, %v4119_v49  ;;  %v4260_v25 = vpop.f32.mrf.mxu0  ;;  %v4262_v28 = vpop.f32.mrf.mxu1  ;;  %v4275_v48 = vld [vmem:[%s5085_s0] sm:$0xff] }
 0x145   :  { %5122 = vst [vmem:[#allocation53_spill] sm:$0xff] %v4260_v25  ;;  %v5099_v49 = vrot.slane %v4275_v48, 4 }
 0x146   :  { %5120 = vst [vmem:[#allocation51_spill] sm:$0xff] %v4255_v37 }
 0x147   :  { %5121 = vst [vmem:[#allocation52_spill] sm:$0xff] %v4258_v23  ;;  %3277 = vmatmul.msk.f32.gmra.mxu0 %vm346_vm1, %v1025_v41  ;;  %3285 = vmatmul.msk.f32.gmra.mxu1 %vm346_vm1, %v1025_v41  ;;  %v1310_v3 = vsel %vm1303_vm4, %v5099_v49, %v1296_v53 }
 0x148   :  { %5123 = vst [vmem:[#allocation54_spill] sm:$0xff] %v4262_v28  ;;  %3293 = vmatmul.msk.f32.gmra.mxu2 %vm346_vm1, %v1025_v41  ;;  %3301 = vmatmul.msk.f32.gmra.mxu3 %vm346_vm1, %v1025_v41 }
 0x14b   :  { %v679_v29 = vpop.f32.mrf.mxu2  ;;  %v720_v32 = vpop.f32.mrf.mxu3 }
 0x14c   :  { %v4283_v5 = vadd.f32 %v679_v29, %v4136_v61  ;;  %v4286_v2 = vadd.f32 %v720_v32, %v4138_v62  ;;  %v4288_v26 = vpop.f32.mrf.mxu0  ;;  %v4290_v27 = vpop.f32.mrf.mxu1  ;;  %v3373_v61 = vld [vmem:[%s5085_s0 + $0x10] sm:$0xff]  ;;  %v3374_v29 = vld [vmem:[%s5085_s0 + $0x18] sm:$0xff] }
 0x14d   :  { %v1297_v62 = vrot.slane %v3373_v61, 4  ;;  %v1298_v32 = vrot.slane %v3374_v29, 4 }
 0x14e   :  { %5124 = vst [vmem:[#allocation55_spill] sm:$0xff] %v4283_v5 }
 0x14f   :  { %5125 = vst [vmem:[#allocation56_spill] sm:$0xff] %v4286_v2  ;;  %3302 = vmatmul.msk.f32.vlgmr.msra.gmra.mxu0 %vm346_vm1, %v1310_v3  ;;  %3310 = vmatmul.msk.f32.vlgmr.msra.gmra.mxu1 %vm346_vm1, %v1310_v3  ;;  %v1309_v40 = vsel %vm1303_vm4, %v1296_v53, %v1297_v62  ;;  %v1308_v2 = vsel %vm1303_vm4, %v1297_v62, %v1298_v32 }
 0x150   :  { %3318 = vmatmul.msk.f32.vlgmr.msra.gmra.mxu2 %vm346_vm1, %v1310_v3  ;;  %3326 = vmatmul.msk.f32.vlgmr.msra.gmra.mxu3 %vm346_vm1, %v1310_v3 }
 0x153   :  { %v4303_v22 = vpop.f32.mrf.mxu2  ;;  %v4305_v60 = vpop.f32.mrf.mxu3 }
 0x154   :  { %v4307_v36 = vpop.f32.mrf.mxu0  ;;  %v4309_v41 = vpop.f32.mrf.mxu1 }
 0x157   :  { %3303 = vmatmul.msk.f32.gmra.mxu0 %vm346_vm1, %v1309_v40  ;;  %3311 = vmatmul.msk.f32.gmra.mxu1 %vm346_vm1, %v1309_v40 }
 0x158   :  { %3319 = vmatmul.msk.f32.gmra.mxu2 %vm346_vm1, %v1309_v40  ;;  %3327 = vmatmul.msk.f32.gmra.mxu3 %vm346_vm1, %v1309_v40  ;;  %v3375_v40 = vld [vmem:[%s5085_s0 + $0x20] sm:$0xff] }
 0x159   :  { %v1299_v29 = vrot.slane %v3375_v40, 4 }
 0x15b   :  { %v4320_v3 = vpop.f32.mrf.mxu2  ;;  %v4322_v61 = vpop.f32.mrf.mxu3  ;;  %v1307_v25 = vsel %vm1303_vm4, %v1298_v32, %v1299_v29 }
 0x15c   :  { %v4324_v49 = vpop.f32.mrf.mxu0  ;;  %v4326_v53 = vpop.f32.mrf.mxu1 }
 0x15f   :  { %3304 = vmatmul.msk.f32.gmra.mxu0 %vm346_vm1, %v1308_v2  ;;  %3312 = vmatmul.msk.f32.gmra.mxu1 %vm346_vm1, %v1308_v2 }
 0x160   :  { %3320 = vmatmul.msk.f32.gmra.mxu2 %vm346_vm1, %v1308_v2  ;;  %3328 = vmatmul.msk.f32.gmra.mxu3 %vm346_vm1, %v1308_v2  ;;  %v3376_v2 = vld [vmem:[%s5085_s0 + $0x28] sm:$0xff] }
 0x161   :  { %v1300_v40 = vrot.slane %v3376_v2, 4 }
 0x163   :  { %v4337_v5 = vpop.f32.mrf.mxu2  ;;  %v4339_v28 = vpop.f32.mrf.mxu3  ;;  %v1306_v21 = vsel %vm1303_vm4, %v1299_v29, %v1300_v40 }
 0x164   :  { %v4341_v51 = vpop.f32.mrf.mxu0  ;;  %v4343_v62 = vpop.f32.mrf.mxu1 }
 0x167   :  { %3305 = vmatmul.msk.f32.gmra.mxu0 %vm346_vm1, %v1307_v25  ;;  %3313 = vmatmul.msk.f32.gmra.mxu1 %vm346_vm1, %v1307_v25 }
 0x168   :  { %3321 = vmatmul.msk.f32.gmra.mxu2 %vm346_vm1, %v1307_v25  ;;  %3329 = vmatmul.msk.f32.gmra.mxu3 %vm346_vm1, %v1307_v25  ;;  %v3377_v25 = vld [vmem:[%s5085_s0 + $0x30] sm:$0xff] }
 0x169   :  { %v1301_v2 = vrot.slane %v3377_v25, 4 }
 0x16b   :  { %v4354_v50 = vpop.f32.mrf.mxu2  ;;  %v4356_v23 = vpop.f32.mrf.mxu3  ;;  %v1305_v47 = vsel %vm1303_vm4, %v1300_v40, %v1301_v2 }
 0x16c   :  { %5126 = vst [vmem:[#allocation57_spill] sm:$0xff] %v4354_v50  ;;  %v4358_v37 = vpop.f32.mrf.mxu0  ;;  %v4360_v32 = vpop.f32.mrf.mxu1 }
 0x16d   :  { %5127 = vst [vmem:[#allocation58_spill] sm:$0xff] %v4356_v23 }
 0x16e   :  { %5128 = vst [vmem:[#allocation59_spill] sm:$0xff] %v4358_v37 }
 0x16f   :  { %5129 = vst [vmem:[#allocation60_spill] sm:$0xff] %v4360_v32  ;;  %3306 = vmatmul.msk.f32.gmra.mxu0 %vm346_vm1, %v1306_v21  ;;  %3314 = vmatmul.msk.f32.gmra.mxu1 %vm346_vm1, %v1306_v21 }
 0x170   :  { %3322 = vmatmul.msk.f32.gmra.mxu2 %vm346_vm1, %v1306_v21  ;;  %3330 = vmatmul.msk.f32.gmra.mxu3 %vm346_vm1, %v1306_v21  ;;  %v3378_v21 = vld [vmem:[%s5085_s0 + $0x38] sm:$0xff]  ;;  %s3726_s0 = smov [#allocation22]  }
 0x171   :  { %v1302_v25 = vrot.slane %v3378_v21, 4  ;;  %s3156_s1 = sshll.u32 %s3726_s0, 4  ;;  %s3157_s1 = int_to_ptr.vmem [resolvable:$true] %s3156_s1 }
 0x173   :  { %v4371_v45 = vpop.f32.mrf.mxu2  ;;  %v4373_v20 = vpop.f32.mrf.mxu3  ;;  %v1304_v35 = vsel %vm1303_vm4, %v1301_v2, %v1302_v25 }
 0x174   :  { %5130 = vst [vmem:[#allocation61_spill] sm:$0xff] %v4371_v45  ;;  %v4375_v44 = vpop.f32.mrf.mxu0  ;;  %v4377_v29 = vpop.f32.mrf.mxu1 }
 0x175   :  { %5131 = vst [vmem:[#allocation62_spill] sm:$0xff] %v4373_v20 }
 0x176   :  { %5132 = vst [vmem:[#allocation63_spill] sm:$0xff] %v4375_v44 }
 0x177   :  { %5133 = vst [vmem:[#allocation64_spill] sm:$0xff] %v4377_v29  ;;  %3307 = vmatmul.msk.f32.gmra.mxu0 %vm346_vm1, %v1305_v47  ;;  %3315 = vmatmul.msk.f32.gmra.mxu1 %vm346_vm1, %v1305_v47 }
 0x178   :  { %3323 = vmatmul.msk.f32.gmra.mxu2 %vm346_vm1, %v1305_v47  ;;  %3331 = vmatmul.msk.f32.gmra.mxu3 %vm346_vm1, %v1305_v47 }
 0x17b   :  { %v4388_v55 = vpop.f32.mrf.mxu2  ;;  %v4390_v44 = vpop.f32.mrf.mxu3 }
 0x17c   :  { %5134 = vst [vmem:[#allocation65_spill] sm:$0xff] %v4388_v55  ;;  %v4392_v29 = vpop.f32.mrf.mxu0  ;;  %v4394_v40 = vpop.f32.mrf.mxu1 }
 0x17d   :  { %5135 = vst [vmem:[#allocation66_spill] sm:$0xff] %v4390_v44 }
 0x17e   :  { %5136 = vst [vmem:[#allocation67_spill] sm:$0xff] %v4392_v29 }
 0x17f   :  { %5137 = vst [vmem:[#allocation68_spill] sm:$0xff] %v4394_v40  ;;  %3308 = vmatmul.msk.f32.gmra.mxu0 %vm346_vm1, %v1304_v35  ;;  %3316 = vmatmul.msk.f32.gmra.mxu1 %vm346_vm1, %v1304_v35  ;;  %v5142_v40 = vrot.slane %v4275_v48, 4 }
 0x180   :  { %3324 = vmatmul.msk.f32.gmra.mxu2 %vm346_vm1, %v1304_v35  ;;  %3332 = vmatmul.msk.f32.gmra.mxu3 %vm346_vm1, %v1304_v35 }
 0x181   :  { %v1311_v2 = vsel %vm1303_vm4, %v1302_v25, %v5142_v40 }
 0x183   :  { %v4402_v47 = vpop.f32.mrf.mxu2  ;;  %v4404_v21 = vpop.f32.mrf.mxu3 }
 0x184   :  { %5138 = vst [vmem:[#allocation69_spill] sm:$0xff] %v4402_v47  ;;  %v4406_v44 = vpop.f32.mrf.mxu0  ;;  %v4408_v29 = vpop.f32.mrf.mxu1 }
 0x185   :  { %5139 = vst [vmem:[#allocation70_spill] sm:$0xff] %v4404_v21 }
 0x186   :  { %5140 = vst [vmem:[#allocation71_spill] sm:$0xff] %v4406_v44 }
 0x187   :  { %5141 = vst [vmem:[#allocation72_spill] sm:$0xff] %v4408_v29  ;;  %3309 = vmatmul.msk.f32.gmra.mxu0 %vm346_vm1, %v1311_v2  ;;  %3317 = vmatmul.msk.f32.gmra.mxu1 %vm346_vm1, %v1311_v2 }
 0x188   :  { %3325 = vmatmul.msk.f32.gmra.mxu2 %vm346_vm1, %v1311_v2  ;;  %3333 = vmatmul.msk.f32.gmra.mxu3 %vm346_vm1, %v1311_v2 }
 0x18b   :  { %v4418_v35 = vpop.f32.mrf.mxu2  ;;  %v4420_v21 = vpop.f32.mrf.mxu3 }
 0x18c   :  { %5143 = vst [vmem:[#allocation73_spill] sm:$0xff] %v4418_v35  ;;  %v1116_v44 = vpop.f32.mrf.mxu0  ;;  %v1157_v47 = vpop.f32.mrf.mxu1 }
 0x18d   :  { %5144 = vst [vmem:[#allocation74_spill] sm:$0xff] %v4420_v21 }
 0x193   :  { %v1198_v29 = vpop.f32.mrf.mxu2  ;;  %v1239_v55 = vpop.f32.mrf.mxu3 }
 0x194   :  { %v1119_v48 = vpop.f32.mrf.mxu0  ;;  %v1160_v31 = vpop.f32.mrf.mxu1 }
 0x19b   :  { %v1201_v34 = vpop.f32.mrf.mxu2  ;;  %v1242_v25 = vpop.f32.mrf.mxu3 }
 0x19c   :  { %v4422_v40 = vpop.f32.mrf.mxu0  ;;  %v4424_v30 = vpop.f32.mrf.mxu1 }
 0x1a3   :  { %v4426_v20 = vpop.f32.mrf.mxu2  ;;  %v4428_v42 = vpop.f32.mrf.mxu3 }
 0x1a4   :  { %v4430_v2 = vpop.f32.mrf.mxu0  ;;  %v4432_v35 = vpop.f32.mrf.mxu1 }
 0x1a5   :  { %5145 = vst [vmem:[#allocation75_spill] sm:$0xff] %v4430_v2 }
 0x1a6   :  { %5146 = vst [vmem:[#allocation76_spill] sm:$0xff] %v4432_v35 }
 0x1ab   :  { %v4434_v21 = vpop.f32.mrf.mxu2  ;;  %v4436_v45 = vpop.f32.mrf.mxu3 }
 0x1ac   :  { %5147 = vst [vmem:[#allocation77_spill] sm:$0xff] %v4434_v21  ;;  %v4438_v63 = vpop.f32.mrf.mxu0  ;;  %v4440_v32 = vpop.f32.mrf.mxu1 }
 0x1ad   :  { %5148 = vst [vmem:[#allocation78_spill] sm:$0xff] %v4436_v45 }
 0x1ae   :  { %5149 = vst [vmem:[#allocation79_spill] sm:$0xff] %v4438_v63 }
 0x1af   :  { %5150 = vst [vmem:[#allocation80_spill] sm:$0xff] %v4440_v32 }
 0x1b3   :  { %v4442_v37 = vpop.f32.mrf.mxu2  ;;  %v4444_v13 = vpop.f32.mrf.mxu3 }
 0x1b4   :  { %5151 = vst [vmem:[#allocation81_spill] sm:$0xff] %v4442_v37  ;;  %v4446_v7 = vpop.f32.mrf.mxu0  ;;  %v4448_v12 = vpop.f32.mrf.mxu1 }
 0x1b5   :  { %5152 = vst [vmem:[#allocation82_spill] sm:$0xff] %v4444_v13 }
 0x1b6   :  { %5153 = vst [vmem:[#allocation83_spill] sm:$0xff] %v4446_v7 }
 0x1b7   :  { %5154 = vst [vmem:[#allocation84_spill] sm:$0xff] %v4448_v12 }
 0x1bb   :  { %v4450_v6 = vpop.f32.mrf.mxu2  ;;  %v4452_v2 = vpop.f32.mrf.mxu3 }
 0x1bc   :  { %5155 = vst [vmem:[#allocation85_spill] sm:$0xff] %v4450_v6  ;;  %v4454_v35 = vpop.f32.mrf.mxu0  ;;  %v4456_v21 = vpop.f32.mrf.mxu1 }
 0x1bd   :  { %5156 = vst [vmem:[#allocation86_spill] sm:$0xff] %v4452_v2  ;;  %v577_v2 = vadd.f32 %v4140_v4, %v4015_v57 }
 0x1be   :  { %5157 = vst [vmem:[#allocation87_spill] sm:$0xff] %v4454_v35 }
 0x1bf   :  { %5158 = vst [vmem:[#allocation88_spill] sm:$0xff] %v4456_v21  ;;  %v618_v21 = vadd.f32 %v4142_v54, %v4017_v59 }
 0x1c3   :  { %v4458_v45 = vpop.f32.mrf.mxu2  ;;  %v4460_v63 = vpop.f32.mrf.mxu3 }
 0x1c4   :  { %5159 = vst [vmem:[#allocation89_spill] sm:$0xff] %v4458_v45  ;;  %v4462_v32 = vpop.f32.mrf.mxu0  ;;  %v4464_v37 = vpop.f32.mrf.mxu1  ;;  %v977_v45 = vadd.f32 %v4288_v26, %v577_v2 }
 0x1c5   :  { %5160 = vst [vmem:[#allocation90_spill] sm:$0xff] %v4460_v63  ;;  %v978_v63 = vadd.f32 %v4290_v27, %v618_v21  ;;  %v580_v27 = vadd.f32 %v4159_v17, %v4032_v0 }
 0x1c6   :  { %5161 = vst [vmem:[#allocation91_spill] sm:$0xff] %v4462_v32  ;;  %v979_v32 = vadd.f32 %v4303_v22, %v4154_v11  ;;  %v621_v11 = vadd.f32 %v4161_v18, %v4034_v1 }
 0x1c7   :  { %5162 = vst [vmem:[#allocation92_spill] sm:$0xff] %v4464_v37  ;;  %v1263_v37 = vadd.f32 %v1116_v44, %v977_v45  ;;  %v981_v45 = vadd.f32 %v4307_v36, %v580_v27  ;;  %v987_v36 = vadd.f32 %v4337_v5, %v4188_v56  ;;  %v5167_v27 = vld [vmem:[#allocation40_spill] sm:$0xff] }
 0x1c8   :  { %v1265_v35 = vadd.f32 %v1198_v29, %v979_v32 }
 0x1cb   :  { %v4466_v13 = vpop.f32.mrf.mxu2  ;;  %v4468_v7 = vpop.f32.mrf.mxu3 }
 0x1cc   :  { %5163 = vst [vmem:[#allocation93_spill] sm:$0xff] %v4466_v13  ;;  %v1402_v12 = vpop.f32.mrf.mxu0  ;;  %v1443_v6 = vpop.f32.mrf.mxu1  ;;  %v980_v13 = vadd.f32 %v4305_v60, %v4157_v14  ;;  %v982_v14 = vadd.f32 %v4309_v41, %v621_v11  ;;  %v988_v41 = vadd.f32 %v4339_v28, %v4191_v9  ;;  %v5168_v11 = vld [vmem:[#allocation58_spill] sm:$0xff] }
 0x1cd   :  { %5164 = vst [vmem:[#allocation94_spill] sm:$0xff] %v4468_v7  ;;  %v1264_v7 = vadd.f32 %v1157_v47, %v978_v63  ;;  %v1549_v57 = vadd.f32 %v1402_v12, %v1263_v37 }
 0x1ce   :  { %v1266_v23 = vadd.f32 %v1239_v55, %v980_v13 }
 0x1cf   :  { %v1550_v4 = vadd.f32 %v1443_v6, %v1264_v7  ;;  %v983_v6 = vadd.f32 %v4320_v3, %v4171_v33  ;;  %v984_v7 = vadd.f32 %v4322_v61, %v4174_v58  ;;  %v624_v33 = vadd.f32 %v4178_v52, %v4049_v16 }
 0x1d0   :  { %v1273_v61 = vadd.f32 %v4426_v20, %v987_v36  ;;  %v5175_v36 = vld [vmem:[#allocation32_spill] sm:$0xff] }
 0x1d1   :  { %v1269_v0 = vadd.f32 %v1201_v34, %v983_v6  ;;  %v1270_v17 = vadd.f32 %v1242_v25, %v984_v7  ;;  %v986_v34 = vadd.f32 %v4326_v53, %v624_v33  ;;  %v1274_v53 = vadd.f32 %v4428_v42, %v988_v41  ;;  %v5171_v7 = vld [vmem:[#allocation77_spill] sm:$0xff]  ;;  %v5173_v33 = vld [vmem:[#allocation31_spill] sm:$0xff]  ;;  %v5176_v41 = vld [vmem:[#allocation42_spill] sm:$0xff] }
 0x1d2   :  { %v627_v25 = vadd.f32 %v4195_v19, %v4064_v43  ;;  %v5170_v19 = vld [vmem:[#allocation76_spill] sm:$0xff] }
 0x1d3   :  { %v1484_v24 = vpop.f32.mrf.mxu2  ;;  %v1525_v50 = vpop.f32.mrf.mxu3 }
 0x1d4   :  { %v1551_v8 = vadd.f32 %v1484_v24, %v1265_v35  ;;  %v1552_v59 = vadd.f32 %v1525_v50, %v1266_v23  ;;  %v1405_v54 = vpop.f32.mrf.mxu0  ;;  %v1446_v26 = vpop.f32.mrf.mxu1  ;;  %v1267_v50 = vadd.f32 %v1119_v48, %v981_v45  ;;  %v1268_v24 = vadd.f32 %v1160_v31, %v982_v14 }
 0x1d5   :  { %v583_v23 = vadd.f32 %v4176_v46, %v4047_v15  ;;  %v586_v48 = vadd.f32 %v4193_v10, %v4062_v39  ;;  %v992_v45 = vadd.f32 %v5168_v11, %v5167_v27  ;;  %v5169_v10 = vld [vmem:[#allocation75_spill] sm:$0xff]  ;;  %v5186_v27 = vld [vmem:[#allocation82_spill] sm:$0xff] }
 0x1d6   :  { %v4484_v22 = vmax.f32 %v1549_v57, %v1551_v8  ;;  %v4486_v44 = vmax.f32 %v1550_v4, %v1552_v59  ;;  %v1553_v18 = vadd.f32 %v1405_v54, %v1267_v50  ;;  %v1554_v8 = vadd.f32 %v1446_v26, %v1268_v24  ;;  %v5165_v59 = vld [vmem:[#allocation39_spill] sm:$0xff]  ;;  %v5166_v54 = vld [vmem:[#allocation57_spill] sm:$0xff]  ;;  %v5172_v24 = vld [vmem:[#allocation78_spill] sm:$0xff] }
 0x1d7   :  { %v985_v31 = vadd.f32 %v4324_v49, %v583_v23  ;;  %v1272_v49 = vadd.f32 %v4424_v30, %v986_v34  ;;  %v989_v57 = vadd.f32 %v4341_v51, %v586_v48  ;;  %v990_v4 = vadd.f32 %v4343_v62, %v627_v25  ;;  %v5183_v25 = vld [vmem:[#allocation79_spill] sm:$0xff] }
 0x1d8   :  { %v1597_v3 = vrot.slane %v4484_v22, 1  ;;  %v1598_v15 = vrot.slane %v4486_v44, 1  ;;  %v991_v26 = vadd.f32 %v5166_v54, %v5165_v59  ;;  %v1278_v51 = vadd.f32 %v5172_v24, %v992_v45  ;;  %v5185_v54 = vld [vmem:[#allocation81_spill] sm:$0xff] }
 0x1d9   :  { %v1271_v52 = vadd.f32 %v4422_v40, %v985_v31  ;;  %v1275_v43 = vadd.f32 %v5169_v10, %v989_v57  ;;  %v1276_v6 = vadd.f32 %v5170_v19, %v990_v4  ;;  %v5174_v31 = vld [vmem:[#allocation41_spill] sm:$0xff]  ;;  %v5184_v4 = vld [vmem:[#allocation80_spill] sm:$0xff] }
 0x1da   :  { %v1277_v50 = vadd.f32 %v5171_v7, %v991_v26  ;;  %v589_v34 = vadd.f32 %v5174_v31, %v5173_v33 }
 0x1db   :  { %v1487_v12 = vpop.f32.mrf.mxu2  ;;  %v1528_v1 = vpop.f32.mrf.mxu3 }
 0x1dc   :  { %v1555_v13 = vadd.f32 %v1487_v12, %v1269_v0  ;;  %v1556_v63 = vadd.f32 %v1528_v1, %v1270_v17  ;;  %v1408_v55 = vpop.f32.mrf.mxu0  ;;  %v1449_v37 = vpop.f32.mrf.mxu1 }
 0x1dd   :  { %v1557_v20 = vadd.f32 %v1408_v55, %v1271_v52  ;;  %v1558_v32 = vadd.f32 %v1449_v37, %v1272_v49  ;;  %v5177_v49 = vld [vmem:[#allocation59_spill] sm:$0xff] }
 0x1de   :  { %v4498_v60 = vmax.f32 %v1553_v18, %v1555_v13  ;;  %v4500_v58 = vmax.f32 %v1554_v8, %v1556_v63 }
 0x1e0   :  { %v1599_v16 = vrot.slane %v4498_v60, 1  ;;  %v1600_v46 = vrot.slane %v4500_v58, 1 }
 0x1e2   :  { %v4520_v56 = vsel %vm288_vm0, %v1597_v3, %v1599_v16  ;;  %v4526_v9 = vsel %vm288_vm0, %v1598_v15, %v1600_v46 }
 0x1e3   :  { %v1490_v28 = vpop.f32.mrf.mxu2  ;;  %v1531_v5 = vpop.f32.mrf.mxu3  ;;  %v1629_v30 = vmax.f32 %v4484_v22, %v4520_v56  ;;  %v1630_v42 = vmax.f32 %v4486_v44, %v4526_v9  ;;  %v1835_v22 = vld [vmem:[#allocation8 + $0x2a0] sm:$0xff]  ;;  %v1840_v56 = vld [vmem:[#allocation8 + $0x2c8] sm:$0xff] }
 0x1e4   :  { %v1559_v29 = vadd.f32 %v1490_v28, %v1273_v61  ;;  %v1560_v47 = vadd.f32 %v1531_v5, %v1274_v53  ;;  %v1411_v21 = vpop.f32.mrf.mxu0  ;;  %v1452_v35 = vpop.f32.mrf.mxu1  ;;  %v993_v61 = vadd.f32 %v5177_v49, %v589_v34  ;;  %v5178_v53 = vld [vmem:[#allocation60_spill] sm:$0xff]  ;;  %v5179_v5 = vld [vmem:[#allocation43_spill] sm:$0xff]  ;;  %v1872_v9 = vld [vmem:[#allocation8 + $0x3c8] sm:$0xff] }
 0x1e5   :  { %v1561_v8 = vadd.f32 %v1411_v21, %v1275_v43  ;;  %v1562_v13 = vadd.f32 %v1452_v35, %v1276_v6  ;;  %v1867_v44 = vld [vmem:[#allocation8 + $0x3a0] sm:$0xff] }
 0x1e6   :  { %v4536_v40 = vmax.f32 %v1557_v20, %v1559_v29  ;;  %v4538_v2 = vmax.f32 %v1558_v32, %v1560_v47  ;;  %v5180_v20 = vld [vmem:[#allocation61_spill] sm:$0xff]  ;;  %v5181_v29 = vld [vmem:[#allocation44_spill] sm:$0xff]  ;;  %v5182_v47 = vld [vmem:[#allocation62_spill] sm:$0xff]  ;;  %v1279_v57 = vadd.f32 %v5183_v25, %v993_v61 }
 0x1e7   :  { %v995_v32 = vadd.f32 %v5180_v20, %v5179_v5  ;;  %v996_v21 = vadd.f32 %v5182_v47, %v5181_v29  ;;  %v5197_v29 = vld [vmem:[#allocation83_spill] sm:$0xff] }
 0x1e8   :  { %v1601_v14 = vrot.slane %v4536_v40, 1  ;;  %v1602_v39 = vrot.slane %v4538_v2, 1 }
 0x1e9   :  { %v1281_v26 = vadd.f32 %v5185_v54, %v995_v32  ;;  %v1282_v11 = vadd.f32 %v5186_v27, %v996_v21  ;;  %v5198_v21 = vld [vmem:[#allocation84_spill] sm:$0xff] }
 0x1ea   :  { %v4554_v62 = vsel %vm288_vm0, %v1599_v16, %v1601_v14  ;;  %v4558_v0 = vsel %vm288_vm0, %v1600_v46, %v1602_v39  ;;  %v630_v16 = vadd.f32 %v5176_v41, %v5175_v36  ;;  %v5191_v36 = vld [vmem:[#allocation63_spill] sm:$0xff] }
 0x1eb   :  { %v1493_v17 = vpop.f32.mrf.mxu2  ;;  %v1534_v12 = vpop.f32.mrf.mxu3  ;;  %v1631_v1 = vmax.f32 %v4498_v60, %v4554_v62  ;;  %v1632_v18 = vmax.f32 %v4500_v58, %v4558_v0  ;;  %v1839_v60 = vld [vmem:[#allocation8 + $0x2c0] sm:$0xff]  ;;  %v1844_v58 = vld [vmem:[#allocation8 + $0x2e8] sm:$0xff]  ;;  %v1837_v0 = vld [vmem:[#allocation8 + $0x2b0] sm:$0xff] }
 0x1ec   :  { %v1563_v63 = vadd.f32 %v1493_v17, %v1277_v50  ;;  %v1564_v55 = vadd.f32 %v1534_v12, %v1278_v51  ;;  %v1414_v37 = vpop.f32.mrf.mxu0  ;;  %v1455_v23 = vpop.f32.mrf.mxu1  ;;  %v994_v28 = vadd.f32 %v5178_v53, %v630_v16  ;;  %v5187_v12 = vld [vmem:[#allocation33_spill] sm:$0xff]  ;;  %v5192_v16 = vld [vmem:[#allocation64_spill] sm:$0xff] }
 0x1ed   :  { %v1565_v50 = vadd.f32 %v1414_v37, %v1279_v57  ;;  %v5193_v37 = vld [vmem:[#allocation47_spill] sm:$0xff]  ;;  %v5195_v53 = vld [vmem:[#allocation48_spill] sm:$0xff]  ;;  %v5199_v57 = vld [vmem:[#allocation85_spill] sm:$0xff] }
 0x1ee   :  { %v4568_v46 = vmax.f32 %v1561_v8, %v1563_v63  ;;  %v4570_v52 = vmax.f32 %v1562_v13, %v1564_v55  ;;  %v1280_v59 = vadd.f32 %v5184_v4, %v994_v28  ;;  %v5188_v8 = vld [vmem:[#allocation45_spill] sm:$0xff]  ;;  %v5189_v13 = vld [vmem:[#allocation34_spill] sm:$0xff] }
 0x1ef   :  { %v5190_v63 = vld [vmem:[#allocation46_spill] sm:$0xff] }
 0x1f0   :  { %v1603_v35 = vrot.slane %v4568_v46, 1  ;;  %v1604_v48 = vrot.slane %v4570_v52, 1  ;;  %v1566_v24 = vadd.f32 %v1455_v23, %v1280_v59  ;;  %v633_v55 = vadd.f32 %v5190_v63, %v5189_v13  ;;  %v5194_v23 = vld [vmem:[#allocation65_spill] sm:$0xff]  ;;  %v5196_v28 = vld [vmem:[#allocation66_spill] sm:$0xff]  ;;  %v5203_v13 = vld [vmem:[#allocation36_spill] sm:$0xff] }
 0x1f1   :  { %v999_v61 = vadd.f32 %v5194_v23, %v5193_v37  ;;  %v1000_v5 = vadd.f32 %v5196_v28, %v5195_v53  ;;  %v5200_v59 = vld [vmem:[#allocation86_spill] sm:$0xff]  ;;  %v5209_v28 = vld [vmem:[#allocation52_spill] sm:$0xff] }
 0x1f2   :  { %v4586_v45 = vsel %vm288_vm0, %v1601_v14, %v1603_v35  ;;  %v4590_v10 = vsel %vm288_vm0, %v1602_v39, %v1604_v48  ;;  %v592_v14 = vadd.f32 %v5188_v8, %v5187_v12  ;;  %v998_v49 = vadd.f32 %v5192_v16, %v633_v55  ;;  %v5201_v8 = vld [vmem:[#allocation35_spill] sm:$0xff]  ;;  %v5204_v63 = vld [vmem:[#allocation50_spill] sm:$0xff] }
 0x1f3   :  { %v1496_v43 = vpop.f32.mrf.mxu2  ;;  %v1537_v19 = vpop.f32.mrf.mxu3  ;;  %v1633_v6 = vmax.f32 %v4536_v40, %v4586_v45  ;;  %v1634_v7 = vmax.f32 %v4538_v2, %v4590_v10  ;;  %v1285_v4 = vadd.f32 %v5199_v57, %v999_v61  ;;  %v1286_v54 = vadd.f32 %v5200_v59, %v1000_v5  ;;  %v5210_v5 = vld [vmem:[#allocation70_spill] sm:$0xff]  ;;  %v1846_v40 = vld [vmem:[#allocation8 + $0x2f8] sm:$0xff]  ;;  %v1871_v2 = vld [vmem:[#allocation8 + $0x3c0] sm:$0xff] }
 0x1f4   :  { %v1567_v51 = vadd.f32 %v1496_v43, %v1281_v26  ;;  %v1568_v17 = vadd.f32 %v1537_v19, %v1282_v11  ;;  %v1417_v39 = vpop.f32.mrf.mxu0  ;;  %v1458_v33 = vpop.f32.mrf.mxu1  ;;  %v997_v41 = vadd.f32 %v5191_v36, %v592_v14  ;;  %v1284_v25 = vadd.f32 %v5198_v21, %v998_v49  ;;  %v5202_v14 = vld [vmem:[#allocation49_spill] sm:$0xff]  ;;  %v5206_v49 = vld [vmem:[#allocation68_spill] sm:$0xff] }
 0x1f5   :  { %v636_v55 = vadd.f32 %v5204_v63, %v5203_v13  ;;  %v1876_v62 = vld [vmem:[#allocation8 + $0x3e8] sm:$0xff]  ;;  %v1874_v45 = vld [vmem:[#allocation8 + $0x3d8] sm:$0xff] }
 0x1f6   :  { %v4600_v31 = vmax.f32 %v1565_v50, %v1567_v51  ;;  %v4602_v34 = vmax.f32 %v1566_v24, %v1568_v17  ;;  %v1283_v47 = vadd.f32 %v5197_v29, %v997_v41  ;;  %v1570_v51 = vadd.f32 %v1458_v33, %v1284_v25  ;;  %v5205_v41 = vld [vmem:[#allocation67_spill] sm:$0xff]  ;;  %v5208_v33 = vld [vmem:[#allocation69_spill] sm:$0xff] }
 0x1f7   :  { %v1002_v37 = vadd.f32 %v5206_v49, %v636_v55  ;;  %v1004_v29 = vadd.f32 %v5210_v5, %v5209_v28  ;;  %v5211_v25 = vld [vmem:[#allocation87_spill] sm:$0xff]  ;;  %v5216_v49 = vld [vmem:[#allocation53_spill] sm:$0xff] }
 0x1f8   :  { %v1605_v20 = vrot.slane %v4600_v31, 1  ;;  %v1606_v32 = vrot.slane %v4602_v34, 1  ;;  %v1569_v24 = vadd.f32 %v1417_v39, %v1283_v47  ;;  %v5207_v39 = vld [vmem:[#allocation51_spill] sm:$0xff] }
 0x1f9   :  { %v1003_v53 = vadd.f32 %v5208_v33, %v5207_v39  ;;  %v5217_v39 = vld [vmem:[#allocation38_spill] sm:$0xff]  ;;  %v5219_v5 = vld [vmem:[#allocation71_spill] sm:$0xff] }
 0x1fa   :  { %v4618_v26 = vsel %vm288_vm0, %v1603_v35, %v1605_v20  ;;  %v4622_v27 = vsel %vm288_vm0, %v1604_v48, %v1606_v32  ;;  %v595_v35 = vadd.f32 %v5202_v14, %v5201_v8  ;;  %v5218_v33 = vld [vmem:[#allocation54_spill] sm:$0xff]  ;;  %v1870_v10 = vld [vmem:[#allocation8 + $0x3b8] sm:$0xff] }
 0x1fb   :  { %v1499_v11 = vpop.f32.mrf.mxu2  ;;  %v1540_v43 = vpop.f32.mrf.mxu3  ;;  %v1635_v19 = vmax.f32 %v4568_v46, %v4618_v26  ;;  %v1636_v50 = vmax.f32 %v4570_v52, %v4622_v27  ;;  %v1645_v46 = vld [vmem:[#allocation7] sm:$0xff]  ;;  %v1878_v52 = vld [vmem:[#allocation8 + $0x3f8] sm:$0xff]  ;;  %v1836_v26 = vld [vmem:[#allocation8 + $0x2a8] sm:$0xff] }
 0x1fc   :  { %v1571_v17 = vadd.f32 %v1499_v11, %v1285_v4  ;;  %v1572_v12 = vadd.f32 %v1540_v43, %v1286_v54  ;;  %v1001_v16 = vadd.f32 %v5205_v41, %v595_v35  ;;  %v1420_v23 = vpop.f32.mrf.mxu0  ;;  %v1461_v61 = vpop.f32.mrf.mxu1  ;;  %v5212_v4 = vld [vmem:[#allocation88_spill] sm:$0xff]  ;;  %v5213_v54 = vld [vmem:[#allocation89_spill] sm:$0xff]  ;;  %v5214_v43 = vld [vmem:[#allocation90_spill] sm:$0xff] }
 0x1fd   :  { %v1288_v59 = vadd.f32 %v5212_v4, %v1002_v37  ;;  %v1289_v11 = vadd.f32 %v5213_v54, %v1003_v53  ;;  %v639_v53 = vadd.f32 %v5218_v33, %v5217_v39  ;;  %v5221_v4 = vld [vmem:[#allocation55_spill] sm:$0xff]  ;;  %v1868_v27 = vld [vmem:[#allocation8 + $0x3a8] sm:$0xff] }
 0x1fe   :  { %v4632_v48 = vmax.f32 %v1569_v24, %v1571_v17  ;;  %v4634_v36 = vmax.f32 %v1570_v51, %v1572_v12  ;;  %v1287_v57 = vadd.f32 %v5211_v25, %v1001_v16  ;;  %v1290_v24 = vadd.f32 %v5214_v43, %v1004_v29  ;;  %v5215_v16 = vld [vmem:[#allocation37_spill] sm:$0xff]  ;;  %v5220_v29 = vld [vmem:[#allocation72_spill] sm:$0xff] }
 0x1ff   :  { %v1574_v63 = vadd.f32 %v1461_v61, %v1288_v59  ;;  %v598_v37 = vadd.f32 %v5216_v49, %v5215_v16  ;;  %v1006_v25 = vadd.f32 %v5220_v29, %v639_v53 }
 0x200   :  { %v1607_v47 = vrot.slane %v4632_v48, 1  ;;  %v1608_v21 = vrot.slane %v4634_v36, 1  ;;  %v1573_v13 = vadd.f32 %v1420_v23, %v1287_v57  ;;  %v5224_v23 = vld [vmem:[#allocation74_spill] sm:$0xff] }
 0x202   :  { %v1617_v51 = vsel %vm288_vm0, %v1605_v20, %v1607_v47  ;;  %v1618_v17 = vsel %vm288_vm0, %v1606_v32, %v1608_v21  ;;  %v1005_v32 = vadd.f32 %v5219_v5, %v598_v37 }
 0x203   :  { %v1502_v12 = vpop.f32.mrf.mxu2  ;;  %v1543_v8 = vpop.f32.mrf.mxu3  ;;  %v1637_v14 = vmax.f32 %v4600_v31, %v1617_v51  ;;  %v1638_v35 = vmax.f32 %v4602_v34, %v1618_v17  ;;  %v5222_v31 = vld [vmem:[#allocation73_spill] sm:$0xff]  ;;  %v5223_v34 = vld [vmem:[#allocation56_spill] sm:$0xff] }
 0x204   :  { %v1575_v55 = vadd.f32 %v1502_v12, %v1289_v11  ;;  %v1576_v41 = vadd.f32 %v1543_v8, %v1290_v24  ;;  %v1007_v54 = vadd.f32 %v5222_v31, %v5221_v4  ;;  %v1008_v61 = vadd.f32 %v5224_v23, %v5223_v34  ;;  %v5225_v11 = vld [vmem:[#allocation91_spill] sm:$0xff]  ;;  %v5226_v24 = vld [vmem:[#allocation92_spill] sm:$0xff]  ;;  %v1423_v17 = vpop.f32.mrf.mxu0  ;;  %v1464_v12 = vpop.f32.mrf.mxu1  ;;  %v5227_v8 = vld [vmem:[#allocation93_spill] sm:$0xff] }
 0x205   :  { %v1291_v43 = vadd.f32 %v5225_v11, %v1005_v32  ;;  %v1292_v51 = vadd.f32 %v5226_v24, %v1006_v25  ;;  %v1864_v24 = vld [vmem:[#allocation8 + $0x388] sm:$0xff] }
 0x206   :  { %v1593_v20 = vmax.f32 %v1573_v13, %v1575_v55  ;;  %v1594_v28 = vmax.f32 %v1574_v63, %v1576_v41  ;;  %v1293_v13 = vadd.f32 %v5227_v8, %v1007_v54  ;;  %v5228_v63 = vld [vmem:[#allocation94_spill] sm:$0xff] }
 0x207   :  { %v1294_v55 = vadd.f32 %v5228_v63, %v1008_v61  ;;  %v1577_v53 = vadd.f32 %v1423_v17, %v1291_v43  ;;  %v1578_v5 = vadd.f32 %v1464_v12, %v1292_v51  ;;  %v1832_v43 = vld [vmem:[#allocation8 + $0x288] sm:$0xff]  ;;  %v1647_v51 = vld [vmem:[#allocation7 + $0x10] sm:$0xff]  ;;  %v1648_v17 = vld [vmem:[#allocation7 + $0x18] sm:$0xff] }
 0x208   :  { %v1609_v57 = vrot.slane %v1593_v20, 1  ;;  %v1610_v59 = vrot.slane %v1594_v28, 1  ;;  %v1829_v12 = vld [vmem:[#allocation8 + $0x270] sm:$0xff]  ;;  %v1862_v63 = vld [vmem:[#allocation8 + $0x378] sm:$0xff] }
 0x209   :  { %v1861_v8 = vld [vmem:[#allocation8 + $0x370] sm:$0xff] }
 0x20a   :  { %v1615_v41 = vsel %vm288_vm0, %v1607_v47, %v1609_v57  ;;  %v1616_v16 = vsel %vm288_vm0, %v1608_v21, %v1610_v59 }
 0x20b   :  { %v1505_v49 = vpop.f32.mrf.mxu2  ;;  %v1546_v37 = vpop.f32.mrf.mxu3  ;;  %v1639_v39 = vmax.f32 %v4632_v48, %v1615_v41  ;;  %v1640_v33 = vmax.f32 %v4634_v36, %v1616_v16  ;;  %v1859_v41 = vld [vmem:[#allocation8 + $0x360] sm:$0xff]  ;;  %v1828_v16 = vld [vmem:[#allocation8 + $0x268] sm:$0xff] }
 0x20c   :  { %v1579_v32 = vadd.f32 %v1505_v49, %v1293_v13  ;;  %v1580_v29 = vadd.f32 %v1546_v37, %v1294_v55  ;;  %v1830_v13 = vld [vmem:[#allocation8 + $0x278] sm:$0xff]  ;;  %v1827_v55 = vld [vmem:[#allocation8 + $0x260] sm:$0xff]  ;;  %v1860_v49 = vld [vmem:[#allocation8 + $0x368] sm:$0xff] }
 0x20d   :  { %v1825_v37 = vld [vmem:[#allocation8 + $0x250] sm:$0xff] }
 0x20e   :  { %v1595_v25 = vmax.f32 %v1577_v53, %v1579_v32  ;;  %v1596_v4 = vmax.f32 %v1578_v5, %v1580_v29  ;;  %v1858_v53 = vld [vmem:[#allocation8 + $0x358] sm:$0xff]  ;;  %v1823_v5 = vld [vmem:[#allocation8 + $0x240] sm:$0xff]  ;;  %v1824_v29 = vld [vmem:[#allocation8 + $0x248] sm:$0xff] }
 0x20f   :  { %v1855_v32 = vld [vmem:[#allocation8 + $0x340] sm:$0xff] }
 0x210   :  { %v1611_v31 = vrot.slane %v1595_v25, 1  ;;  %v1612_v54 = vrot.slane %v1596_v4, 1 }
 0x212   :  { %v1627_v47 = vsel %vm288_vm0, %v1611_v31, %v1597_v3  ;;  %v1628_v48 = vsel %vm288_vm0, %v1612_v54, %v1598_v15  ;;  %v1613_v36 = vsel %vm288_vm0, %v1609_v57, %v1611_v31  ;;  %v1614_v21 = vsel %vm288_vm0, %v1610_v59, %v1612_v54  ;;  %v1845_v3 = vld [vmem:[#allocation8 + $0x2f0] sm:$0xff]  ;;  %v1834_v57 = vld [vmem:[#allocation8 + $0x298] sm:$0xff] }
 0x213   :  { %v1643_v34 = vmax.f32 %v1595_v25, %v1627_v47  ;;  %v1644_v23 = vmax.f32 %v1596_v4, %v1628_v48  ;;  %v1641_v61 = vmax.f32 %v1593_v20, %v1613_v36  ;;  %v1642_v11 = vmax.f32 %v1594_v28, %v1614_v21  ;;  %v1877_v15 = vld [vmem:[#allocation8 + $0x3f0] sm:$0xff]  ;;  %v1843_v20 = vld [vmem:[#allocation8 + $0x2e0] sm:$0xff]  ;;  %1879 = vmatpush.msrb.mxu2 %v1845_v3  ;;  %v1866_v59 = vld [vmem:[#allocation8 + $0x398] sm:$0xff] }
 0x214   :  { %v1875_v28 = vld [vmem:[#allocation8 + $0x3e0] sm:$0xff]  ;;  %1908 = vmatpush.msrb.mxu3 %v1877_v15  ;;  %v1856_v25 = vld [vmem:[#allocation8 + $0x348] sm:$0xff]  ;;  %v1821_v4 = vld [vmem:[#allocation8 + $0x230] sm:$0xff] }
 0x215   :  { %1676 = vmatpush.msrb.mxu0 %v1643_v34  ;;  %1705 = vmatpush.msrb.mxu1 %v1644_v23  ;;  %v1853_v31 = vld [vmem:[#allocation8 + $0x330] sm:$0xff]  ;;  %v1822_v54 = vld [vmem:[#allocation8 + $0x238] sm:$0xff]  ;;  %v1819_v48 = vld [vmem:[#allocation8 + $0x220] sm:$0xff] }
 0x216   :  { %1880 = vmatpush.msrb.mxu2 %v1843_v20  ;;  %1909 = vmatpush.msrb.mxu3 %v1875_v28  ;;  %v1854_v47 = vld [vmem:[#allocation8 + $0x338] sm:$0xff]  ;;  %v1851_v36 = vld [vmem:[#allocation8 + $0x320] sm:$0xff]  ;;  %v1820_v21 = vld [vmem:[#allocation8 + $0x228] sm:$0xff] }
 0x217   :  { %1677 = vmatpush.msrb.mxu0 %v1641_v61  ;;  %1706 = vmatpush.msrb.mxu1 %v1642_v11  ;;  %v1852_v34 = vld [vmem:[#allocation8 + $0x328] sm:$0xff]  ;;  %v1817_v23 = vld [vmem:[#allocation8 + $0x210] sm:$0xff]  ;;  %v1818_v11 = vld [vmem:[#allocation8 + $0x218] sm:$0xff] }
 0x218   :  { %v1849_v61 = vld [vmem:[#allocation8 + $0x310] sm:$0xff]  ;;  %v1850_v3 = vld [vmem:[#allocation8 + $0x318] sm:$0xff]  ;;  %v1815_v15 = vld [vmem:[#allocation8 + $0x200] sm:$0xff] }
 0x219   :  { %1678 = vmatpush.msrb.mxu0 %v1639_v39  ;;  %1707 = vmatpush.msrb.mxu1 %v1640_v33  ;;  %v1857_v39 = vld [vmem:[#allocation8 + $0x350] sm:$0xff]  ;;  %v1826_v33 = vld [vmem:[#allocation8 + $0x258] sm:$0xff]  ;;  %v1847_v20 = vld [vmem:[#allocation8 + $0x300] sm:$0xff] }
 0x21a   :  { %v1816_v28 = vld [vmem:[#allocation8 + $0x208] sm:$0xff] }
 0x21b   :  { %1679 = vmatpush.msrb.mxu0 %v1637_v14  ;;  %1708 = vmatpush.msrb.mxu1 %v1638_v35  ;;  %v1841_v14 = vld [vmem:[#allocation8 + $0x2d0] sm:$0xff] }
 0x21c   :  { %v1873_v35 = vld [vmem:[#allocation8 + $0x3d0] sm:$0xff]  ;;  %1881 = vmatpush.msrb.mxu2 %v1841_v14  ;;  %v1848_v14 = vld [vmem:[#allocation8 + $0x308] sm:$0xff] }
 0x21d   :  { %1680 = vmatpush.msrb.mxu0 %v1635_v19  ;;  %1709 = vmatpush.msrb.mxu1 %v1636_v50  ;;  %v1831_v19 = vld [vmem:[#allocation8 + $0x280] sm:$0xff] }
 0x21e   :  { %1910 = vmatpush.msrb.mxu3 %v1873_v35  ;;  %1882 = vmatpush.msrb.mxu2 %v1839_v60  ;;  %v1863_v50 = vld [vmem:[#allocation8 + $0x380] sm:$0xff]  ;;  %v1764_v35 = vld [vmem:[#allocation8 + $0xf0] sm:$0xff] }
 0x21f   :  { %1681 = vmatpush.msrb.mxu0 %v1633_v6  ;;  %1710 = vmatpush.msrb.mxu1 %v1634_v7  ;;  %v1833_v6 = vld [vmem:[#allocation8 + $0x290] sm:$0xff]  ;;  %v1762_v60 = vld [vmem:[#allocation8 + $0xe0] sm:$0xff] }
 0x220   :  { %1911 = vmatpush.msrb.mxu3 %v1871_v2  ;;  %1883 = vmatpush.msrb.mxu2 %v1837_v0  ;;  %v1865_v7 = vld [vmem:[#allocation8 + $0x390] sm:$0xff]  ;;  %v1794_v2 = vld [vmem:[#allocation8 + $0x1e0] sm:$0xff] }
 0x221   :  { %1682 = vmatpush.msrb.mxu0 %v1631_v1  ;;  %1711 = vmatpush.msrb.mxu1 %v1632_v18  ;;  %v1869_v1 = vld [vmem:[#allocation8 + $0x3b0] sm:$0xff]  ;;  %v1842_v18 = vld [vmem:[#allocation8 + $0x2d8] sm:$0xff] }
 0x222   :  { %1912 = vmatpush.msrb.mxu3 %v1869_v1  ;;  %1884 = vmatpush.msrb.mxu2 %v1835_v22  ;;  %v1760_v0 = vld [vmem:[#allocation8 + $0xd0] sm:$0xff]  ;;  %v1758_v22 = vld [vmem:[#allocation8 + $0xc0] sm:$0xff] }
 0x223   :  { %1683 = vmatpush.msrb.mxu0 %v1629_v30  ;;  %1712 = vmatpush.msrb.mxu1 %v1630_v42  ;;  %v1646_v30 = vld [vmem:[#allocation7 + $0x8] sm:$0xff]  ;;  %v1838_v42 = vld [vmem:[#allocation8 + $0x2b8] sm:$0xff]  ;;  %v1792_v1 = vld [vmem:[#allocation8 + $0x1d0] sm:$0xff] }
 0x224   :  { %3334 = vmatmul.msk.f32.vlgmr.msrb.gmra.mxu0 %vm1655_vm5, %v1645_v46  ;;  %3338 = vmatmul.msk.f32.vlgmr.msrb.gmra.mxu1 %vm1655_vm5, %v1645_v46  ;;  %v1796_v46 = vld [vmem:[#allocation8 + $0x1f0] sm:$0xff] }
 0x225   :  { %1937 = vmatpush.msra.mxu0 %v1846_v40  ;;  %1966 = vmatpush.msra.mxu1 %v1878_v52  ;;  %v1765_v40 = vld [vmem:[#allocation8 + $0xf8] sm:$0xff] }
 0x226   :  { %1913 = vmatpush.msrb.mxu3 %v1867_v44  ;;  %1885 = vmatpush.msrb.mxu2 %v1833_v6  ;;  %v1797_v52 = vld [vmem:[#allocation8 + $0x1f8] sm:$0xff]  ;;  %v1790_v44 = vld [vmem:[#allocation8 + $0x1c0] sm:$0xff] }
 0x227   :  { %1938 = vmatpush.msra.mxu0 %v1844_v58  ;;  %1967 = vmatpush.msra.mxu1 %v1876_v62  ;;  %v1763_v58 = vld [vmem:[#allocation8 + $0xe8] sm:$0xff]  ;;  %v1649_v6 = vld [vmem:[#allocation5] sm:$0x3] }
 0x228   :  { %1914 = vmatpush.msrb.mxu3 %v1865_v7  ;;  %1886 = vmatpush.msrb.mxu2 %v1831_v19  ;;  %v1795_v62 = vld [vmem:[#allocation8 + $0x1e8] sm:$0xff]  ;;  %v1789_v7 = vld [vmem:[#allocation8 + $0x1b8] sm:$0xff] }
 0x229   :  { %1939 = vmatpush.msra.mxu0 %v1842_v18  ;;  %1968 = vmatpush.msra.mxu1 %v1874_v45  ;;  %v1761_v18 = vld [vmem:[#allocation8 + $0xd8] sm:$0xff]  ;;  %v1755_v19 = vld [vmem:[#allocation8 + $0xa8] sm:$0xff] }
 0x22a   :  { %1915 = vmatpush.msrb.mxu3 %v1863_v50  ;;  %1887 = vmatpush.msrb.mxu2 %v1829_v12  ;;  %v1793_v45 = vld [vmem:[#allocation8 + $0x1d8] sm:$0xff]  ;;  %v1787_v50 = vld [vmem:[#allocation8 + $0x1a8] sm:$0xff]  ;;  %v4720_v12 = vperm.slane %v1649_v6, 1 }
 0x22b   :  { %1940 = vmatpush.msra.mxu0 %v1840_v56  ;;  %1969 = vmatpush.msra.mxu1 %v1872_v9  ;;  %v1759_v56 = vld [vmem:[#allocation8 + $0xc8] sm:$0xff] }
 0x22c   :  { %3335 = vmatmul.msk.f32.gmra.mxu0 %vm1655_vm5, %v1646_v30  ;;  %3339 = vmatmul.msk.f32.gmra.mxu1 %vm1655_vm5, %v1646_v30  ;;  %v1791_v9 = vld [vmem:[#allocation8 + $0x1c8] sm:$0xff]  ;;  %v1756_v30 = vld [vmem:[#allocation8 + $0xb0] sm:$0xff] }
 0x22d   :  { %1941 = vmatpush.msra.mxu0 %v1838_v42  ;;  %1970 = vmatpush.msra.mxu1 %v1870_v10  ;;  %v1788_v42 = vld [vmem:[#allocation8 + $0x1b0] sm:$0xff]  ;;  %v1757_v10 = vld [vmem:[#allocation8 + $0xb8] sm:$0xff] }
 0x22e   :  { %1916 = vmatpush.msrb.mxu3 %v1861_v8  ;;  %1888 = vmatpush.msrb.mxu2 %v1827_v55  ;;  %v1782_v8 = vld [vmem:[#allocation8 + $0x180] sm:$0xff] }
 0x22f   :  { %1942 = vmatpush.msra.mxu0 %v1836_v26  ;;  %1971 = vmatpush.msra.mxu1 %v1868_v27  ;;  %v1754_v26 = vld [vmem:[#allocation8 + $0xa0] sm:$0xff] }
 0x230   :  { %1917 = vmatpush.msrb.mxu3 %v1859_v41  ;;  %1889 = vmatpush.msrb.mxu2 %v1825_v37  ;;  %v1786_v27 = vld [vmem:[#allocation8 + $0x1a0] sm:$0xff]  ;;  %v1749_v37 = vld [vmem:[#allocation8 + $0x78] sm:$0xff] }
 0x231   :  { %1943 = vmatpush.msra.mxu0 %v1834_v57  ;;  %1972 = vmatpush.msra.mxu1 %v1866_v59  ;;  %v1752_v57 = vld [vmem:[#allocation8 + $0x90] sm:$0xff] }
 0x232   :  { %1918 = vmatpush.msrb.mxu3 %v1857_v39  ;;  %1890 = vmatpush.msrb.mxu2 %v1823_v5  ;;  %v1784_v59 = vld [vmem:[#allocation8 + $0x190] sm:$0xff]  ;;  %v1746_v5 = vld [vmem:[#allocation8 + $0x60] sm:$0xff] }
 0x233   :  { %1944 = vmatpush.msra.mxu0 %v1832_v43  ;;  %1973 = vmatpush.msra.mxu1 %v1864_v24  ;;  %v1753_v43 = vld [vmem:[#allocation8 + $0x98] sm:$0xff] }
 0x234   :  { %3336 = vmatmul.msk.f32.gmra.mxu0 %vm1655_vm5, %v1647_v51  ;;  %3340 = vmatmul.msk.f32.gmra.mxu1 %vm1655_vm5, %v1647_v51  ;;  %v1785_v24 = vld [vmem:[#allocation8 + $0x198] sm:$0xff]  ;;  %v1750_v51 = vld [vmem:[#allocation8 + $0x80] sm:$0xff] }
 0x235   :  { %1945 = vmatpush.msra.mxu0 %v1830_v13  ;;  %1974 = vmatpush.msra.mxu1 %v1862_v63  ;;  %v1751_v13 = vld [vmem:[#allocation8 + $0x88] sm:$0xff] }
 0x236   :  { %1919 = vmatpush.msrb.mxu3 %v1855_v32  ;;  %1891 = vmatpush.msrb.mxu2 %v1821_v4  ;;  %v1783_v63 = vld [vmem:[#allocation8 + $0x188] sm:$0xff]  ;;  %v1778_v32 = vld [vmem:[#allocation8 + $0x160] sm:$0xff]  ;;  %v1744_v4 = vld [vmem:[#allocation8 + $0x50] sm:$0xff] }
 0x237   :  { %1946 = vmatpush.msra.mxu0 %v1828_v16  ;;  %1975 = vmatpush.msra.mxu1 %v1860_v49  ;;  %v1748_v16 = vld [vmem:[#allocation8 + $0x70] sm:$0xff] }
 0x238   :  { %1920 = vmatpush.msrb.mxu3 %v1853_v31  ;;  %1892 = vmatpush.msrb.mxu2 %v1819_v48  ;;  %v1780_v49 = vld [vmem:[#allocation8 + $0x170] sm:$0xff]  ;;  %v1742_v48 = vld [vmem:[#allocation8 + $0x40] sm:$0xff] }
 0x239   :  { %1947 = vmatpush.msra.mxu0 %v1826_v33  ;;  %1976 = vmatpush.msra.mxu1 %v1858_v53  ;;  %v1781_v53 = vld [vmem:[#allocation8 + $0x178] sm:$0xff]  ;;  %v1776_v31 = vld [vmem:[#allocation8 + $0x150] sm:$0xff] }
 0x23a   :  { %1921 = vmatpush.msrb.mxu3 %v1851_v36  ;;  %1893 = vmatpush.msrb.mxu2 %v1817_v23  ;;  %v1774_v36 = vld [vmem:[#allocation8 + $0x140] sm:$0xff]  ;;  %v1743_v23 = vld [vmem:[#allocation8 + $0x48] sm:$0xff] }
 0x23b   :  { %1948 = vmatpush.msra.mxu0 %v1824_v29  ;;  %1977 = vmatpush.msra.mxu1 %v1856_v25  ;;  %v1747_v29 = vld [vmem:[#allocation8 + $0x68] sm:$0xff] }
 0x23c   :  { %3337 = vmatmul.msk.f32.gmra.mxu0 %vm1655_vm5, %v1648_v17  ;;  %3341 = vmatmul.msk.f32.gmra.mxu1 %vm1655_vm5, %v1648_v17  ;;  %v4718_v17 = vperm.slane %v1649_v6, 0  ;;  %v1779_v25 = vld [vmem:[#allocation8 + $0x168] sm:$0xff] }
 0x23d   :  { %1949 = vmatpush.msra.mxu0 %v1822_v54  ;;  %1978 = vmatpush.msra.mxu1 %v1854_v47  ;;  %v1745_v54 = vld [vmem:[#allocation8 + $0x58] sm:$0xff] }
 0x23e   :  { %1922 = vmatpush.msrb.mxu3 %v1849_v61  ;;  %1894 = vmatpush.msrb.mxu2 %v1815_v15  ;;  %v1777_v47 = vld [vmem:[#allocation8 + $0x158] sm:$0xff]  ;;  %v1775_v61 = vld [vmem:[#allocation8 + $0x148] sm:$0xff] }
 0x23f   :  { %1950 = vmatpush.msra.mxu0 %v1820_v21  ;;  %1979 = vmatpush.msra.mxu1 %v1852_v34 }
 0x240   :  { %1923 = vmatpush.msrb.mxu3 %v1847_v20  ;;  %1995 = vmatpush.msra.mxu2 %v1764_v35  ;;  %v1741_v35 = vld [vmem:[#allocation8 + $0x38] sm:$0xff] }
 0x241   :  { %1951 = vmatpush.msra.mxu0 %v1818_v11  ;;  %1980 = vmatpush.msra.mxu1 %v1850_v3 }
 0x242   :  { %2024 = vmatpush.msra.mxu3 %v1796_v46  ;;  %1996 = vmatpush.msra.mxu2 %v1762_v60  ;;  %v1738_v60 = vld [vmem:[#allocation8 + $0x20] sm:$0xff] }
 0x243   :  { %1952 = vmatpush.msra.mxu0 %v1816_v28  ;;  %1981 = vmatpush.msra.mxu1 %v1848_v14  ;;  %v1740_v28 = vld [vmem:[#allocation8 + $0x30] sm:$0xff] }
 0x244   :  { %2025 = vmatpush.msra.mxu3 %v1794_v2  ;;  %1997 = vmatpush.msra.mxu2 %v1760_v0  ;;  %v1772_v14 = vld [vmem:[#allocation8 + $0x130] sm:$0xff]  ;;  %v1770_v2 = vld [vmem:[#allocation8 + $0x120] sm:$0xff]  ;;  %v1739_v0 = vld [vmem:[#allocation8 + $0x28] sm:$0xff] }
 0x245   :  { %2053 = vmatpush.msrb.mxu0 %v1765_v40  ;;  %2082 = vmatpush.msrb.mxu1 %v1797_v52  ;;  %v1773_v52 = vld [vmem:[#allocation8 + $0x138] sm:$0xff] }
 0x246   :  { %2026 = vmatpush.msra.mxu3 %v1792_v1  ;;  %1998 = vmatpush.msra.mxu2 %v1758_v22  ;;  %v1771_v1 = vld [vmem:[#allocation8 + $0x128] sm:$0xff]  ;;  %v1768_v22 = vld [vmem:[#allocation8 + $0x110] sm:$0xff] }
 0x247   :  { %2054 = vmatpush.msrb.mxu0 %v1763_v58  ;;  %2083 = vmatpush.msrb.mxu1 %v1795_v62 }
 0x248   :  { %2027 = vmatpush.msra.mxu3 %v1790_v44  ;;  %1999 = vmatpush.msra.mxu2 %v1756_v30  ;;  %v1737_v44 = vld [vmem:[#allocation8 + $0x18] sm:$0xff] }
 0x249   :  { %2055 = vmatpush.msrb.mxu0 %v1761_v18  ;;  %2084 = vmatpush.msrb.mxu1 %v1793_v45  ;;  %v1736_v18 = vld [vmem:[#allocation8 + $0x10] sm:$0xff] }
 0x24a   :  { %2028 = vmatpush.msra.mxu3 %v1788_v42  ;;  %2000 = vmatpush.msra.mxu2 %v1754_v26 }
 0x24b   :  { %2056 = vmatpush.msrb.mxu0 %v1759_v56  ;;  %2085 = vmatpush.msrb.mxu1 %v1791_v9  ;;  %v1769_v56 = vld [vmem:[#allocation8 + $0x118] sm:$0xff] }
 0x24c   :  { %2029 = vmatpush.msra.mxu3 %v1786_v27  ;;  %2001 = vmatpush.msra.mxu2 %v1752_v57 }
 0x24d   :  { %2057 = vmatpush.msrb.mxu0 %v1757_v10  ;;  %2086 = vmatpush.msrb.mxu1 %v1789_v7 }
 0x24e   :  { %2030 = vmatpush.msra.mxu3 %v1784_v59  ;;  %2002 = vmatpush.msra.mxu2 %v1750_v51  ;;  %v1766_v51 = vld [vmem:[#allocation8 + $0x100] sm:$0xff] }
 0x24f   :  { %2058 = vmatpush.msrb.mxu0 %v1755_v19  ;;  %2087 = vmatpush.msrb.mxu1 %v1787_v50 }
 0x250   :  { %2031 = vmatpush.msra.mxu3 %v1782_v8  ;;  %2003 = vmatpush.msra.mxu2 %v1748_v16  ;;  %v1767_v16 = vld [vmem:[#allocation8 + $0x108] sm:$0xff] }
 0x251   :  { %2059 = vmatpush.msrb.mxu0 %v1753_v43  ;;  %2088 = vmatpush.msrb.mxu1 %v1785_v24  ;;  %v1734_v24 = vld [vmem:[#allocation8] sm:$0xff] }
 0x252   :  { %2032 = vmatpush.msra.mxu3 %v1780_v49  ;;  %2004 = vmatpush.msra.mxu2 %v1746_v5 }
 0x253   :  { %2060 = vmatpush.msrb.mxu0 %v1751_v13  ;;  %2089 = vmatpush.msrb.mxu1 %v1783_v63 }
 0x254   :  { %2033 = vmatpush.msra.mxu3 %v1778_v32  ;;  %2005 = vmatpush.msra.mxu2 %v1744_v4  ;;  %v2158_v32 = vld [vmem:[#allocation8 + $0x4f0] sm:$0xff]  ;;  %v2159_v4 = vld [vmem:[#allocation8 + $0x4f8] sm:$0xff] }
 0x255   :  { %2061 = vmatpush.msrb.mxu0 %v1749_v37  ;;  %2090 = vmatpush.msrb.mxu1 %v1781_v53 }
 0x256   :  { %2034 = vmatpush.msra.mxu3 %v1776_v31  ;;  %2006 = vmatpush.msra.mxu2 %v1742_v48  ;;  %v2191_v31 = vld [vmem:[#allocation8 + $0x5f8] sm:$0xff] }
 0x257   :  { %2062 = vmatpush.msrb.mxu0 %v1747_v29  ;;  %2091 = vmatpush.msrb.mxu1 %v1779_v25  ;;  %v2190_v29 = vld [vmem:[#allocation8 + $0x5f0] sm:$0xff] }
 0x258   :  { %2035 = vmatpush.msra.mxu3 %v1774_v36  ;;  %2007 = vmatpush.msra.mxu2 %v1740_v28  ;;  %v2156_v36 = vld [vmem:[#allocation8 + $0x4e0] sm:$0xff] }
 0x259   :  { %2063 = vmatpush.msrb.mxu0 %v1745_v54  ;;  %2092 = vmatpush.msrb.mxu1 %v1777_v47 }
 0x25a   :  { %2036 = vmatpush.msra.mxu3 %v1772_v14  ;;  %2008 = vmatpush.msra.mxu2 %v1738_v60 }
 0x25b   :  { %2064 = vmatpush.msrb.mxu0 %v1743_v23  ;;  %2093 = vmatpush.msrb.mxu1 %v1775_v61  ;;  %v2188_v23 = vld [vmem:[#allocation8 + $0x5e0] sm:$0xff]  ;;  %v2157_v61 = vld [vmem:[#allocation8 + $0x4e8] sm:$0xff] }
 0x25c   :  { %2037 = vmatpush.msra.mxu3 %v1770_v2  ;;  %2009 = vmatpush.msra.mxu2 %v1736_v18 }
 0x25d   :  { %2065 = vmatpush.msrb.mxu0 %v1741_v35  ;;  %2094 = vmatpush.msrb.mxu1 %v1773_v52 }
 0x25e   :  { %2038 = vmatpush.msra.mxu3 %v1768_v22  ;;  %2010 = vmatpush.msra.mxu2 %v1734_v24 }
 0x25f   :  { %2066 = vmatpush.msrb.mxu0 %v1739_v0  ;;  %2095 = vmatpush.msrb.mxu1 %v1771_v1  ;;  %v2154_v0 = vld [vmem:[#allocation8 + $0x4d0] sm:$0xff] }
 0x260   :  { %2039 = vmatpush.msra.mxu3 %v1766_v51  ;;  %v2186_v1 = vld [vmem:[#allocation8 + $0x5d0] sm:$0xff]  ;;  %v2152_v51 = vld [vmem:[#allocation8 + $0x4c0] sm:$0xff] }
 0x261   :  { %2067 = vmatpush.msrb.mxu0 %v1737_v44  ;;  %2096 = vmatpush.msrb.mxu1 %v1769_v56 }
 0x263   :  { %2097 = vmatpush.msrb.mxu1 %v1767_v16  ;;  %v2182_v16 = vld [vmem:[#allocation8 + $0x5b0] sm:$0xff] }
 0x2a1   :  { %v1685_v55 = vpop.f32.mrf.mxu0  ;;  %v1714_v41 = vpop.f32.mrf.mxu1 }
 0x2a2   :  { %v1686_v39 = vadd.f32 %v1685_v55, %v4718_v17  ;;  %v1715_v33 = vadd.f32 %v1714_v41, %v4720_v12  ;;  %v1735_v41 = vld [vmem:[#allocation8 + $0x8] sm:$0xff] }
 0x2a3   :  { %2068 = vmatpush.msrb.mxu0 %v1735_v41 }
 0x2a4   :  { %v4724_v21 = vmax.f32 %v1686_v39, 0.0  ;;  %v4726_v34 = vmax.f32 %v1715_v33, 0.0 }
 0x2a6   :  { %v1798_v46 = vrot.slane %v4724_v21, 1  ;;  %v1799_v40 = vrot.slane %v4726_v34, 1  ;;  %v2111_v45 = vrot.slane %v4724_v21, 2  ;;  %v2112_v9 = vrot.slane %v4726_v34, 2 }
 0x2a7   :  { %v2316_v30 = vrot.slane %v4724_v21, 3  ;;  %v2317_v42 = vrot.slane %v4726_v34, 3  ;;  %v2521_v26 = vrot.slane %v4724_v21, 4  ;;  %v2522_v33 = vrot.slane %v4726_v34, 4 }
 0x2a9   :  { %v1688_v11 = vpop.f32.mrf.mxu0  ;;  %v1717_v3 = vpop.f32.mrf.mxu1 }
 0x2aa   :  { %v1689_v15 = vadd.f32 %v1688_v11, %v4718_v17  ;;  %v1718_v20 = vadd.f32 %v1717_v3, %v4720_v12  ;;  %v2189_v11 = vld [vmem:[#allocation8 + $0x5e8] sm:$0xff] }
 0x2ac   :  { %v4732_v58 = vmax.f32 %v1689_v15, 0.0  ;;  %v4734_v62 = vmax.f32 %v1718_v20, 0.0 }
 0x2ae   :  { %v1800_v10 = vrot.slane %v4732_v58, 1  ;;  %v1801_v6 = vrot.slane %v4734_v62, 1  ;;  %v2113_v7 = vrot.slane %v4732_v58, 2  ;;  %v2114_v27 = vrot.slane %v4734_v62, 2 }
 0x2af   :  { %v2318_v19 = vrot.slane %v4732_v58, 3  ;;  %v2319_v50 = vrot.slane %v4734_v62, 3  ;;  %v2523_v57 = vrot.slane %v4732_v58, 4  ;;  %v2524_v13 = vrot.slane %v4734_v62, 4 }
 0x2b0   :  { %v1810_v59 = vsel %vm288_vm0, %v1798_v46, %v1800_v10  ;;  %v1811_v43 = vsel %vm288_vm0, %v1799_v40, %v1801_v6  ;;  %v4766_v8 = vsel %vm731_vm2, %v2111_v45, %v2113_v7  ;;  %v4775_v49 = vsel %vm731_vm2, %v2112_v9, %v2114_v27 }
 0x2b1   :  { %v1691_v63 = vpop.f32.mrf.mxu0  ;;  %v1720_v55 = vpop.f32.mrf.mxu1  ;;  %1895 = vmatmul.f32.vlgmr.msrb.gmra.mxu2 %v1810_v59  ;;  %1924 = vmatmul.f32.vlgmr.msrb.gmra.mxu3 %v1811_v43  ;;  %v4783_v37 = vsel %vm1017_vm3, %v2316_v30, %v2318_v19  ;;  %v4791_v39 = vsel %vm1017_vm3, %v2317_v42, %v2319_v50  ;;  %v4802_v25 = vsel %vm1303_vm4, %v2521_v26, %v2523_v57 }
 0x2b2   :  { %v1692_v53 = vadd.f32 %v1691_v63, %v4718_v17  ;;  %v1721_v5 = vadd.f32 %v1720_v55, %v4720_v12  ;;  %1953 = vmatmul.f32.vlgmr.msra.gmra.mxu0 %v1810_v59  ;;  %1982 = vmatmul.f32.vlgmr.msra.gmra.mxu1 %v1811_v43  ;;  %v4810_v54 = vsel %vm1303_vm4, %v2522_v33, %v2524_v13  ;;  %v2184_v63 = vld [vmem:[#allocation8 + $0x5c0] sm:$0xff]  ;;  %v2185_v55 = vld [vmem:[#allocation8 + $0x5c8] sm:$0xff] }
 0x2b3   :  { %2192 = vmatpush.msrb.mxu2 %v2158_v32  ;;  %2221 = vmatpush.msrb.mxu3 %v2190_v29 }
 0x2b4   :  { %v4812_v47 = vmax.f32 %v1692_v53, 0.0  ;;  %v4814_v48 = vmax.f32 %v1721_v5, 0.0  ;;  %2250 = vmatpush.msra.mxu0 %v2159_v4  ;;  %2279 = vmatpush.msra.mxu1 %v2191_v31  ;;  %v2151_v53 = vld [vmem:[#allocation8 + $0x4b8] sm:$0xff] }
 0x2b5   :  { %2193 = vmatpush.msrb.mxu2 %v2156_v36  ;;  %2222 = vmatpush.msrb.mxu3 %v2188_v23 }
 0x2b6   :  { %v1802_v3 = vrot.slane %v4812_v47, 1  ;;  %v1803_v15 = vrot.slane %v4814_v48, 1  ;;  %v2115_v20 = vrot.slane %v4812_v47, 2  ;;  %v2116_v28 = vrot.slane %v4814_v48, 2  ;;  %2251 = vmatpush.msra.mxu0 %v2157_v61  ;;  %2280 = vmatpush.msra.mxu1 %v2189_v11  ;;  %v2183_v11 = vld [vmem:[#allocation8 + $0x5b8] sm:$0xff] }
 0x2b7   :  { %v2320_v14 = vrot.slane %v4812_v47, 3  ;;  %v2321_v35 = vrot.slane %v4814_v48, 3  ;;  %v2525_v52 = vrot.slane %v4812_v47, 4  ;;  %v2526_v22 = vrot.slane %v4814_v48, 4  ;;  %2194 = vmatpush.msrb.mxu2 %v2154_v0  ;;  %2223 = vmatpush.msrb.mxu3 %v2186_v1  ;;  %v2149_v0 = vld [vmem:[#allocation8 + $0x4a8] sm:$0xff] }
 0x2b8   :  { %v1808_v60 = vsel %vm288_vm0, %v1800_v10, %v1802_v3  ;;  %v1809_v2 = vsel %vm288_vm0, %v1801_v6, %v1803_v15  ;;  %v4837_v18 = vsel %vm731_vm2, %v2113_v7, %v2115_v20  ;;  %v2155_v10 = vld [vmem:[#allocation8 + $0x4d8] sm:$0xff]  ;;  %v4846_v59 = vsel %vm731_vm2, %v2114_v27, %v2116_v28 }
 0x2b9   :  { %v1694_v44 = vpop.f32.mrf.mxu0  ;;  %v1723_v56 = vpop.f32.mrf.mxu1  ;;  %1898 = vmatmul.f32.gmra.mxu2 %v1808_v60  ;;  %1927 = vmatmul.f32.gmra.mxu3 %v1809_v2  ;;  %v2187_v6 = vld [vmem:[#allocation8 + $0x5d8] sm:$0xff]  ;;  %v4854_v7 = vsel %vm1017_vm3, %v2318_v19, %v2320_v14  ;;  %v4862_v43 = vsel %vm1017_vm3, %v2319_v50, %v2321_v35  ;;  %v4872_v19 = vsel %vm1303_vm4, %v2523_v57, %v2525_v52  ;;  %v2153_v50 = vld [vmem:[#allocation8 + $0x4c8] sm:$0xff]  ;;  %v2150_v57 = vld [vmem:[#allocation8 + $0x4b0] sm:$0xff] }
 0x2ba   :  { %v1695_v24 = vadd.f32 %v1694_v44, %v4718_v17  ;;  %v1724_v27 = vadd.f32 %v1723_v56, %v4720_v12  ;;  %1956 = vmatmul.f32.gmra.mxu0 %v1808_v60  ;;  %1985 = vmatmul.f32.gmra.mxu1 %v1809_v2  ;;  %v4880_v17 = vsel %vm1303_vm4, %v2524_v13, %v2526_v22  ;;  %v2148_v60 = vld [vmem:[#allocation8 + $0x4a0] sm:$0xff]  ;;  %v2181_v56 = vld [vmem:[#allocation8 + $0x5a8] sm:$0xff] }
 0x2bb   :  { %2252 = vmatpush.msra.mxu0 %v2155_v10  ;;  %2281 = vmatpush.msra.mxu1 %v2187_v6  ;;  %v2180_v2 = vld [vmem:[#allocation8 + $0x5a0] sm:$0xff]  ;;  %v2146_v10 = vld [vmem:[#allocation8 + $0x490] sm:$0xff] }
 0x2bc   :  { %v4882_v12 = vmax.f32 %v1695_v24, 0.0  ;;  %v4884_v41 = vmax.f32 %v1724_v27, 0.0  ;;  %2195 = vmatpush.msrb.mxu2 %v2152_v51  ;;  %2224 = vmatpush.msrb.mxu3 %v2184_v63  ;;  %v2178_v6 = vld [vmem:[#allocation8 + $0x590] sm:$0xff]  ;;  %v2147_v24 = vld [vmem:[#allocation8 + $0x498] sm:$0xff]  ;;  %v2144_v51 = vld [vmem:[#allocation8 + $0x480] sm:$0xff] }
 0x2bd   :  { %2253 = vmatpush.msra.mxu0 %v2153_v50  ;;  %2282 = vmatpush.msra.mxu1 %v2185_v55  ;;  %v2179_v27 = vld [vmem:[#allocation8 + $0x598] sm:$0xff]  ;;  %v2176_v63 = vld [vmem:[#allocation8 + $0x580] sm:$0xff]  ;;  %v2145_v50 = vld [vmem:[#allocation8 + $0x488] sm:$0xff] }
 0x2be   :  { %v1804_v5 = vrot.slane %v4882_v12, 1  ;;  %v1805_v32 = vrot.slane %v4884_v41, 1  ;;  %v2117_v13 = vrot.slane %v4882_v12, 2  ;;  %2196 = vmatpush.msrb.mxu2 %v2150_v57  ;;  %2225 = vmatpush.msrb.mxu3 %v2182_v16  ;;  %v2118_v29 = vrot.slane %v4884_v41, 2  ;;  %v2142_v55 = vld [vmem:[#allocation8 + $0x470] sm:$0xff]  ;;  %v2143_v16 = vld [vmem:[#allocation8 + $0x478] sm:$0xff] }
 0x2bf   :  { %v2322_v4 = vrot.slane %v4882_v12, 3  ;;  %v2323_v31 = vrot.slane %v4884_v41, 3  ;;  %v2527_v36 = vrot.slane %v4882_v12, 4  ;;  %2254 = vmatpush.msra.mxu0 %v2151_v53  ;;  %v2528_v44 = vrot.slane %v4884_v41, 4  ;;  %2283 = vmatpush.msra.mxu1 %v2183_v11  ;;  %v2174_v57 = vld [vmem:[#allocation8 + $0x570] sm:$0xff]  ;;  %v2175_v53 = vld [vmem:[#allocation8 + $0x578] sm:$0xff] }
 0x2c0   :  { %v1806_v23 = vsel %vm288_vm0, %v1802_v3, %v1804_v5  ;;  %v1807_v61 = vsel %vm288_vm0, %v1803_v15, %v1805_v32  ;;  %v4901_v1 = vsel %vm731_vm2, %v2115_v20, %v2117_v13  ;;  %v4907_v3 = vsel %vm731_vm2, %v2116_v28, %v2118_v29  ;;  %2197 = vmatpush.msrb.mxu2 %v2148_v60  ;;  %v2169_v11 = vld [vmem:[#allocation8 + $0x548] sm:$0xff]  ;;  %v2134_v60 = vld [vmem:[#allocation8 + $0x430] sm:$0xff] }
 0x2c1   :  { %1901 = vmatmul.f32.gmra.mxu2 %v1806_v23  ;;  %1930 = vmatmul.f32.gmra.mxu3 %v1807_v61  ;;  %v4913_v15 = vsel %vm731_vm2, %v2117_v13, %v2111_v45  ;;  %v4920_v20 = vsel %vm731_vm2, %v2118_v29, %v2112_v9  ;;  %v4926_v28 = vsel %vm1017_vm3, %v2320_v14, %v2322_v4  ;;  %v2140_v13 = vld [vmem:[#allocation8 + $0x460] sm:$0xff]  ;;  %v2173_v29 = vld [vmem:[#allocation8 + $0x568] sm:$0xff] }
 0x2c2   :  { %1959 = vmatmul.f32.gmra.mxu0 %v1806_v23  ;;  %1988 = vmatmul.f32.gmra.mxu1 %v1807_v61  ;;  %v4932_v45 = vsel %vm1017_vm3, %v2321_v35, %v2323_v31  ;;  %v4938_v9 = vsel %vm1017_vm3, %v2322_v4, %v2316_v30  ;;  %v4944_v14 = vsel %vm1017_vm3, %v2323_v31, %v2317_v42  ;;  %v2139_v4 = vld [vmem:[#allocation8 + $0x458] sm:$0xff]  ;;  %v2168_v23 = vld [vmem:[#allocation8 + $0x540] sm:$0xff]  ;;  %v2137_v61 = vld [vmem:[#allocation8 + $0x448] sm:$0xff] }
 0x2c3   :  { %v4950_v35 = vsel %vm1303_vm4, %v2525_v52, %v2527_v36  ;;  %2226 = vmatpush.msrb.mxu3 %v2180_v2  ;;  %2255 = vmatpush.msra.mxu0 %v2149_v0  ;;  %v4956_v30 = vsel %vm1303_vm4, %v2526_v22, %v2528_v44  ;;  %v4962_v42 = vsel %vm1303_vm4, %v2527_v36, %v2521_v26  ;;  %v2171_v31 = vld [vmem:[#allocation8 + $0x558] sm:$0xff]  ;;  %v2136_v36 = vld [vmem:[#allocation8 + $0x440] sm:$0xff]  ;;  %v2166_v2 = vld [vmem:[#allocation8 + $0x530] sm:$0xff] }
 0x2c4   :  { %v4968_v52 = vsel %vm1303_vm4, %v2528_v44, %v2522_v33  ;;  %2284 = vmatpush.msra.mxu1 %v2181_v56  ;;  %2198 = vmatpush.msrb.mxu2 %v2146_v10  ;;  %v1812_v26 = vsel %vm288_vm0, %v1804_v5, %v1798_v46  ;;  %v1813_v22 = vsel %vm288_vm0, %v1805_v32, %v1799_v40  ;;  %v2177_v33 = vld [vmem:[#allocation8 + $0x588] sm:$0xff]  ;;  %v2172_v46 = vld [vmem:[#allocation8 + $0x560] sm:$0xff]  ;;  %v2138_v40 = vld [vmem:[#allocation8 + $0x450] sm:$0xff] }
 0x2c5   :  { %2227 = vmatpush.msrb.mxu3 %v2178_v6  ;;  %2256 = vmatpush.msra.mxu0 %v2147_v24  ;;  %v2141_v5 = vld [vmem:[#allocation8 + $0x468] sm:$0xff]  ;;  %v2170_v32 = vld [vmem:[#allocation8 + $0x550] sm:$0xff]  ;;  %v2135_v0 = vld [vmem:[#allocation8 + $0x438] sm:$0xff] }
 0x2c6   :  { %2285 = vmatpush.msra.mxu1 %v2179_v27  ;;  %2199 = vmatpush.msrb.mxu2 %v2144_v51  ;;  %v2167_v44 = vld [vmem:[#allocation8 + $0x538] sm:$0xff]  ;;  %v2132_v56 = vld [vmem:[#allocation8 + $0x420] sm:$0xff]  ;;  %v2133_v6 = vld [vmem:[#allocation8 + $0x428] sm:$0xff] }
 0x2c7   :  { %2228 = vmatpush.msrb.mxu3 %v2176_v63  ;;  %2257 = vmatpush.msra.mxu0 %v2145_v50  ;;  %v2164_v10 = vld [vmem:[#allocation8 + $0x520] sm:$0xff]  ;;  %v2162_v24 = vld [vmem:[#allocation8 + $0x510] sm:$0xff]  ;;  %v2131_v27 = vld [vmem:[#allocation8 + $0x418] sm:$0xff] }
 0x2c8   :  { %2286 = vmatpush.msra.mxu1 %v2177_v33  ;;  %2200 = vmatpush.msrb.mxu2 %v2142_v55  ;;  %v2163_v51 = vld [vmem:[#allocation8 + $0x518] sm:$0xff]  ;;  %v2128_v63 = vld [vmem:[#allocation8 + $0x400] sm:$0xff]  ;;  %v2363_v33 = vld [vmem:[#allocation8 + $0x6f0] sm:$0xff] }
 0x2c9   :  { %1904 = vmatmul.f32.gmra.mxu2 %v1812_v26  ;;  %1933 = vmatmul.f32.gmra.mxu3 %v1813_v22  ;;  %v2160_v50 = vld [vmem:[#allocation8 + $0x500] sm:$0xff]  ;;  %v2395_v55 = vld [vmem:[#allocation8 + $0x7f0] sm:$0xff] }
 0x2ca   :  { %1962 = vmatmul.f32.gmra.mxu0 %v1812_v26  ;;  %1991 = vmatmul.f32.gmra.mxu1 %v1813_v22  ;;  %v2129_v26 = vld [vmem:[#allocation8 + $0x408] sm:$0xff] }
 0x2cb   :  { %2229 = vmatpush.msrb.mxu3 %v2174_v57  ;;  %2258 = vmatpush.msra.mxu0 %v2143_v16  ;;  %v2161_v22 = vld [vmem:[#allocation8 + $0x508] sm:$0xff]  ;;  %v2364_v57 = vld [vmem:[#allocation8 + $0x6f8] sm:$0xff]  ;;  %v2393_v16 = vld [vmem:[#allocation8 + $0x7e0] sm:$0xff] }
 0x2cc   :  { %2287 = vmatpush.msra.mxu1 %v2175_v53  ;;  %2201 = vmatpush.msrb.mxu2 %v2140_v13  ;;  %v2362_v53 = vld [vmem:[#allocation8 + $0x6e8] sm:$0xff] }
 0x2cd   :  { %2230 = vmatpush.msrb.mxu3 %v2172_v46  ;;  %2259 = vmatpush.msra.mxu0 %v2141_v5  ;;  %v2394_v13 = vld [vmem:[#allocation8 + $0x7e8] sm:$0xff]  ;;  %v2359_v46 = vld [vmem:[#allocation8 + $0x6d0] sm:$0xff] }
 0x2ce   :  { %2288 = vmatpush.msra.mxu1 %v2173_v29  ;;  %2202 = vmatpush.msrb.mxu2 %v2138_v40  ;;  %v2391_v5 = vld [vmem:[#allocation8 + $0x7d0] sm:$0xff]  ;;  %v2360_v29 = vld [vmem:[#allocation8 + $0x6d8] sm:$0xff] }
 0x2cf   :  { %2231 = vmatpush.msrb.mxu3 %v2170_v32  ;;  %2260 = vmatpush.msra.mxu0 %v2139_v4  ;;  %v2392_v40 = vld [vmem:[#allocation8 + $0x7d8] sm:$0xff]  ;;  %v2357_v32 = vld [vmem:[#allocation8 + $0x6c0] sm:$0xff] }
 0x2d0   :  { %2289 = vmatpush.msra.mxu1 %v2171_v31  ;;  %2203 = vmatpush.msrb.mxu2 %v2136_v36  ;;  %v2389_v4 = vld [vmem:[#allocation8 + $0x7c0] sm:$0xff]  ;;  %v2358_v31 = vld [vmem:[#allocation8 + $0x6c8] sm:$0xff]  ;;  %v2387_v36 = vld [vmem:[#allocation8 + $0x7b0] sm:$0xff] }
 0x2d1   :  { %2011 = vmatmul.f32.vlgmr.msra.gmra.mxu2 %v4724_v21  ;;  %2040 = vmatmul.f32.vlgmr.msra.gmra.mxu3 %v4726_v34 }
 0x2d2   :  { %2069 = vmatmul.f32.vlgmr.msrb.gmra.mxu0 %v4724_v21  ;;  %2098 = vmatmul.f32.vlgmr.msrb.gmra.mxu1 %v4726_v34  ;;  %v2165_v21 = vld [vmem:[#allocation8 + $0x528] sm:$0xff]  ;;  %v2130_v34 = vld [vmem:[#allocation8 + $0x410] sm:$0xff] }
 0x2d3   :  { %2232 = vmatpush.msrb.mxu3 %v2168_v23  ;;  %2261 = vmatpush.msra.mxu0 %v2137_v61  ;;  %v2356_v23 = vld [vmem:[#allocation8 + $0x6b8] sm:$0xff] }
 0x2d4   :  { %2290 = vmatpush.msra.mxu1 %v2169_v11  ;;  %2204 = vmatpush.msrb.mxu2 %v2134_v60  ;;  %v2388_v61 = vld [vmem:[#allocation8 + $0x7b8] sm:$0xff]  ;;  %v2353_v11 = vld [vmem:[#allocation8 + $0x6a0] sm:$0xff] }
 0x2d5   :  { %2233 = vmatpush.msrb.mxu3 %v2166_v2  ;;  %2262 = vmatpush.msra.mxu0 %v2135_v0  ;;  %v2385_v60 = vld [vmem:[#allocation8 + $0x7a0] sm:$0xff]  ;;  %v2354_v2 = vld [vmem:[#allocation8 + $0x6a8] sm:$0xff] }
 0x2d6   :  { %2291 = vmatpush.msra.mxu1 %v2167_v44  ;;  %2205 = vmatpush.msrb.mxu2 %v2132_v56  ;;  %v2386_v0 = vld [vmem:[#allocation8 + $0x7a8] sm:$0xff]  ;;  %v2351_v44 = vld [vmem:[#allocation8 + $0x690] sm:$0xff] }
 0x2d7   :  { %2234 = vmatpush.msrb.mxu3 %v2164_v10  ;;  %2263 = vmatpush.msra.mxu0 %v2133_v6  ;;  %v2383_v56 = vld [vmem:[#allocation8 + $0x790] sm:$0xff]  ;;  %v2352_v10 = vld [vmem:[#allocation8 + $0x698] sm:$0xff]  ;;  %v2381_v6 = vld [vmem:[#allocation8 + $0x780] sm:$0xff] }
 0x2d8   :  { %2292 = vmatpush.msra.mxu1 %v2165_v21  ;;  %2206 = vmatpush.msrb.mxu2 %v2130_v34  ;;  %v2350_v21 = vld [vmem:[#allocation8 + $0x688] sm:$0xff] }
 0x2d9   :  { %2014 = vmatmul.f32.gmra.mxu2 %v4732_v58  ;;  %2043 = vmatmul.f32.gmra.mxu3 %v4734_v62  ;;  %v2382_v34 = vld [vmem:[#allocation8 + $0x788] sm:$0xff] }
 0x2da   :  { %2072 = vmatmul.f32.gmra.mxu0 %v4732_v58  ;;  %2101 = vmatmul.f32.gmra.mxu1 %v4734_v62  ;;  %v2396_v58 = vld [vmem:[#allocation8 + $0x7f8] sm:$0xff]  ;;  %v2361_v62 = vld [vmem:[#allocation8 + $0x6e0] sm:$0xff] }
 0x2db   :  { %2235 = vmatpush.msrb.mxu3 %v2162_v24  ;;  %2264 = vmatpush.msra.mxu0 %v2131_v27  ;;  %v2347_v24 = vld [vmem:[#allocation8 + $0x670] sm:$0xff] }
 0x2dc   :  { %2293 = vmatpush.msra.mxu1 %v2163_v51  ;;  %2207 = vmatpush.msrb.mxu2 %v2128_v63  ;;  %v2379_v27 = vld [vmem:[#allocation8 + $0x770] sm:$0xff]  ;;  %v2348_v51 = vld [vmem:[#allocation8 + $0x678] sm:$0xff] }
 0x2dd   :  { %2236 = vmatpush.msrb.mxu3 %v2160_v50  ;;  %2265 = vmatpush.msra.mxu0 %v2129_v26  ;;  %v2380_v63 = vld [vmem:[#allocation8 + $0x778] sm:$0xff]  ;;  %v2345_v50 = vld [vmem:[#allocation8 + $0x660] sm:$0xff] }
 0x2de   :  { %2294 = vmatpush.msra.mxu1 %v2161_v22  ;;  %2397 = vmatpush.msra.mxu2 %v2363_v33  ;;  %v2377_v26 = vld [vmem:[#allocation8 + $0x760] sm:$0xff]  ;;  %v2346_v22 = vld [vmem:[#allocation8 + $0x668] sm:$0xff]  ;;  %v2375_v33 = vld [vmem:[#allocation8 + $0x750] sm:$0xff] }
 0x2df   :  { %2426 = vmatpush.msra.mxu3 %v2395_v55  ;;  %2455 = vmatpush.msrb.mxu0 %v2364_v57  ;;  %v2344_v55 = vld [vmem:[#allocation8 + $0x658] sm:$0xff] }
 0x2e0   :  { %2484 = vmatpush.msrb.mxu1 %v2396_v58  ;;  %2398 = vmatpush.msra.mxu2 %v2361_v62  ;;  %v2376_v57 = vld [vmem:[#allocation8 + $0x758] sm:$0xff]  ;;  %v2341_v58 = vld [vmem:[#allocation8 + $0x640] sm:$0xff] }
 0x2e1   :  { %2017 = vmatmul.f32.gmra.mxu2 %v4812_v47  ;;  %2046 = vmatmul.f32.gmra.mxu3 %v4814_v48  ;;  %v2373_v62 = vld [vmem:[#allocation8 + $0x740] sm:$0xff] }
 0x2e2   :  { %2075 = vmatmul.f32.gmra.mxu0 %v4812_v47  ;;  %2104 = vmatmul.f32.gmra.mxu1 %v4814_v48  ;;  %v2390_v47 = vld [vmem:[#allocation8 + $0x7c8] sm:$0xff]  ;;  %v2355_v48 = vld [vmem:[#allocation8 + $0x6b0] sm:$0xff] }
 0x2e3   :  { %2427 = vmatpush.msra.mxu3 %v2393_v16  ;;  %2456 = vmatpush.msrb.mxu0 %v2362_v53  ;;  %v2342_v16 = vld [vmem:[#allocation8 + $0x648] sm:$0xff] }
 0x2e4   :  { %2485 = vmatpush.msrb.mxu1 %v2394_v13  ;;  %2399 = vmatpush.msra.mxu2 %v2359_v46  ;;  %v2374_v53 = vld [vmem:[#allocation8 + $0x748] sm:$0xff]  ;;  %v2339_v13 = vld [vmem:[#allocation8 + $0x630] sm:$0xff] }
 0x2e5   :  { %2428 = vmatpush.msra.mxu3 %v2391_v5  ;;  %2457 = vmatpush.msrb.mxu0 %v2360_v29  ;;  %v2371_v46 = vld [vmem:[#allocation8 + $0x730] sm:$0xff]  ;;  %v2340_v5 = vld [vmem:[#allocation8 + $0x638] sm:$0xff]  ;;  %v2369_v29 = vld [vmem:[#allocation8 + $0x720] sm:$0xff] }
 0x2e6   :  { %2486 = vmatpush.msrb.mxu1 %v2392_v40  ;;  %2400 = vmatpush.msra.mxu2 %v2357_v32  ;;  %v2338_v40 = vld [vmem:[#allocation8 + $0x628] sm:$0xff] }
 0x2e7   :  { %2429 = vmatpush.msra.mxu3 %v2389_v4  ;;  %2458 = vmatpush.msrb.mxu0 %v2358_v31  ;;  %v2370_v32 = vld [vmem:[#allocation8 + $0x728] sm:$0xff]  ;;  %v2335_v4 = vld [vmem:[#allocation8 + $0x610] sm:$0xff] }
 0x2e8   :  { %2487 = vmatpush.msrb.mxu1 %v2390_v47  ;;  %2401 = vmatpush.msra.mxu2 %v2355_v48  ;;  %v2367_v31 = vld [vmem:[#allocation8 + $0x710] sm:$0xff]  ;;  %v2336_v47 = vld [vmem:[#allocation8 + $0x618] sm:$0xff] }
 0x2e9   :  { %2020 = vmatmul.f32.gmra.mxu2 %v4882_v12  ;;  %2049 = vmatmul.f32.gmra.mxu3 %v4884_v41  ;;  %v2368_v48 = vld [vmem:[#allocation8 + $0x718] sm:$0xff] }
 0x2ea   :  { %2078 = vmatmul.f32.gmra.mxu0 %v4882_v12  ;;  %2107 = vmatmul.f32.gmra.mxu1 %v4884_v41  ;;  %v2384_v12 = vld [vmem:[#allocation8 + $0x798] sm:$0xff]  ;;  %v2349_v41 = vld [vmem:[#allocation8 + $0x680] sm:$0xff] }
 0x2eb   :  { %2430 = vmatpush.msra.mxu3 %v2387_v36  ;;  %2459 = vmatpush.msrb.mxu0 %v2356_v23  ;;  %v2333_v36 = vld [vmem:[#allocation8 + $0x600] sm:$0xff] }
 0x2ec   :  { %2488 = vmatpush.msrb.mxu1 %v2388_v61  ;;  %2402 = vmatpush.msra.mxu2 %v2353_v11  ;;  %v2365_v23 = vld [vmem:[#allocation8 + $0x700] sm:$0xff]  ;;  %v2334_v61 = vld [vmem:[#allocation8 + $0x608] sm:$0xff]  ;;  %v2600_v11 = vld [vmem:[#allocation8 + $0x9f0] sm:$0xff] }
 0x2ed   :  { %2431 = vmatpush.msra.mxu3 %v2385_v60  ;;  %2460 = vmatpush.msrb.mxu0 %v2354_v2  ;;  %v2569_v60 = vld [vmem:[#allocation8 + $0x8f8] sm:$0xff] }
 0x2ee   :  { %2489 = vmatpush.msrb.mxu1 %v2386_v0  ;;  %2403 = vmatpush.msra.mxu2 %v2351_v44  ;;  %v2601_v2 = vld [vmem:[#allocation8 + $0x9f8] sm:$0xff]  ;;  %v2566_v0 = vld [vmem:[#allocation8 + $0x8e0] sm:$0xff] }
 0x2ef   :  { %2432 = vmatpush.msra.mxu3 %v2383_v56  ;;  %2461 = vmatpush.msrb.mxu0 %v2352_v10  ;;  %v2598_v44 = vld [vmem:[#allocation8 + $0x9e0] sm:$0xff]  ;;  %v2567_v56 = vld [vmem:[#allocation8 + $0x8e8] sm:$0xff] }
 0x2f0   :  { %2490 = vmatpush.msrb.mxu1 %v2384_v12  ;;  %2404 = vmatpush.msra.mxu2 %v2349_v41  ;;  %v2599_v10 = vld [vmem:[#allocation8 + $0x9e8] sm:$0xff]  ;;  %v2564_v12 = vld [vmem:[#allocation8 + $0x8d0] sm:$0xff] }
 0x2f1   :  { %2208 = vmatmul.f32.vlgmr.msrb.gmra.mxu2 %v4766_v8  ;;  %2237 = vmatmul.f32.vlgmr.msrb.gmra.mxu3 %v4775_v49  ;;  %v2596_v41 = vld [vmem:[#allocation8 + $0x9d0] sm:$0xff] }
 0x2f2   :  { %2266 = vmatmul.f32.vlgmr.msra.gmra.mxu0 %v4766_v8  ;;  %2295 = vmatmul.f32.vlgmr.msra.gmra.mxu1 %v4775_v49  ;;  %v2378_v8 = vld [vmem:[#allocation8 + $0x768] sm:$0xff]  ;;  %v2343_v49 = vld [vmem:[#allocation8 + $0x650] sm:$0xff] }
 0x2f3   :  { %2433 = vmatpush.msra.mxu3 %v2381_v6  ;;  %2462 = vmatpush.msrb.mxu0 %v2350_v21  ;;  %v2565_v6 = vld [vmem:[#allocation8 + $0x8d8] sm:$0xff]  ;;  %v2594_v21 = vld [vmem:[#allocation8 + $0x9c0] sm:$0xff] }
 0x2f4   :  { %2491 = vmatpush.msrb.mxu1 %v2382_v34  ;;  %2405 = vmatpush.msra.mxu2 %v2347_v24  ;;  %v2563_v34 = vld [vmem:[#allocation8 + $0x8c8] sm:$0xff] }
 0x2f5   :  { %2434 = vmatpush.msra.mxu3 %v2379_v27  ;;  %2463 = vmatpush.msrb.mxu0 %v2348_v51  ;;  %v2595_v24 = vld [vmem:[#allocation8 + $0x9c8] sm:$0xff]  ;;  %v2560_v27 = vld [vmem:[#allocation8 + $0x8b0] sm:$0xff] }
 0x2f6   :  { %2492 = vmatpush.msrb.mxu1 %v2380_v63  ;;  %2406 = vmatpush.msra.mxu2 %v2345_v50  ;;  %v2592_v51 = vld [vmem:[#allocation8 + $0x9b0] sm:$0xff]  ;;  %v2561_v63 = vld [vmem:[#allocation8 + $0x8b8] sm:$0xff] }
 0x2f7   :  { %2435 = vmatpush.msra.mxu3 %v2377_v26  ;;  %2464 = vmatpush.msrb.mxu0 %v2346_v22  ;;  %v2593_v50 = vld [vmem:[#allocation8 + $0x9b8] sm:$0xff]  ;;  %v2558_v26 = vld [vmem:[#allocation8 + $0x8a0] sm:$0xff] }
 0x2f8   :  { %2493 = vmatpush.msrb.mxu1 %v2378_v8  ;;  %2407 = vmatpush.msra.mxu2 %v2343_v49  ;;  %v2590_v22 = vld [vmem:[#allocation8 + $0x9a0] sm:$0xff]  ;;  %v2559_v8 = vld [vmem:[#allocation8 + $0x8a8] sm:$0xff]  ;;  %v2588_v49 = vld [vmem:[#allocation8 + $0x990] sm:$0xff] }
 0x2f9   :  { %2211 = vmatmul.f32.gmra.mxu2 %v4837_v18  ;;  %2240 = vmatmul.f32.gmra.mxu3 %v4846_v59 }
 0x2fa   :  { %2269 = vmatmul.f32.gmra.mxu0 %v4837_v18  ;;  %2298 = vmatmul.f32.gmra.mxu1 %v4846_v59  ;;  %v2372_v18 = vld [vmem:[#allocation8 + $0x738] sm:$0xff]  ;;  %v2337_v59 = vld [vmem:[#allocation8 + $0x620] sm:$0xff] }
 0x2fb   :  { %2436 = vmatpush.msra.mxu3 %v2375_v33  ;;  %2465 = vmatpush.msrb.mxu0 %v2344_v55  ;;  %v2557_v33 = vld [vmem:[#allocation8 + $0x898] sm:$0xff] }
 0x2fc   :  { %2494 = vmatpush.msrb.mxu1 %v2376_v57  ;;  %2408 = vmatpush.msra.mxu2 %v2341_v58  ;;  %v2589_v55 = vld [vmem:[#allocation8 + $0x998] sm:$0xff]  ;;  %v2554_v57 = vld [vmem:[#allocation8 + $0x880] sm:$0xff] }
 0x2fd   :  { %2437 = vmatpush.msra.mxu3 %v2373_v62  ;;  %2466 = vmatpush.msrb.mxu0 %v2342_v16  ;;  %v2586_v58 = vld [vmem:[#allocation8 + $0x980] sm:$0xff]  ;;  %v2555_v62 = vld [vmem:[#allocation8 + $0x888] sm:$0xff] }
 0x2fe   :  { %2495 = vmatpush.msrb.mxu1 %v2374_v53  ;;  %2409 = vmatpush.msra.mxu2 %v2339_v13  ;;  %v2587_v16 = vld [vmem:[#allocation8 + $0x988] sm:$0xff]  ;;  %v2552_v53 = vld [vmem:[#allocation8 + $0x870] sm:$0xff] }
 0x2ff   :  { %2438 = vmatpush.msra.mxu3 %v2371_v46  ;;  %2467 = vmatpush.msrb.mxu0 %v2340_v5  ;;  %v2584_v13 = vld [vmem:[#allocation8 + $0x970] sm:$0xff]  ;;  %v2553_v46 = vld [vmem:[#allocation8 + $0x878] sm:$0xff]  ;;  %v2582_v5 = vld [vmem:[#allocation8 + $0x960] sm:$0xff] }
 0x300   :  { %2496 = vmatpush.msrb.mxu1 %v2372_v18  ;;  %2410 = vmatpush.msra.mxu2 %v2337_v59  ;;  %v2551_v18 = vld [vmem:[#allocation8 + $0x868] sm:$0xff] }
 0x301   :  { %2214 = vmatmul.f32.gmra.mxu2 %v4901_v1  ;;  %2243 = vmatmul.f32.gmra.mxu3 %v4907_v3  ;;  %v2583_v59 = vld [vmem:[#allocation8 + $0x968] sm:$0xff] }
 0x302   :  { %2272 = vmatmul.f32.gmra.mxu0 %v4901_v1  ;;  %2301 = vmatmul.f32.gmra.mxu1 %v4907_v3  ;;  %v2366_v1 = vld [vmem:[#allocation8 + $0x708] sm:$0xff]  ;;  %v2568_v3 = vld [vmem:[#allocation8 + $0x8f0] sm:$0xff] }
 0x303   :  { %2439 = vmatpush.msra.mxu3 %v2369_v29  ;;  %2468 = vmatpush.msrb.mxu0 %v2338_v40  ;;  %v2548_v29 = vld [vmem:[#allocation8 + $0x850] sm:$0xff] }
 0x304   :  { %2497 = vmatpush.msrb.mxu1 %v2370_v32  ;;  %2411 = vmatpush.msra.mxu2 %v2335_v4  ;;  %v2580_v40 = vld [vmem:[#allocation8 + $0x950] sm:$0xff]  ;;  %v2549_v32 = vld [vmem:[#allocation8 + $0x858] sm:$0xff] }
 0x305   :  { %2440 = vmatpush.msra.mxu3 %v2367_v31  ;;  %2469 = vmatpush.msrb.mxu0 %v2336_v47  ;;  %v2581_v4 = vld [vmem:[#allocation8 + $0x958] sm:$0xff]  ;;  %v2546_v31 = vld [vmem:[#allocation8 + $0x840] sm:$0xff] }
 0x306   :  { %2498 = vmatpush.msrb.mxu1 %v2368_v48  ;;  %2412 = vmatpush.msra.mxu2 %v2333_v36  ;;  %v2578_v47 = vld [vmem:[#allocation8 + $0x940] sm:$0xff]  ;;  %v2547_v48 = vld [vmem:[#allocation8 + $0x848] sm:$0xff] }
 0x307   :  { %2441 = vmatpush.msra.mxu3 %v2365_v23  ;;  %2470 = vmatpush.msrb.mxu0 %v2334_v61  ;;  %v2579_v36 = vld [vmem:[#allocation8 + $0x948] sm:$0xff]  ;;  %v2545_v23 = vld [vmem:[#allocation8 + $0x838] sm:$0xff] }
 0x308   :  { %2499 = vmatpush.msrb.mxu1 %v2366_v1  ;;  %2602 = vmatpush.msrb.mxu2 %v2568_v3  ;;  %v2577_v61 = vld [vmem:[#allocation8 + $0x938] sm:$0xff]  ;;  %v2542_v1 = vld [vmem:[#allocation8 + $0x820] sm:$0xff] }
 0x309   :  { %2217 = vmatmul.f32.gmra.mxu2 %v4913_v15  ;;  %2246 = vmatmul.f32.gmra.mxu3 %v4920_v20  ;;  %v2574_v3 = vld [vmem:[#allocation8 + $0x920] sm:$0xff] }
 0x30a   :  { %2275 = vmatmul.f32.gmra.mxu0 %v4913_v15  ;;  %2304 = vmatmul.f32.gmra.mxu1 %v4920_v20  ;;  %v2597_v15 = vld [vmem:[#allocation8 + $0x9d8] sm:$0xff]  ;;  %v2562_v20 = vld [vmem:[#allocation8 + $0x8c0] sm:$0xff] }
 0x30b   :  { %2631 = vmatpush.msrb.mxu3 %v2600_v11  ;;  %2660 = vmatpush.msra.mxu0 %v2569_v60  ;;  %v2543_v11 = vld [vmem:[#allocation8 + $0x828] sm:$0xff] }
 0x30c   :  { %2689 = vmatpush.msra.mxu1 %v2601_v2  ;;  %2603 = vmatpush.msrb.mxu2 %v2566_v0  ;;  %v2575_v60 = vld [vmem:[#allocation8 + $0x928] sm:$0xff]  ;;  %v2540_v2 = vld [vmem:[#allocation8 + $0x810] sm:$0xff] }
 0x30d   :  { %2632 = vmatpush.msrb.mxu3 %v2598_v44  ;;  %2661 = vmatpush.msra.mxu0 %v2567_v56  ;;  %v2572_v0 = vld [vmem:[#allocation8 + $0x910] sm:$0xff]  ;;  %v2541_v44 = vld [vmem:[#allocation8 + $0x818] sm:$0xff] }
 0x30e   :  { %2690 = vmatpush.msra.mxu1 %v2599_v10  ;;  %2604 = vmatpush.msrb.mxu2 %v2564_v12  ;;  %v2573_v56 = vld [vmem:[#allocation8 + $0x918] sm:$0xff]  ;;  %v2538_v10 = vld [vmem:[#allocation8 + $0x800] sm:$0xff] }
 0x30f   :  { %2633 = vmatpush.msrb.mxu3 %v2596_v41  ;;  %2662 = vmatpush.msra.mxu0 %v2565_v6  ;;  %v2539_v41 = vld [vmem:[#allocation8 + $0x808] sm:$0xff] }
 0x310   :  { %2691 = vmatpush.msra.mxu1 %v2597_v15  ;;  %2605 = vmatpush.msrb.mxu2 %v2562_v20  ;;  %v2571_v15 = vld [vmem:[#allocation8 + $0x908] sm:$0xff] }
 0x311   :  { %2413 = vmatmul.f32.vlgmr.msra.gmra.mxu2 %v4783_v37  ;;  %2442 = vmatmul.f32.vlgmr.msra.gmra.mxu3 %v4791_v39 }
 0x312   :  { %2471 = vmatmul.f32.vlgmr.msrb.gmra.mxu0 %v4783_v37  ;;  %2500 = vmatmul.f32.vlgmr.msrb.gmra.mxu1 %v4791_v39  ;;  %v2591_v37 = vld [vmem:[#allocation8 + $0x9a8] sm:$0xff]  ;;  %v2556_v39 = vld [vmem:[#allocation8 + $0x890] sm:$0xff] }
 0x313   :  { %2634 = vmatpush.msrb.mxu3 %v2594_v21  ;;  %2663 = vmatpush.msra.mxu0 %v2563_v34 }
 0x314   :  { %2692 = vmatpush.msra.mxu1 %v2595_v24  ;;  %2606 = vmatpush.msrb.mxu2 %v2560_v27 }
 0x315   :  { %2635 = vmatpush.msrb.mxu3 %v2592_v51  ;;  %2664 = vmatpush.msra.mxu0 %v2561_v63 }
 0x316   :  { %2693 = vmatpush.msra.mxu1 %v2593_v50  ;;  %2607 = vmatpush.msrb.mxu2 %v2558_v26 }
 0x317   :  { %2636 = vmatpush.msrb.mxu3 %v2590_v22  ;;  %2665 = vmatpush.msra.mxu0 %v2559_v8 }
 0x318   :  { %2694 = vmatpush.msra.mxu1 %v2591_v37  ;;  %2608 = vmatpush.msrb.mxu2 %v2556_v39 }
 0x319   :  { %2416 = vmatmul.f32.gmra.mxu2 %v4854_v7  ;;  %2445 = vmatmul.f32.gmra.mxu3 %v4862_v43 }
 0x31a   :  { %2474 = vmatmul.f32.gmra.mxu0 %v4854_v7  ;;  %2503 = vmatmul.f32.gmra.mxu1 %v4862_v43  ;;  %v2585_v7 = vld [vmem:[#allocation8 + $0x978] sm:$0xff]  ;;  %v2550_v43 = vld [vmem:[#allocation8 + $0x860] sm:$0xff] }
 0x31b   :  { %2637 = vmatpush.msrb.mxu3 %v2588_v49  ;;  %2666 = vmatpush.msra.mxu0 %v2557_v33 }
 0x31c   :  { %2695 = vmatpush.msra.mxu1 %v2589_v55  ;;  %2609 = vmatpush.msrb.mxu2 %v2554_v57 }
 0x31d   :  { %2638 = vmatpush.msrb.mxu3 %v2586_v58  ;;  %2667 = vmatpush.msra.mxu0 %v2555_v62 }
 0x31e   :  { %2696 = vmatpush.msra.mxu1 %v2587_v16  ;;  %2610 = vmatpush.msrb.mxu2 %v2552_v53 }
 0x31f   :  { %2639 = vmatpush.msrb.mxu3 %v2584_v13  ;;  %2668 = vmatpush.msra.mxu0 %v2553_v46 }
 0x320   :  { %2697 = vmatpush.msra.mxu1 %v2585_v7  ;;  %2611 = vmatpush.msrb.mxu2 %v2550_v43 }
 0x321   :  { %2419 = vmatmul.f32.gmra.mxu2 %v4926_v28  ;;  %2448 = vmatmul.f32.gmra.mxu3 %v4932_v45 }
 0x322   :  { %2477 = vmatmul.f32.gmra.mxu0 %v4926_v28  ;;  %2506 = vmatmul.f32.gmra.mxu1 %v4932_v45  ;;  %v2544_v28 = vld [vmem:[#allocation8 + $0x830] sm:$0xff] }
 0x323   :  { %2640 = vmatpush.msrb.mxu3 %v2582_v5  ;;  %2669 = vmatpush.msra.mxu0 %v2551_v18  ;;  %v2576_v45 = vld [vmem:[#allocation8 + $0x930] sm:$0xff] }
 0x324   :  { %2698 = vmatpush.msra.mxu1 %v2583_v59  ;;  %2612 = vmatpush.msrb.mxu2 %v2548_v29 }
 0x325   :  { %2641 = vmatpush.msrb.mxu3 %v2580_v40  ;;  %2670 = vmatpush.msra.mxu0 %v2549_v32 }
 0x326   :  { %2699 = vmatpush.msra.mxu1 %v2581_v4  ;;  %2613 = vmatpush.msrb.mxu2 %v2546_v31 }
 0x327   :  { %2642 = vmatpush.msrb.mxu3 %v2578_v47  ;;  %2671 = vmatpush.msra.mxu0 %v2547_v48 }
 0x328   :  { %2700 = vmatpush.msra.mxu1 %v2579_v36  ;;  %2614 = vmatpush.msrb.mxu2 %v2544_v28 }
 0x329   :  { %2422 = vmatmul.f32.gmra.mxu2 %v4938_v9  ;;  %2451 = vmatmul.f32.gmra.mxu3 %v4944_v14 }
 0x32a   :  { %2480 = vmatmul.f32.gmra.mxu0 %v4938_v9  ;;  %2509 = vmatmul.f32.gmra.mxu1 %v4944_v14  ;;  %v2570_v14 = vld [vmem:[#allocation8 + $0x900] sm:$0xff] }
 0x32b   :  { %2643 = vmatpush.msrb.mxu3 %v2576_v45  ;;  %2672 = vmatpush.msra.mxu0 %v2545_v23 }
 0x32c   :  { %2701 = vmatpush.msra.mxu1 %v2577_v61  ;;  %2615 = vmatpush.msrb.mxu2 %v2542_v1 }
 0x32d   :  { %2644 = vmatpush.msrb.mxu3 %v2574_v3  ;;  %2673 = vmatpush.msra.mxu0 %v2543_v11 }
 0x32e   :  { %2702 = vmatpush.msra.mxu1 %v2575_v60  ;;  %2616 = vmatpush.msrb.mxu2 %v2540_v2 }
 0x32f   :  { %v1954_v9 = vpop.f32.mrf.mxu0  ;;  %v1983_v12 = vpop.f32.mrf.mxu1  ;;  %2645 = vmatpush.msrb.mxu3 %v2572_v0  ;;  %2674 = vmatpush.msra.mxu0 %v2541_v44 }
 0x330   :  { %v1984_v6 = vadd.f32 %v1983_v12, %v1954_v9  ;;  %2703 = vmatpush.msra.mxu1 %v2573_v56  ;;  %2617 = vmatpush.msrb.mxu2 %v2538_v10 }
 0x331   :  { %2646 = vmatpush.msrb.mxu3 %v2570_v14  ;;  %2675 = vmatpush.msra.mxu0 %v2539_v41 }
 0x332   :  { %2704 = vmatpush.msra.mxu1 %v2571_v15  ;;  %2618 = vmatmul.f32.vlgmr.msrb.gmra.mxu2 %v4802_v25 }
 0x333   :  { %2647 = vmatmul.f32.vlgmr.msrb.gmra.mxu3 %v4810_v54  ;;  %2676 = vmatmul.f32.vlgmr.msra.gmra.mxu0 %v4802_v25 }
 0x334   :  { %v1896_v20 = vpop.f32.mrf.mxu2  ;;  %v1925_v21 = vpop.f32.mrf.mxu3  ;;  %2705 = vmatmul.f32.vlgmr.msra.gmra.mxu1 %v4810_v54 }
 0x337   :  { %v1957_v34 = vpop.f32.mrf.mxu0  ;;  %v1986_v24 = vpop.f32.mrf.mxu1 }
 0x338   :  { %v1987_v27 = vadd.f32 %v1986_v24, %v1957_v34 }
 0x33a   :  { %2621 = vmatmul.f32.gmra.mxu2 %v4872_v19 }
 0x33b   :  { %2650 = vmatmul.f32.gmra.mxu3 %v4880_v17  ;;  %2679 = vmatmul.f32.gmra.mxu0 %v4872_v19 }
 0x33c   :  { %v1899_v51 = vpop.f32.mrf.mxu2  ;;  %v1928_v63 = vpop.f32.mrf.mxu3  ;;  %2708 = vmatmul.f32.gmra.mxu1 %v4880_v17 }
 0x33d   :  { %v1929_v50 = vadd.f32 %v1928_v63, %v1899_v51 }
 0x33f   :  { %v1960_v26 = vpop.f32.mrf.mxu0  ;;  %v1989_v25 = vpop.f32.mrf.mxu1 }
 0x340   :  { %v1990_v22 = vadd.f32 %v1989_v25, %v1960_v26 }
 0x342   :  { %2624 = vmatmul.f32.gmra.mxu2 %v4950_v35 }
 0x343   :  { %2653 = vmatmul.f32.gmra.mxu3 %v4956_v30  ;;  %2682 = vmatmul.f32.gmra.mxu0 %v4950_v35 }
 0x344   :  { %v1902_v54 = vpop.f32.mrf.mxu2  ;;  %v1931_v8 = vpop.f32.mrf.mxu3  ;;  %2711 = vmatmul.f32.gmra.mxu1 %v4956_v30  ;;  %v1926_v30 = vadd.f32 %v1925_v21, %v1896_v20 }
 0x345   :  { %v1932_v37 = vadd.f32 %v1931_v8, %v1902_v54 }
 0x347   :  { %v1963_v19 = vpop.f32.mrf.mxu0  ;;  %v1992_v39 = vpop.f32.mrf.mxu1 }
 0x348   :  { %v1993_v49 = vadd.f32 %v1992_v39, %v1963_v19 }
 0x34a   :  { %2627 = vmatmul.f32.gmra.mxu2 %v4962_v42 }
 0x34b   :  { %2656 = vmatmul.f32.gmra.mxu3 %v4968_v52  ;;  %2685 = vmatmul.f32.gmra.mxu0 %v4962_v42 }
 0x34c   :  { %v1905_v17 = vpop.f32.mrf.mxu2  ;;  %v1934_v33 = vpop.f32.mrf.mxu3  ;;  %2714 = vmatmul.f32.gmra.mxu1 %v4968_v52 }
 0x34d   :  { %v1935_v55 = vadd.f32 %v1934_v33, %v1905_v17 }
 0x34f   :  { %v2070_v35 = vpop.f32.mrf.mxu0  ;;  %v2099_v57 = vpop.f32.mrf.mxu1 }
 0x350   :  { %v2071_v58 = vadd.f32 %v2070_v35, %v1984_v6 }
 0x352   :  { %v2100_v62 = vadd.f32 %v2099_v57, %v2071_v58 }
 0x354   :  { %v2012_v16 = vpop.f32.mrf.mxu2  ;;  %v2041_v53 = vpop.f32.mrf.mxu3 }
 0x355   :  { %v2013_v13 = vadd.f32 %v2012_v16, %v1926_v30 }
 0x357   :  { %v2042_v46 = vadd.f32 %v2041_v53, %v2013_v13  ;;  %v2073_v7 = vpop.f32.mrf.mxu0  ;;  %v2102_v43 = vpop.f32.mrf.mxu1 }
 0x358   :  { %v2074_v5 = vadd.f32 %v2073_v7, %v1987_v27 }
 0x35a   :  { %v2103_v18 = vadd.f32 %v2102_v43, %v2074_v5 }
 0x35c   :  { %v2015_v59 = vpop.f32.mrf.mxu2  ;;  %v2044_v42 = vpop.f32.mrf.mxu3 }
 0x35d   :  { %v2016_v29 = vadd.f32 %v2015_v59, %v1929_v50 }
 0x35f   :  { %v2045_v40 = vadd.f32 %v2044_v42, %v2016_v29  ;;  %v2076_v32 = vpop.f32.mrf.mxu0  ;;  %v2105_v52 = vpop.f32.mrf.mxu1 }
 0x360   :  { %v2077_v4 = vadd.f32 %v2076_v32, %v1990_v22 }
 0x362   :  { %v2106_v31 = vadd.f32 %v2105_v52, %v2077_v4 }
 0x364   :  { %v2018_v47 = vpop.f32.mrf.mxu2  ;;  %v2047_v48 = vpop.f32.mrf.mxu3 }
 0x365   :  { %v2019_v36 = vadd.f32 %v2018_v47, %v1932_v37 }
 0x367   :  { %v2048_v28 = vadd.f32 %v2047_v48, %v2019_v36  ;;  %v2079_v45 = vpop.f32.mrf.mxu0  ;;  %v2108_v23 = vpop.f32.mrf.mxu1 }
 0x368   :  { %v2080_v61 = vadd.f32 %v2079_v45, %v1993_v49 }
 0x36a   :  { %v5042_v1 = vadd.f32 %v2108_v23, %v2080_v61 }
 0x36c   :  { %v2021_v3 = vpop.f32.mrf.mxu2  ;;  %v2050_v11 = vpop.f32.mrf.mxu3 }
 0x36d   :  { %v2022_v60 = vadd.f32 %v2021_v3, %v1935_v55 }
 0x36f   :  { %v5044_v2 = vadd.f32 %v2050_v11, %v2022_v60  ;;  %v2267_v0 = vpop.f32.mrf.mxu0  ;;  %v2296_v44 = vpop.f32.mrf.mxu1 }
 0x370   :  { %v2297_v56 = vadd.f32 %v2296_v44, %v2267_v0 }
 0x372   :  { %v2309_v10 = vadd.f32 %v2297_v56, %v2100_v62 }
 0x374   :  { %v2209_v9 = vpop.f32.mrf.mxu2  ;;  %v2238_v12 = vpop.f32.mrf.mxu3 }
 0x375   :  { %v2239_v14 = vadd.f32 %v2238_v12, %v2209_v9 }
 0x377   :  { %v2308_v41 = vadd.f32 %v2239_v14, %v2042_v46  ;;  %v2270_v6 = vpop.f32.mrf.mxu0  ;;  %v2299_v15 = vpop.f32.mrf.mxu1 }
 0x378   :  { %v2300_v20 = vadd.f32 %v2299_v15, %v2270_v6 }
 0x37a   :  { %v2311_v21 = vadd.f32 %v2300_v20, %v2103_v18 }
 0x37c   :  { %v2212_v34 = vpop.f32.mrf.mxu2  ;;  %v2241_v24 = vpop.f32.mrf.mxu3 }
 0x37d   :  { %v2242_v27 = vadd.f32 %v2241_v24, %v2212_v34 }
 0x37f   :  { %v2310_v51 = vadd.f32 %v2242_v27, %v2045_v40  ;;  %v2273_v63 = vpop.f32.mrf.mxu0  ;;  %v2302_v50 = vpop.f32.mrf.mxu1 }
 0x380   :  { %v2303_v26 = vadd.f32 %v2302_v50, %v2273_v63 }
 0x382   :  { %v2313_v25 = vadd.f32 %v2303_v26, %v2106_v31 }
 0x384   :  { %v2215_v22 = vpop.f32.mrf.mxu2  ;;  %v2244_v54 = vpop.f32.mrf.mxu3 }
 0x385   :  { %v2245_v8 = vadd.f32 %v2244_v54, %v2215_v22 }
 0x387   :  { %v2312_v37 = vadd.f32 %v2245_v8, %v2048_v28  ;;  %v2276_v19 = vpop.f32.mrf.mxu0  ;;  %v2305_v39 = vpop.f32.mrf.mxu1 }
 0x38c   :  { %v2218_v49 = vpop.f32.mrf.mxu2  ;;  %v2247_v17 = vpop.f32.mrf.mxu3 }
 0x38f   :  { %v2472_v33 = vpop.f32.mrf.mxu0  ;;  %v2501_v55 = vpop.f32.mrf.mxu1 }
 0x390   :  { %v2502_v40 = vadd.f32 %v2501_v55, %v2472_v33  ;;  %v2306_v55 = vadd.f32 %v2305_v39, %v2276_v19 }
 0x392   :  { %v2514_v47 = vadd.f32 %v2502_v40, %v2309_v10 }
 0x394   :  { %v2414_v35 = vpop.f32.mrf.mxu2  ;;  %v2443_v57 = vpop.f32.mrf.mxu3 }
 0x395   :  { %v2444_v32 = vadd.f32 %v2443_v57, %v2414_v35  ;;  %v2248_v35 = vadd.f32 %v2247_v17, %v2218_v49 }
 0x397   :  { %v2475_v58 = vpop.f32.mrf.mxu0  ;;  %v2504_v62 = vpop.f32.mrf.mxu1  ;;  %v2513_v48 = vadd.f32 %v2444_v32, %v2308_v41 }
 0x398   :  { %v2505_v3 = vadd.f32 %v2504_v62, %v2475_v58 }
 0x39a   :  { %v2516_v9 = vadd.f32 %v2505_v3, %v2311_v21  ;;  %v2971_v3 = vld [vmem:[#allocation13 + $0x1c8] sm:$0xff] }
 0x39c   :  { %v2417_v30 = vpop.f32.mrf.mxu2  ;;  %v2446_v16 = vpop.f32.mrf.mxu3 }
 0x39d   :  { %v2447_v11 = vadd.f32 %v2446_v16, %v2417_v30 }
 0x39f   :  { %v2478_v53 = vpop.f32.mrf.mxu0  ;;  %v2507_v13 = vpop.f32.mrf.mxu1  ;;  %v2515_v12 = vadd.f32 %v2447_v11, %v2310_v51  ;;  %v2970_v11 = vld [vmem:[#allocation13 + $0x1c0] sm:$0xff] }
 0x3a0   :  { %v2508_v10 = vadd.f32 %v2507_v13, %v2478_v53 }
 0x3a2   :  { %v2518_v54 = vadd.f32 %v2508_v10, %v2313_v25  ;;  %v2314_v25 = vadd.f32 %v2248_v35, %v5044_v2  ;;  %v2786_v10 = vld [vmem:[#allocation13 + $0x70] sm:$0xff]  ;;  %v2910_v35 = vld [vmem:[#allocation13 + $0x160] sm:$0xff] }
 0x3a4   :  { %v2420_v46 = vpop.f32.mrf.mxu2  ;;  %v2449_v7 = vpop.f32.mrf.mxu3 }
 0x3a5   :  { %v2450_v41 = vadd.f32 %v2449_v7, %v2420_v46  ;;  %v2315_v46 = vadd.f32 %v2306_v55, %v5042_v1  ;;  %v2781_v55 = vld [vmem:[#allocation13 + $0x48] sm:$0xff] }
 0x3a7   :  { %v2481_v43 = vpop.f32.mrf.mxu0  ;;  %v2510_v5 = vpop.f32.mrf.mxu1  ;;  %v2517_v8 = vadd.f32 %v2450_v41, %v2312_v37  ;;  %v2828_v41 = vld [vmem:[#allocation13 + $0xe8] sm:$0xff] }
 0x3a8   :  { %v2511_v16 = vadd.f32 %v2510_v5, %v2481_v43 }
 0x3aa   :  { %v2520_v40 = vadd.f32 %v2511_v16, %v2315_v46  ;;  %v2779_v16 = vld [vmem:[#allocation13 + $0x38] sm:$0xff]  ;;  %v2778_v46 = vld [vmem:[#allocation13 + $0x30] sm:$0xff] }
 0x3ac   :  { %v2423_v18 = vpop.f32.mrf.mxu2  ;;  %v2452_v59 = vpop.f32.mrf.mxu3 }
 0x3ad   :  { %v2453_v53 = vadd.f32 %v2452_v59, %v2423_v18 }
 0x3af   :  { %v2519_v32 = vadd.f32 %v2453_v53, %v2314_v25  ;;  %v2908_v53 = vld [vmem:[#allocation13 + $0x150] sm:$0xff]  ;;  %v2907_v25 = vld [vmem:[#allocation13 + $0x148] sm:$0xff] }
 0x3b0   :  { %v2677_v42 = vpop.f32.mrf.mxu0 }
 0x3b1   :  { %v2706_v29 = vpop.f32.mrf.mxu1 }
 0x3b2   :  { %v2707_v52 = vadd.f32 %v2706_v29, %v2677_v42 }
 0x3b4   :  { %v2719_v45 = vadd.f32 %v2707_v52, %v2514_v47  ;;  %v2977_v47 = vld [vmem:[#allocation13 + $0x1f8] sm:$0xff] }
 0x3b5   :  { %v2619_v4 = vpop.f32.mrf.mxu2 }
 0x3b6   :  { %v2648_v31 = vpop.f32.mrf.mxu3 }
 0x3b7   :  { %v2649_v36 = vadd.f32 %v2648_v31, %v2619_v4  ;;  %v2742_v4 = vld [vmem:[#allocation11] sm:$0x3]  ;;  %v2789_v31 = vld [vmem:[#allocation11 + $0x2] sm:$0x3] }
 0x3b8   :  { %v2680_v28 = vpop.f32.mrf.mxu0 }
 0x3b9   :  { %v2718_v23 = vadd.f32 %v2649_v36, %v2513_v48  ;;  %v2709_v61 = vpop.f32.mrf.mxu1  ;;  %v2936_v48 = vld [vmem:[#allocation11 + $0x6] sm:$0x3]  ;;  %v2976_v36 = vld [vmem:[#allocation13 + $0x1f0] sm:$0xff] }
 0x3ba   :  { %v2710_v0 = vadd.f32 %v2709_v61, %v2680_v28  ;;  %v2975_v28 = vld [vmem:[#allocation13 + $0x1e8] sm:$0xff]  ;;  %v2972_v61 = vld [vmem:[#allocation13 + $0x1d0] sm:$0xff] }
 0x3bb   :  { %v2726_v60 = vmax.f32 %v2718_v23, %v2719_v45  ;;  %v2974_v45 = vld [vmem:[#allocation13 + $0x1e0] sm:$0xff]  ;;  %v2973_v23 = vld [vmem:[#allocation13 + $0x1d8] sm:$0xff] }
 0x3bc   :  { %v2721_v15 = vadd.f32 %v2710_v0, %v2516_v9  ;;  %v2968_v0 = vld [vmem:[#allocation13 + $0x1b0] sm:$0xff]  ;;  %v2965_v9 = vld [vmem:[#allocation13 + $0x198] sm:$0xff] }
 0x3bd   :  { %v2622_v44 = vpop.f32.mrf.mxu2  ;;  %v2730_v27 = vrot.slane %v2726_v60, 1 }
 0x3be   :  { %v2651_v56 = vpop.f32.mrf.mxu3 }
 0x3bf   :  { %v2652_v14 = vadd.f32 %v2651_v56, %v2622_v44  ;;  %v2967_v44 = vld [vmem:[#allocation13 + $0x1a8] sm:$0xff]  ;;  %v2966_v56 = vld [vmem:[#allocation13 + $0x1a0] sm:$0xff] }
 0x3c0   :  { %v2683_v6 = vpop.f32.mrf.mxu0 }
 0x3c1   :  { %v2720_v20 = vadd.f32 %v2652_v14, %v2515_v12  ;;  %v2712_v34 = vpop.f32.mrf.mxu1  ;;  %v2964_v12 = vld [vmem:[#allocation13 + $0x190] sm:$0xff]  ;;  %v2963_v14 = vld [vmem:[#allocation13 + $0x188] sm:$0xff] }
 0x3c2   :  { %v2713_v50 = vadd.f32 %v2712_v34, %v2683_v6  ;;  %v2962_v6 = vld [vmem:[#allocation13 + $0x180] sm:$0xff]  ;;  %v2829_v34 = vld [vmem:[#allocation13 + $0xf0] sm:$0xff] }
 0x3c3   :  { %v2727_v24 = vmax.f32 %v2720_v20, %v2721_v15  ;;  %v2830_v15 = vld [vmem:[#allocation13 + $0xf8] sm:$0xff] }
 0x3c4   :  { %v2723_v57 = vadd.f32 %v2713_v50, %v2518_v54  ;;  %v2787_v20 = vld [vmem:[#allocation13 + $0x78] sm:$0xff]  ;;  %2831 = vmatpush.msrb.mxu0 %v2830_v15  ;;  %v2912_v54 = vld [vmem:[#allocation13 + $0x170] sm:$0xff]  ;;  %v3034_v15 = vld [vmem:[#allocation13 + $0x240] sm:$0xff] }
 0x3c5   :  { %v2731_v63 = vrot.slane %v2727_v24, 1  ;;  %v2625_v26 = vpop.f32.mrf.mxu2  ;;  %2851 = vmatpush.msrb.mxu1 %v2787_v20  ;;  %v2913_v50 = vld [vmem:[#allocation13 + $0x178] sm:$0xff] }
 0x3c6   :  { %v2654_v22 = vpop.f32.mrf.mxu3  ;;  %2832 = vmatpush.msrb.mxu0 %v2829_v34  ;;  %v3033_v34 = vld [vmem:[#allocation13 + $0x238] sm:$0xff] }
 0x3c7   :  { %v2736_v33 = vsel %vm288_vm0, %v2730_v27, %v2731_v63  ;;  %v2655_v21 = vadd.f32 %v2654_v22, %v2625_v26  ;;  %2852 = vmatpush.msrb.mxu1 %v2786_v10  ;;  %v2826_v26 = vld [vmem:[#allocation13 + $0xd8] sm:$0xff] }
 0x3c8   :  { %v5048_v51 = vmax.f32 %v2726_v60, %v2736_v33  ;;  %v2686_v62 = vpop.f32.mrf.mxu0  ;;  %v2969_v60 = vld [vmem:[#allocation13 + $0x1b8] sm:$0xff]  ;;  %2833 = vmatpush.msrb.mxu0 %v2828_v41  ;;  %v2782_v33 = vld [vmem:[#allocation13 + $0x50] sm:$0xff] }
 0x3c9   :  { %v2722_v58 = vadd.f32 %v2655_v21, %v2517_v8  ;;  %v2715_v30 = vpop.f32.mrf.mxu1  ;;  %v2783_v22 = vld [vmem:[#allocation13 + $0x58] sm:$0xff]  ;;  %v2825_v8 = vld [vmem:[#allocation13 + $0xd0] sm:$0xff]  ;;  %v2911_v21 = vld [vmem:[#allocation13 + $0x168] sm:$0xff] }
 0x3ca   :  { %v2716_v7 = vadd.f32 %v2715_v30, %v2686_v62  ;;  %v2909_v62 = vld [vmem:[#allocation13 + $0x158] sm:$0xff] }
 0x3cb   :  { %v2728_v13 = vmax.f32 %v2722_v58, %v2723_v57  ;;  %v2823_v57 = vld [vmem:[#allocation13 + $0xc0] sm:$0xff]  ;;  %v2822_v30 = vld [vmem:[#allocation13 + $0xb8] sm:$0xff] }
 0x3cc   :  { %v2725_v17 = vadd.f32 %v2716_v7, %v2520_v40  ;;  %v2780_v58 = vld [vmem:[#allocation13 + $0x40] sm:$0xff]  ;;  %v2777_v7 = vld [vmem:[#allocation13 + $0x28] sm:$0xff] }
 0x3cd   :  { %v2732_v37 = vrot.slane %v2728_v13, 1  ;;  %v2628_v42 = vpop.f32.mrf.mxu2  ;;  %v2776_v40 = vld [vmem:[#allocation13 + $0x20] sm:$0xff] }
 0x3ce   :  { %v2657_v29 = vpop.f32.mrf.mxu3 }
 0x3cf   :  { %v2735_v19 = vsel %vm288_vm0, %v2731_v63, %v2732_v37  ;;  %v2658_v39 = vadd.f32 %v2657_v29, %v2628_v42  ;;  %v2784_v63 = vld [vmem:[#allocation13 + $0x60] sm:$0xff] }
 0x3d0   :  { %v5054_v49 = vmax.f32 %v2727_v24, %v2735_v19  ;;  %v2785_v24 = vld [vmem:[#allocation13 + $0x68] sm:$0xff]  ;;  %v2906_v42 = vld [vmem:[#allocation13 + $0x140] sm:$0xff]  ;;  %v2818_v19 = vld [vmem:[#allocation13 + $0x98] sm:$0xff] }
 0x3d1   :  { %v2724_v43 = vadd.f32 %v2658_v39, %v2519_v32  ;;  %2853 = vmatpush.msrb.mxu1 %v2785_v24  ;;  %v2819_v29 = vld [vmem:[#allocation13 + $0xa0] sm:$0xff]  ;;  %v2905_v32 = vld [vmem:[#allocation13 + $0x138] sm:$0xff] }
 0x3d2   :  { %v2775_v39 = vld [vmem:[#allocation13 + $0x18] sm:$0xff] }
 0x3d3   :  { %v2729_v5 = vmax.f32 %v2724_v43, %v2725_v17  ;;  %2854 = vmatpush.msrb.mxu1 %v2784_v63  ;;  %v2817_v17 = vld [vmem:[#allocation13 + $0x90] sm:$0xff] }
 0x3d4   :  { %v2774_v43 = vld [vmem:[#allocation13 + $0x10] sm:$0xff] }
 0x3d5   :  { %v2733_v18 = vrot.slane %v2729_v5, 1  ;;  %2855 = vmatpush.msrb.mxu1 %v2783_v22  ;;  %v3032_v63 = vld [vmem:[#allocation13 + $0x230] sm:$0xff]  ;;  %v3029_v22 = vld [vmem:[#allocation13 + $0x218] sm:$0xff] }
 0x3d7   :  { %v2734_v1 = vsel %vm288_vm0, %v2732_v37, %v2733_v18  ;;  %v2737_v2 = vsel %vm288_vm0, %v2733_v18, %v2730_v27  ;;  %v2827_v27 = vld [vmem:[#allocation13 + $0xe0] sm:$0xff]  ;;  %2856 = vmatpush.msrb.mxu1 %v2782_v33  ;;  %v2820_v37 = vld [vmem:[#allocation13 + $0xa8] sm:$0xff] }
 0x3d8   :  { %v2741_v59 = vmax.f32 %v2729_v5, %v2737_v2  ;;  %v2740_v52 = vmax.f32 %v2728_v13, %v2734_v1  ;;  %2834 = vmatpush.msrb.mxu0 %v2827_v27  ;;  %v2821_v13 = vld [vmem:[#allocation13 + $0xb0] sm:$0xff]  ;;  %v2903_v5 = vld [vmem:[#allocation13 + $0x128] sm:$0xff]  ;;  %v2902_v2 = vld [vmem:[#allocation13 + $0x120] sm:$0xff] }
 0x3d9   :  { %2857 = vmatpush.msrb.mxu1 %v2781_v55  ;;  %v2816_v18 = vld [vmem:[#allocation13 + $0x88] sm:$0xff]  ;;  %v3000_v27 = vld [vmem:[#allocation11 + $0x8] sm:$0x3]  ;;  %v3026_v33 = vld [vmem:[#allocation13 + $0x200] sm:$0xff] }
 0x3da   :  { %2763 = vmatpush.msra.mxu2 %v2741_v59  ;;  %2805 = vmatpush.msra.mxu3 %v2741_v59  ;;  %v2773_v1 = vld [vmem:[#allocation13 + $0x8] sm:$0xff] }
 0x3db   :  { %2835 = vmatpush.msrb.mxu0 %v2826_v26  ;;  %2858 = vmatpush.msrb.mxu1 %v2780_v58  ;;  %v3030_v26 = vld [vmem:[#allocation13 + $0x220] sm:$0xff]  ;;  %v3082_v55 = vld [vmem:[#allocation16 + $0x68] sm:$0xff]  ;;  %v3079_v58 = vld [vmem:[#allocation16 + $0x50] sm:$0xff] }
 0x3dc   :  { %2764 = vmatpush.msra.mxu2 %v2740_v52  ;;  %2806 = vmatpush.msra.mxu3 %v2740_v52 }
 0x3dd   :  { %2836 = vmatpush.msrb.mxu0 %v2825_v8  ;;  %2859 = vmatpush.msrb.mxu1 %v2779_v16  ;;  %v3027_v8 = vld [vmem:[#allocation13 + $0x208] sm:$0xff]  ;;  %v3076_v16 = vld [vmem:[#allocation16 + $0x38] sm:$0xff] }
 0x3de   :  { %2765 = vmatpush.msra.mxu2 %v5054_v49  ;;  %2807 = vmatpush.msra.mxu3 %v5054_v49 }
 0x3df   :  { %2860 = vmatpush.msrb.mxu1 %v2778_v46 }
 0x3e0   :  { %2766 = vmatpush.msra.mxu2 %v5048_v51  ;;  %2808 = vmatpush.msra.mxu3 %v5048_v51 }
 0x3e1   :  { %3342 = vmatmul.msk.f32.vlgmr.msra.gmra.mxu2 %vm2747_vm6, %v2742_v4  ;;  %3343 = vmatmul.msk.f32.vlgmr.msra.gmra.mxu3 %vm2747_vm6, %v2789_v31  ;;  %v2901_v4 = vld [vmem:[#allocation13 + $0x118] sm:$0xff]  ;;  %v2900_v31 = vld [vmem:[#allocation13 + $0x110] sm:$0xff] }
 0x3e2   :  { %2888 = vmatpush.msrb.mxu2 %v2741_v59  ;;  %2914 = vmatpush.msrb.mxu3 %v2913_v50  ;;  %v3031_v50 = vld [vmem:[#allocation13 + $0x228] sm:$0xff] }
 0x3e3   :  { %2861 = vmatpush.msrb.mxu1 %v2777_v7 }
 0x3e4   :  { %2889 = vmatpush.msrb.mxu2 %v2740_v52  ;;  %2915 = vmatpush.msrb.mxu3 %v2912_v54  ;;  %v3028_v54 = vld [vmem:[#allocation13 + $0x210] sm:$0xff] }
 0x3e5   :  { %2862 = vmatpush.msrb.mxu1 %v2776_v40  ;;  %v3071_v40 = vld [vmem:[#allocation16 + $0x10] sm:$0xff] }
 0x3e6   :  { %2890 = vmatpush.msrb.mxu2 %v5054_v49  ;;  %2916 = vmatpush.msrb.mxu3 %v2911_v21  ;;  %v3084_v21 = vld [vmem:[#allocation16 + $0x78] sm:$0xff] }
 0x3e7   :  { %2863 = vmatpush.msrb.mxu1 %v2775_v39  ;;  %v3125_v39 = vld [vmem:[#allocation19 + $0x78] sm:$0xff] }
 0x3e8   :  { %2891 = vmatpush.msrb.mxu2 %v5048_v51  ;;  %2917 = vmatpush.msrb.mxu3 %v2910_v35  ;;  %v3081_v35 = vld [vmem:[#allocation16 + $0x60] sm:$0xff] }
 0x3e9   :  { %3344 = vmatmul.msk.f32.vlgmr.msrb.gmra.mxu2 %vm2747_vm6, %v2872_v38  ;;  %2864 = vmatpush.msrb.mxu1 %v2774_v43  ;;  %v2899_v38 = vld [vmem:[#allocation13 + $0x108] sm:$0xff] }
 0x3ea   :  { %2952 = vmatpush.msra.mxu2 %v2741_v59  ;;  %2918 = vmatpush.msrb.mxu3 %v2909_v62  ;;  %v3078_v62 = vld [vmem:[#allocation16 + $0x48] sm:$0xff] }
 0x3eb   :  { %2865 = vmatpush.msrb.mxu1 %v2773_v1  ;;  %v3122_v43 = vld [vmem:[#allocation19 + $0x60] sm:$0xff]  ;;  %v3119_v1 = vld [vmem:[#allocation19 + $0x48] sm:$0xff] }
 0x3ec   :  { %2953 = vmatpush.msra.mxu2 %v2740_v52  ;;  %2919 = vmatpush.msrb.mxu3 %v2908_v53  ;;  %v3075_v53 = vld [vmem:[#allocation16 + $0x30] sm:$0xff] }
 0x3ee   :  { %2954 = vmatpush.msra.mxu2 %v5054_v49  ;;  %2920 = vmatpush.msrb.mxu3 %v2907_v25  ;;  %v3073_v25 = vld [vmem:[#allocation16 + $0x20] sm:$0xff] }
 0x3f0   :  { %2955 = vmatpush.msra.mxu2 %v5048_v51  ;;  %2921 = vmatpush.msrb.mxu3 %v2906_v42 }
 0x3f1   :  { %3345 = vmatmul.msk.f32.vlgmr.msra.gmra.mxu2 %vm2747_vm6, %v2936_v48  ;;  %v5074_v48 = vld [vmem:[#allocation10] ss:$0 sm:$0xff] }
 0x3f2   :  { %2978 = vmatpush.msrb.mxu2 %v2977_v47  ;;  %2922 = vmatpush.msrb.mxu3 %v2905_v32  ;;  %v2898_v47 = vld [vmem:[#allocation13 + $0x100] sm:$0xff]  ;;  %v3070_v32 = vld [vmem:[#allocation16 + $0x8] sm:$0xff] }
 0x3f4   :  { %2979 = vmatpush.msrb.mxu2 %v2976_v36  ;;  %v3041_v36 = vld [vmem:[#allocation13 + $0x278] sm:$0xff] }
 0x3f6   :  { %2980 = vmatpush.msrb.mxu2 %v2975_v28  ;;  %v3040_v28 = vld [vmem:[#allocation13 + $0x270] sm:$0xff] }
 0x3f8   :  { %2981 = vmatpush.msrb.mxu2 %v2974_v45 }
 0x3fa   :  { %2982 = vmatpush.msrb.mxu2 %v2973_v23 }
 0x3fc   :  { %2983 = vmatpush.msrb.mxu2 %v2972_v61  ;;  %v3039_v61 = vld [vmem:[#allocation13 + $0x268] sm:$0xff] }
 0x3fe   :  { %2984 = vmatpush.msrb.mxu2 %v2971_v3 }
 0x400   :  { %2985 = vmatpush.msrb.mxu2 %v2970_v11 }
 0x402   :  { %2986 = vmatpush.msrb.mxu2 %v2969_v60 }
 0x404   :  { %2987 = vmatpush.msrb.mxu2 %v2968_v0 }
 0x406   :  { %2988 = vmatpush.msrb.mxu2 %v2967_v44  ;;  %v3038_v44 = vld [vmem:[#allocation13 + $0x260] sm:$0xff] }
 0x408   :  { %2989 = vmatpush.msrb.mxu2 %v2966_v56  ;;  %v3037_v56 = vld [vmem:[#allocation13 + $0x258] sm:$0xff] }
 0x40a   :  { %2990 = vmatpush.msrb.mxu2 %v2965_v9  ;;  %v3036_v9 = vld [vmem:[#allocation13 + $0x250] sm:$0xff] }
 0x40c   :  { %2991 = vmatpush.msrb.mxu2 %v2964_v12 }
 0x40e   :  { %2992 = vmatpush.msrb.mxu2 %v2963_v14  ;;  %v3035_v14 = vld [vmem:[#allocation13 + $0x248] sm:$0xff] }
 0x410   :  { %2993 = vmatpush.msrb.mxu2 %v2962_v6 }
 0x412   :  { %3016 = vmatpush.msra.mxu2 %v2741_v59  ;;  %v2815_v59 = vld [vmem:[#allocation13 + $0x80] sm:$0xff] }
 0x414   :  { %3017 = vmatpush.msra.mxu2 %v2740_v52  ;;  %v2772_v52 = vld [vmem:[#allocation13] sm:$0xff] }
 0x415   :  { %2866 = vmatpush.msrb.mxu1 %v2772_v52  ;;  %v3116_v52 = vld [vmem:[#allocation19 + $0x30] sm:$0xff] }
 0x416   :  { %3018 = vmatpush.msra.mxu2 %v5054_v49  ;;  %v2904_v49 = vld [vmem:[#allocation13 + $0x130] sm:$0xff] }
 0x417   :  { %2923 = vmatpush.msrb.mxu3 %v2904_v49  ;;  %3042 = vmatpush.msra.mxu1 %v3041_v36  ;;  %v3124_v49 = vld [vmem:[#allocation19 + $0x70] sm:$0xff]  ;;  %v3114_v36 = vld [vmem:[#allocation19 + $0x20] sm:$0xff] }
 0x418   :  { %3019 = vmatpush.msra.mxu2 %v5048_v51  ;;  %v2824_v51 = vld [vmem:[#allocation13 + $0xc8] sm:$0xff] }
 0x419   :  { %2837 = vmatpush.msrb.mxu0 %v2824_v51  ;;  %2924 = vmatpush.msrb.mxu3 %v2903_v5  ;;  %v3083_v51 = vld [vmem:[#allocation16 + $0x70] sm:$0xff]  ;;  %v3121_v5 = vld [vmem:[#allocation19 + $0x58] sm:$0xff] }
 0x41a   :  { %3043 = vmatpush.msra.mxu1 %v3040_v28 }
 0x41b   :  { %2838 = vmatpush.msrb.mxu0 %v2823_v57  ;;  %2925 = vmatpush.msrb.mxu3 %v2902_v2  ;;  %v3080_v57 = vld [vmem:[#allocation16 + $0x58] sm:$0xff]  ;;  %v3118_v2 = vld [vmem:[#allocation19 + $0x40] sm:$0xff] }
 0x41c   :  { %3044 = vmatpush.msra.mxu1 %v3039_v61  ;;  %v3368_v61 = vld [vmem:[#allocation14] ss:$0 sm:$0xff] }
 0x41d   :  { %2839 = vmatpush.msrb.mxu0 %v2822_v30  ;;  %2926 = vmatpush.msrb.mxu3 %v2901_v4  ;;  %v3077_v30 = vld [vmem:[#allocation16 + $0x40] sm:$0xff] }
 0x41e   :  { %3045 = vmatpush.msra.mxu1 %v3038_v44  ;;  %v3112_v44 = vld [vmem:[#allocation19 + $0x10] sm:$0xff] }
 0x41f   :  { %2840 = vmatpush.msrb.mxu0 %v2821_v13  ;;  %2927 = vmatpush.msrb.mxu3 %v2900_v31  ;;  %v3074_v13 = vld [vmem:[#allocation16 + $0x28] sm:$0xff] }
 0x420   :  { %3046 = vmatpush.msra.mxu1 %v3037_v56  ;;  %v3111_v56 = vld [vmem:[#allocation19 + $0x8] sm:$0xff] }
 0x421   :  { %2841 = vmatpush.msrb.mxu0 %v2820_v37  ;;  %2928 = vmatpush.msrb.mxu3 %v2899_v38  ;;  %v3115_v38 = vld [vmem:[#allocation19 + $0x28] sm:$0xff] }
 0x422   :  { %3047 = vmatpush.msra.mxu1 %v3036_v9  ;;  %v3110_v9 = vld [vmem:[#allocation19] sm:$0xff] }
 0x423   :  { %2842 = vmatpush.msrb.mxu0 %v2819_v29  ;;  %2929 = vmatpush.msrb.mxu3 %v2898_v47  ;;  %v3072_v29 = vld [vmem:[#allocation16 + $0x18] sm:$0xff] }
 0x424   :  { %3048 = vmatpush.msra.mxu1 %v3035_v14 }
 0x425   :  { %2843 = vmatpush.msrb.mxu0 %v2818_v19  ;;  %3089 = vmatpush.msra.mxu3 %v3084_v21  ;;  %v3069_v19 = vld [vmem:[#allocation16] sm:$0xff] }
 0x426   :  { %3049 = vmatpush.msra.mxu1 %v3034_v15 }
 0x427   :  { %2844 = vmatpush.msrb.mxu0 %v2817_v17  ;;  %3090 = vmatpush.msra.mxu3 %v3083_v51  ;;  %v3123_v17 = vld [vmem:[#allocation19 + $0x68] sm:$0xff] }
 0x428   :  { %3050 = vmatpush.msra.mxu1 %v3033_v34 }
 0x429   :  { %2845 = vmatpush.msrb.mxu0 %v2816_v18  ;;  %3091 = vmatpush.msra.mxu3 %v3082_v55  ;;  %v3120_v18 = vld [vmem:[#allocation19 + $0x50] sm:$0xff] }
 0x42a   :  { %3051 = vmatpush.msra.mxu1 %v3032_v63 }
 0x42b   :  { %2846 = vmatpush.msrb.mxu0 %v2815_v59  ;;  %3092 = vmatpush.msra.mxu3 %v3081_v35  ;;  %v3117_v59 = vld [vmem:[#allocation19 + $0x38] sm:$0xff] }
 0x42c   :  { %3052 = vmatpush.msra.mxu1 %v3031_v50 }
 0x42d   :  { %3093 = vmatpush.msra.mxu3 %v3080_v57  ;;  %3130 = vmatpush.msra.mxu0 %v3125_v39 }
 0x42e   :  { %3053 = vmatpush.msra.mxu1 %v3030_v26 }
 0x42f   :  { %3094 = vmatpush.msra.mxu3 %v3079_v58  ;;  %3131 = vmatpush.msra.mxu0 %v3124_v49 }
 0x430   :  { %3054 = vmatpush.msra.mxu1 %v3029_v22 }
 0x431   :  { %3095 = vmatpush.msra.mxu3 %v3078_v62  ;;  %3132 = vmatpush.msra.mxu0 %v3123_v17 }
 0x432   :  { %3055 = vmatpush.msra.mxu1 %v3028_v54 }
 0x433   :  { %3096 = vmatpush.msra.mxu3 %v3077_v30  ;;  %3133 = vmatpush.msra.mxu0 %v3122_v43 }
 0x434   :  { %3056 = vmatpush.msra.mxu1 %v3027_v8 }
 0x435   :  { %3097 = vmatpush.msra.mxu3 %v3076_v16  ;;  %3134 = vmatpush.msra.mxu0 %v3121_v5 }
 0x436   :  { %3057 = vmatpush.msra.mxu1 %v3026_v33 }
 0x437   :  { %3098 = vmatpush.msra.mxu3 %v3075_v53  ;;  %3135 = vmatpush.msra.mxu0 %v3120_v18 }
 0x439   :  { %3099 = vmatpush.msra.mxu3 %v3074_v13  ;;  %3136 = vmatpush.msra.mxu0 %v3119_v1 }
 0x43b   :  { %3100 = vmatpush.msra.mxu3 %v3073_v25  ;;  %3137 = vmatpush.msra.mxu0 %v3118_v2 }
 0x43d   :  { %3101 = vmatpush.msra.mxu3 %v3072_v29  ;;  %3138 = vmatpush.msra.mxu0 %v3117_v59 }
 0x43f   :  { %3102 = vmatpush.msra.mxu3 %v3071_v40  ;;  %3139 = vmatpush.msra.mxu0 %v3116_v52 }
 0x441   :  { %3103 = vmatpush.msra.mxu3 %v3070_v32  ;;  %3140 = vmatpush.msra.mxu0 %v3115_v38 }
 0x443   :  { %3104 = vmatpush.msra.mxu3 %v3069_v19  ;;  %3141 = vmatpush.msra.mxu0 %v3114_v36 }
 0x464   :  { %v2768_v45 = vpop.f32.mrf.mxu2  ;;  %v2810_v23 = vpop.f32.mrf.mxu3 }
 0x465   :  { %v2769_v3 = vadd.f32 %v5074_v48, %v2768_v45  ;;  %v2811_v11 = vadd.f32 %v5074_v48, %v2810_v23  ;;  %v3113_v45 = vld [vmem:[#allocation19 + $0x18] sm:$0xff] }
 0x466   :  { %3142 = vmatpush.msra.mxu0 %v3113_v45 }
 0x467   :  { %v2771_v60 = vmax.f32 %v2769_v3, 0.0  ;;  %v2813_v0 = vmax.f32 %v2811_v11, 0.0 }
 0x468   :  { %3143 = vmatpush.msra.mxu0 %v3112_v44 }
 0x469   :  { %2847 = vmatmul.f32.vlgmr.msrb.gmra.mxu0 %v2813_v0  ;;  %2867 = vmatmul.f32.vlgmr.msrb.gmra.mxu1 %v2771_v60 }
 0x46a   :  { %3144 = vmatpush.msra.mxu0 %v3111_v56 }
 0x46c   :  { %v2893_v12 = vpop.f32.mrf.mxu2  ;;  %3145 = vmatpush.msra.mxu0 %v3110_v9 }
 0x46d   :  { %v2894_v6 = vadd.f32 %v5074_v48, %v2893_v12  ;;  %v3369_v12 = vld [vmem:[#allocation17] ss:$0 sm:$0xff] }
 0x46f   :  { %v2896_v20 = vmax.f32 %v2894_v6, 0.0 }
 0x471   :  { %2930 = vmatmul.f32.vlgmr.msrb.gmra.mxu3 %v2896_v20  ;;  %v3370_v20 = vld [vmem:[#allocation20] ss:$0 sm:$0xff] }
 0x474   :  { %v2957_v10 = vpop.f32.mrf.mxu2 }
 0x475   :  { %v2958_v41 = vadd.f32 %v5074_v48, %v2957_v10 }
 0x477   :  { %v2960_v24 = vmax.f32 %v2958_v41, 0.0 }
 0x479   :  { %2994 = vmatmul.f32.vlgmr.msrb.gmra.mxu2 %v2960_v24 }
 0x481   :  { %3346 = vmatmul.msk.f32.vlgmr.msra.gmra.mxu2 %vm2747_vm6, %v3000_v27 }
 0x4e6   :  { %v2848_v4 = vpop.f32.mrf.mxu0  ;;  %v2868_v31 = vpop.f32.mrf.mxu1 }
 0x4f4   :  { %v2931_v47 = vpop.f32.mrf.mxu3 }
 0x4fc   :  { %v2995_v46 = vpop.f32.mrf.mxu2 }
 0x504   :  { %v3021_v37 = vpop.f32.mrf.mxu2 }
 0x505   :  { %v3022_v7 = vadd.f32 %v5074_v48, %v3021_v37  ;;  %v2869_v48 = vadd.f32 %v2868_v31, %v2848_v4 }
 0x507   :  { %v3024_v42 = vmax.f32 %v3022_v7, 0.0  ;;  %v2934_v28 = vadd.f32 %v2931_v47, %v2869_v48 }
 0x509   :  { %3058 = vmatmul.f32.vlgmr.msra.gmra.mxu1 %v3024_v42  ;;  %v2998_v23 = vadd.f32 %v2995_v46, %v2934_v28 }
 0x586   :  { %v3059_v3 = vpop.f32.mrf.mxu1 }
 0x587   :  { %v3062_v11 = vadd.f32 %v3059_v3, %v2998_v23 }
 0x589   :  { %v3067_v60 = vadd.f32 %v3368_v61, %v3062_v11 }
 0x58b   :  { %v3068_v0 = vmax.f32 %v3067_v60, 0.0 }
 0x58d   :  { %3105 = vmatmul.f32.vlgmr.msra.gmra.mxu3 %v3068_v0 }
 0x610   :  { %v3106_v14 = vpop.f32.mrf.mxu3 }
 0x611   :  { %v3107_v6 = vadd.f32 %v3369_v12, %v3106_v14 }
 0x613   :  { %v3109_v15 = vmax.f32 %v3107_v6, 0.0 }
 0x615   :  { %3146 = vmatmul.f32.vlgmr.msra.gmra.mxu0 %v3109_v15 }
 0x692   :  { %v3147_v34 = vpop.f32.mrf.mxu0 }
 0x693   :  { %v3148_v10 = vadd.f32 %v3370_v20, %v3147_v34 }
 0x695   :  { %3150 = vst [vmem:[#allocation22] sm:$0x3] %v3148_v10 }
 0x696   :  { %3161 = dma.vmem_to_hbm [thread:$0]  %s3157_s1, 32, %s3159_s28, [#allocation4]  }
 0x697   :  { %3705 = dma.done.wait [#allocation4], 32  }
 0x698   :  { %3706 = vsyncadd [#allocation4], 4294967264 }
 0x699   :  { %3166 = vsyncpa [#allocation3], 1 }
 0x69a   :  { %3167 = vsyncpa [#allocation6], 1 }
 0x69b   :  { %3168 = vsyncpa [#allocation9], 1 }
 0x69c   :  { %3169 = vsyncpa [#allocation12], 1 }
 0x69d   :  { %3170 = vsyncpa [#allocation15], 1 }
 0x69e   :  { %3171 = vsyncpa [#allocation18], 1 }
 0x69f   :  { %3172 = vsyncpa [#allocation21], 1 }
 0x6a0   :  { %3173 = vsyncpa [#allocation4], 1 }

</bundles_post_ra>
